<compile_context>
chip_gen: v6e
topology: v6e:2x2x1
jax: 0.10.0
libtpu: 0.0.40
codegen_flags: <defaults>
</compile_context>

<pallas_src>
import functools

import numpy as np
import jax
import jax.numpy as jnp
from jax import lax
from jax.experimental import pallas as pl
from jax.experimental.pallas import tpu as pltpu


# --------------------------------------------------------------------------
# Fused kernel: whole DeformAtten2D forward for one batch element per step.
# --------------------------------------------------------------------------
def _deform_atten_kernel(x_ref, wq_ref, bq_ref, w12_ref, b12_ref, sh_ref,
                         grid_ref, wkv_ref, bkv_ref, rpb_ref, mask_ref,
                         perm_ref, woutT_ref, bout_ref, o_ref, *,
                         H, W, C, ksize, scale, off_factor):
    HW = H * W
    f32 = jnp.float32
    bf16 = jnp.bfloat16

    def bdot(a, b):  # bf16 MXU inputs, f32 accumulation
        return jnp.dot(a.astype(bf16), b.astype(bf16),
                       preferred_element_type=f32)

    x = x_ref[0]                                            # (C, HW) chan-major

    # ---- q = proj_q(x): 1x1 conv == channel-mixing matmul -----------------
    q = jnp.dot(wq_ref[...], x, preferred_element_type=f32) + bq_ref[...]

    # ---- offset = proj_offset(q): kxk conv + 1x1 conv, folded on host -----
    # off = b12 + sum_taps W12_tap @ q @ Shift_tap   (q never leaves VMEM)
    off = jnp.zeros((2, HW), f32)
    for j in range(ksize * ksize):
        t = jnp.dot(w12_ref[j], q, preferred_element_type=f32)      # (2, HW)
        off = off + jnp.dot(t, sh_ref[j], preferred_element_type=f32)
    off = off + b12_ref[...]
    off = jnp.tanh(off) * off_factor                        # (2, HW)

    # ---- bilinear sampling matrix (HW_src x HW_dst), grid_sample semantics
    gx = grid_ref[0:1, :] + off[0:1, :]                     # x / column coord
    gy = grid_ref[1:2, :] + off[1:2, :]                     # y / row coord
    # normalize_grid: reference divides x-coord by (H-1), y-coord by (W-1)
    gxn = 2.0 * gx / max(H - 1, 1) - 1.0
    gyn = 2.0 * gy / max(W - 1, 1) - 1.0
    # grid_sample, bilinear, padding_mode='zeros', align_corners=False
    ix = ((gxn + 1.0) * W - 1.0) * 0.5
    iy = ((gyn + 1.0) * H - 1.0) * 0.5
    x0 = jnp.floor(ix)
    x1 = x0 + 1.0
    y0 = jnp.floor(iy)
    y1 = y0 + 1.0
    wx1 = ix - x0
    wx0 = 1.0 - wx1
    wy1 = iy - y0
    wy0 = 1.0 - wy1

    src = lax.broadcasted_iota(jnp.int32, (HW, HW), 0)      # source flat index

    def corner(xc, yc, wgt):
        valid = ((xc >= 0.0) & (xc <= W - 1.0) &
                 (yc >= 0.0) & (yc <= H - 1.0)).astype(f32)
        idx = (jnp.clip(yc, 0.0, H - 1.0).astype(jnp.int32) * W
               + jnp.clip(xc, 0.0, W - 1.0).astype(jnp.int32))       # (1, HW)
        return (src == idx).astype(f32) * (wgt * valid)              # (HW, HW)

    samp = (corner(x0, y0, wx0 * wy0) + corner(x1, y0, wx1 * wy0)
            + corner(x0, y1, wx0 * wy1) + corner(x1, y1, wx1 * wy1))

    xs = bdot(x, samp)                                      # (C, HW) x_sampled

    # ---- fused k/v projection + relative position bias --------------------
    kv = bdot(wkv_ref[...], xs) + bkv_ref[...]              # (2C, HW)
    k = kv[0:C, :]
    v = kv[C:2 * C, :] + rpb_ref[...]

    # ---- head-packed (H*C, W) layout: row (i*C + c) = head c, position i --
    def headpack(a):                                        # (C, HW) -> (H*C, W)
        return jnp.concatenate(
            [a[:, i * W:(i + 1) * W] for i in range(H)], axis=0)

    q2 = headpack(q)
    k2 = headpack(k)
    v2 = headpack(v)

    # ---- all heads in one matmul with block-diagonal head mask ------------
    s = lax.dot_general(q2.astype(bf16), k2.astype(bf16),
                        (((1,), (1,)), ((), ())),
                        preferred_element_type=f32)         # (HC, HC)
    s = s * scale + mask_ref[...]
    m = jnp.max(s, axis=-1, keepdims=True)
    p = jnp.exp(s - m)
    attn = p * pl.reciprocal(jnp.sum(p, axis=-1, keepdims=True), approx=True)
    out = bdot(attn, v2)                                    # (HC, W), rows (i, c)

    # ---- literal out.reshape(B, H, W, C) (row permutation) + proj_out -----
    out = jnp.dot(perm_ref[...], out, preferred_element_type=f32)   # rows (c, i)
    y = jnp.dot(out, woutT_ref[...], preferred_element_type=f32) + bout_ref[...]
    o_ref[0] = y                                            # (HW, C)


# --------------------------------------------------------------------------
# Wrapper: host-side constant/operator prep + one pallas_call.
# --------------------------------------------------------------------------
def deform_atten2d_forward(params, x, *, kernel, offset_range_factor,
                           d_model, n_heads):
    B, H, W, C = x.shape
    HW = H * W
    pad = kernel // 2

    # Constraints the reference forward implicitly requires (assert loudly
    # instead of silently producing scrambled results).
    assert n_heads == d_model and C == d_model
    assert H == W == C, "literal out.reshape(B,H,W,C) relabeling needs H==W==C"
    assert params["rpb"].shape[2] == H, "rpb broadcast needs seq_len == H"

    # ---- compile-time constant operators (numpy) --------------------------
    hh, ww = np.meshgrid(np.arange(H), np.arange(W), indexing="ij")
    basegrid = np.stack([ww.reshape(-1), hh.reshape(-1)], 0).astype(np.float32)

    shifts = np.zeros((kernel * kernel, HW, HW), np.float32)
    for a in range(kernel):
        for b in range(kernel):
            sh, sw = hh + a - pad, ww + b - pad
            ok = (sh >= 0) & (sh < H) & (sw >= 0) & (sw < W)
            shifts[a * kernel + b, (sh * W + sw)[ok], (hh * W + ww)[ok]] = 1.0

    rr = np.arange(H * C)
    attn_mask = np.where((rr[:, None] % C) == (rr[None, :] % C),
                         0.0, -1e30).astype(np.float32)

    perm = np.zeros((HW, HW), np.float32)                   # (i,c)-rows -> (c,i)-rows
    cc, ii = np.meshgrid(np.arange(C), np.arange(H), indexing="ij")
    perm[(cc * W + ii).reshape(-1), (ii * C + cc).reshape(-1)] = 1.0

    # ---- parameter preprocessing (tiny, fused by XLA) ----------------------
    wq = params["wq"].reshape(C, C)
    bq = params["bq"].reshape(C, 1)
    w2m = params["w_off2"].reshape(2, C)
    w12 = jnp.einsum("oc,cdab->abod", w2m,
                     params["w_off1"]).reshape(kernel * kernel, 2, C)
    b12 = (w2m @ params["b_off1"]).reshape(2, 1)
    wkv = jnp.concatenate([params["wk"].reshape(C, C),
                           params["wv"].reshape(C, C)], axis=0)      # (2C, C)
    bkv = jnp.concatenate([params["bk"], params["bv"]]).reshape(2 * C, 1)
    rpb_cm = jnp.repeat(params["rpb"][0, :, :, 0], W, axis=1)        # (C, HW)
    woutT = params["w_out"].T
    bout = params["b_out"].reshape(1, C)

    x_cm = jnp.transpose(x, (0, 3, 1, 2)).reshape(B, C, HW)          # boundary only

    kern = functools.partial(
        _deform_atten_kernel, H=H, W=W, C=C, ksize=kernel,
        scale=float(d_model) ** -0.5, off_factor=float(offset_range_factor))

    def _const(shape):
        return pl.BlockSpec(shape, lambda b, _n=len(shape): (0,) * _n)

    out = pl.pallas_call(
        kern,
        out_shape=jax.ShapeDtypeStruct((B, HW, C), jnp.float32),
        grid=(B,),
        in_specs=[
            pl.BlockSpec((1, C, HW), lambda b: (b, 0, 0)),   # x (channel-major)
            _const((C, C)), _const((C, 1)),                  # wq, bq
            _const((kernel * kernel, 2, C)), _const((2, 1)), # folded offset conv
            _const((kernel * kernel, HW, HW)),               # shift operators
            _const((2, HW)),                                 # base grid
            _const((2 * C, C)), _const((2 * C, 1)),          # fused k/v proj
            _const((C, HW)),                                 # rpb
            _const((HW, HW)), _const((HW, HW)),              # head mask, out perm
            _const((C, C)), _const((1, C)),                  # out proj
        ],
        out_specs=pl.BlockSpec((1, HW, C), lambda b: (b, 0, 0)),
        compiler_params=pltpu.CompilerParams(
            dimension_semantics=("parallel",)),
    )(x_cm,
      wq.astype(jnp.float32), bq.astype(jnp.float32),
      w12.astype(jnp.float32), b12.astype(jnp.float32),
      jnp.asarray(shifts), jnp.asarray(basegrid),
      wkv.astype(jnp.float32), bkv.astype(jnp.float32),
      rpb_cm.astype(jnp.float32),
      jnp.asarray(attn_mask), jnp.asarray(perm),
      woutT.astype(jnp.float32), bout.astype(jnp.float32))

    return out.reshape(B, H, W, C)


# --------------------------------------------------------------------------
# Deterministic synthetic parameter init (shapes from the module's __init__)
# --------------------------------------------------------------------------
def init_params(key, d_model, seq_len, kernel):
    C = d_model
    keys = jax.random.split(key, 12)

    def w(k_, shape, s):
        return jax.random.normal(k_, shape, jnp.float32) * s

    return dict(
        wq=w(keys[0], (C, C, 1, 1), 0.1),  bq=w(keys[1], (C,), 0.05),
        wk=w(keys[2], (C, C, 1, 1), 0.1),  bk=w(keys[3], (C,), 0.05),
        wv=w(keys[4], (C, C, 1, 1), 0.1),  bv=w(keys[5], (C,), 0.05),
        # proj_offset: Conv2d(C, C, k, pad=k//2) + Conv2d(C, 2, 1, bias=False)
        w_off1=w(keys[6], (C, C, kernel, kernel), 0.05),
        b_off1=w(keys[7], (C,), 0.05),
        w_off2=w(keys[8], (2, C, 1, 1), 0.1),
        # proj_out: Linear(d_model, d_model)
        w_out=w(keys[9], (C, C), 0.1), b_out=w(keys[10], (C,), 0.05),
        # relative_position_bias_table: (1, d_model, seq_len, 1), std=0.02
        rpb=w(keys[11], (1, C, seq_len, 1), 0.02),
    )


if __name__ == "__main__":
    B, H, W = 2, 8, 8
    d_model = 8
    n_heads = 8      # forward's q.reshape(B*n_heads, H, W) requires n_heads == d_model
    seq_len = H      # rpb table broadcasts over the H axis
    kernel = 5

    key = jax.random.PRNGKey(0)
    kx, kp = jax.random.split(key)
    x = jax.random.normal(kx, (B, H, W, d_model), jnp.float32)
    params = init_params(kp, d_model, seq_len, kernel)

    fwd = jax.jit(functools.partial(
        deform_atten2d_forward,
        kernel=kernel, offset_range_factor=kernel,
        d_model=d_model, n_heads=n_heads))

    y = fwd(params, x)
    jax.block_until_ready(y)
    assert y.shape == (B, H, W, d_model)
    assert bool(jnp.all(jnp.isfinite(y)))
    print("KERNEL_OK")
</pallas_src>

<mosaic_0001>
module attributes {stable_mosaic.version = 11 : i64} {
  func.func @_deform_atten_kernel(%arg0: i32, %arg1: memref<1x8x64xf32, #tpu.memory_space<vmem>>, %arg2: memref<8x8xf32, #tpu.memory_space<vmem>>, %arg3: memref<8x1xf32, #tpu.memory_space<vmem>>, %arg4: memref<25x2x8xf32, #tpu.memory_space<vmem>>, %arg5: memref<2x1xf32, #tpu.memory_space<vmem>>, %arg6: memref<25x64x64xf32, #tpu.memory_space<vmem>>, %arg7: memref<2x64xf32, #tpu.memory_space<vmem>>, %arg8: memref<16x8xf32, #tpu.memory_space<vmem>>, %arg9: memref<16x1xf32, #tpu.memory_space<vmem>>, %arg10: memref<8x64xf32, #tpu.memory_space<vmem>>, %arg11: memref<64x64xf32, #tpu.memory_space<vmem>>, %arg12: memref<64x64xf32, #tpu.memory_space<vmem>>, %arg13: memref<8x8xf32, #tpu.memory_space<vmem>>, %arg14: memref<1x8xf32, #tpu.memory_space<vmem>>, %arg15: memref<1x64x8xf32, #tpu.memory_space<vmem>>) attributes {dimension_semantics = [#tpu.dimension_semantics<parallel>], iteration_bounds = array<i64: 2>, scalar_prefetch = 0 : i64, scratch_operands = 0 : i64, tpu.core_type = #tpu.core_type<tc>, window_params = [{transform_indices = @transform_0, window_bounds = array<i64: 1, 8, 64>}, {pipeline_mode = #tpu.pipeline_mode<synchronous>, transform_indices = @transform_1, window_bounds = array<i64: 8, 8>}, {pipeline_mode = #tpu.pipeline_mode<synchronous>, transform_indices = @transform_2, window_bounds = array<i64: 8, 1>}, {pipeline_mode = #tpu.pipeline_mode<synchronous>, transform_indices = @transform_3, window_bounds = array<i64: 25, 2, 8>}, {pipeline_mode = #tpu.pipeline_mode<synchronous>, transform_indices = @transform_4, window_bounds = array<i64: 2, 1>}, {pipeline_mode = #tpu.pipeline_mode<synchronous>, transform_indices = @transform_5, window_bounds = array<i64: 25, 64, 64>}, {pipeline_mode = #tpu.pipeline_mode<synchronous>, transform_indices = @transform_6, window_bounds = array<i64: 2, 64>}, {pipeline_mode = #tpu.pipeline_mode<synchronous>, transform_indices = @transform_7, window_bounds = array<i64: 16, 8>}, {pipeline_mode = #tpu.pipeline_mode<synchronous>, transform_indices = @transform_8, window_bounds = array<i64: 16, 1>}, {pipeline_mode = #tpu.pipeline_mode<synchronous>, transform_indices = @transform_9, window_bounds = array<i64: 8, 64>}, {pipeline_mode = #tpu.pipeline_mode<synchronous>, transform_indices = @transform_10, window_bounds = array<i64: 64, 64>}, {pipeline_mode = #tpu.pipeline_mode<synchronous>, transform_indices = @transform_11, window_bounds = array<i64: 64, 64>}, {pipeline_mode = #tpu.pipeline_mode<synchronous>, transform_indices = @transform_12, window_bounds = array<i64: 8, 8>}, {pipeline_mode = #tpu.pipeline_mode<synchronous>, transform_indices = @transform_13, window_bounds = array<i64: 1, 8>}, {transform_indices = @transform_14, window_bounds = array<i64: 1, 64, 8>}]} {
    %c0 = arith.constant 0 : index
    %c0_0 = arith.constant 0 : index
    %c0_1 = arith.constant 0 : index
    %0 = vector.load %arg1[%c0, %c0_0, %c0_1] : memref<1x8x64xf32, #tpu.memory_space<vmem>>, vector<1x8x64xf32>
    %1 = vector.shape_cast %0 : vector<1x8x64xf32> to vector<8x64xf32>
    %c0_2 = arith.constant 0 : index
    %c0_3 = arith.constant 0 : index
    %2 = vector.load %arg2[%c0_2, %c0_3] : memref<8x8xf32, #tpu.memory_space<vmem>>, vector<8x8xf32>
    %cst = arith.constant dense<0.000000e+00> : vector<8x64xf32>
    %3 = tpu.matmul %2, %1, %cst {dimension_numbers = #tpu.dot_dimension_numbers<[1], [0], [0], [1], [0, 0, 1, 1], [], []>} : vector<8x8xf32>, vector<8x64xf32>, vector<8x64xf32> -> vector<8x64xf32>
    %c0_4 = arith.constant 0 : index
    %c0_5 = arith.constant 0 : index
    %4 = vector.load %arg3[%c0_4, %c0_5] : memref<8x1xf32, #tpu.memory_space<vmem>>, vector<8x1xf32>
    %5 = vector.broadcast %4 : vector<8x1xf32> to vector<8x64xf32>
    %6 = arith.addf %3, %5 : vector<8x64xf32>
    %cst_6 = arith.constant 0.000000e+00 : f32
    %7 = vector.broadcast %cst_6 : f32 to vector<2x64xf32>
    %c0_7 = arith.constant 0 : index
    %c0_8 = arith.constant 0 : index
    %c0_9 = arith.constant 0 : index
    %8 = vector.load %arg4[%c0_7, %c0_8, %c0_9] : memref<25x2x8xf32, #tpu.memory_space<vmem>>, vector<1x2x8xf32>
    %9 = vector.shape_cast %8 : vector<1x2x8xf32> to vector<2x8xf32>
    %cst_10 = arith.constant dense<0.000000e+00> : vector<2x64xf32>
    %10 = tpu.matmul %9, %6, %cst_10 {dimension_numbers = #tpu.dot_dimension_numbers<[1], [0], [0], [1], [0, 0, 1, 1], [], []>} : vector<2x8xf32>, vector<8x64xf32>, vector<2x64xf32> -> vector<2x64xf32>
    %c0_11 = arith.constant 0 : index
    %c0_12 = arith.constant 0 : index
    %c0_13 = arith.constant 0 : index
    %11 = vector.load %arg6[%c0_11, %c0_12, %c0_13] : memref<25x64x64xf32, #tpu.memory_space<vmem>>, vector<1x64x64xf32>
    %12 = vector.shape_cast %11 : vector<1x64x64xf32> to vector<64x64xf32>
    %cst_14 = arith.constant dense<0.000000e+00> : vector<2x64xf32>
    %13 = tpu.matmul %10, %12, %cst_14 {dimension_numbers = #tpu.dot_dimension_numbers<[1], [0], [0], [1], [0, 0, 1, 1], [], []>} : vector<2x64xf32>, vector<64x64xf32>, vector<2x64xf32> -> vector<2x64xf32>
    %14 = arith.addf %7, %13 : vector<2x64xf32>
    %c1 = arith.constant 1 : index
    %c0_15 = arith.constant 0 : index
    %c0_16 = arith.constant 0 : index
    %15 = vector.load %arg4[%c1, %c0_15, %c0_16] : memref<25x2x8xf32, #tpu.memory_space<vmem>>, vector<1x2x8xf32>
    %16 = vector.shape_cast %15 : vector<1x2x8xf32> to vector<2x8xf32>
    %cst_17 = arith.constant dense<0.000000e+00> : vector<2x64xf32>
    %17 = tpu.matmul %16, %6, %cst_17 {dimension_numbers = #tpu.dot_dimension_numbers<[1], [0], [0], [1], [0, 0, 1, 1], [], []>} : vector<2x8xf32>, vector<8x64xf32>, vector<2x64xf32> -> vector<2x64xf32>
    %c1_18 = arith.constant 1 : index
    %c0_19 = arith.constant 0 : index
    %c0_20 = arith.constant 0 : index
    %18 = vector.load %arg6[%c1_18, %c0_19, %c0_20] : memref<25x64x64xf32, #tpu.memory_space<vmem>>, vector<1x64x64xf32>
    %19 = vector.shape_cast %18 : vector<1x64x64xf32> to vector<64x64xf32>
    %cst_21 = arith.constant dense<0.000000e+00> : vector<2x64xf32>
    %20 = tpu.matmul %17, %19, %cst_21 {dimension_numbers = #tpu.dot_dimension_numbers<[1], [0], [0], [1], [0, 0, 1, 1], [], []>} : vector<2x64xf32>, vector<64x64xf32>, vector<2x64xf32> -> vector<2x64xf32>
    %21 = arith.addf %14, %20 : vector<2x64xf32>
    %c2 = arith.constant 2 : index
    %c0_22 = arith.constant 0 : index
    %c0_23 = arith.constant 0 : index
    %22 = vector.load %arg4[%c2, %c0_22, %c0_23] : memref<25x2x8xf32, #tpu.memory_space<vmem>>, vector<1x2x8xf32>
    %23 = vector.shape_cast %22 : vector<1x2x8xf32> to vector<2x8xf32>
    %cst_24 = arith.constant dense<0.000000e+00> : vector<2x64xf32>
    %24 = tpu.matmul %23, %6, %cst_24 {dimension_numbers = #tpu.dot_dimension_numbers<[1], [0], [0], [1], [0, 0, 1, 1], [], []>} : vector<2x8xf32>, vector<8x64xf32>, vector<2x64xf32> -> vector<2x64xf32>
    %c2_25 = arith.constant 2 : index
    %c0_26 = arith.constant 0 : index
    %c0_27 = arith.constant 0 : index
    %25 = vector.load %arg6[%c2_25, %c0_26, %c0_27] : memref<25x64x64xf32, #tpu.memory_space<vmem>>, vector<1x64x64xf32>
    %26 = vector.shape_cast %25 : vector<1x64x64xf32> to vector<64x64xf32>
    %cst_28 = arith.constant dense<0.000000e+00> : vector<2x64xf32>
    %27 = tpu.matmul %24, %26, %cst_28 {dimension_numbers = #tpu.dot_dimension_numbers<[1], [0], [0], [1], [0, 0, 1, 1], [], []>} : vector<2x64xf32>, vector<64x64xf32>, vector<2x64xf32> -> vector<2x64xf32>
    %28 = arith.addf %21, %27 : vector<2x64xf32>
    %c3 = arith.constant 3 : index
    %c0_29 = arith.constant 0 : index
    %c0_30 = arith.constant 0 : index
    %29 = vector.load %arg4[%c3, %c0_29, %c0_30] : memref<25x2x8xf32, #tpu.memory_space<vmem>>, vector<1x2x8xf32>
    %30 = vector.shape_cast %29 : vector<1x2x8xf32> to vector<2x8xf32>
    %cst_31 = arith.constant dense<0.000000e+00> : vector<2x64xf32>
    %31 = tpu.matmul %30, %6, %cst_31 {dimension_numbers = #tpu.dot_dimension_numbers<[1], [0], [0], [1], [0, 0, 1, 1], [], []>} : vector<2x8xf32>, vector<8x64xf32>, vector<2x64xf32> -> vector<2x64xf32>
    %c3_32 = arith.constant 3 : index
    %c0_33 = arith.constant 0 : index
    %c0_34 = arith.constant 0 : index
    %32 = vector.load %arg6[%c3_32, %c0_33, %c0_34] : memref<25x64x64xf32, #tpu.memory_space<vmem>>, vector<1x64x64xf32>
    %33 = vector.shape_cast %32 : vector<1x64x64xf32> to vector<64x64xf32>
    %cst_35 = arith.constant dense<0.000000e+00> : vector<2x64xf32>
    %34 = tpu.matmul %31, %33, %cst_35 {dimension_numbers = #tpu.dot_dimension_numbers<[1], [0], [0], [1], [0, 0, 1, 1], [], []>} : vector<2x64xf32>, vector<64x64xf32>, vector<2x64xf32> -> vector<2x64xf32>
    %35 = arith.addf %28, %34 : vector<2x64xf32>
    %c4 = arith.constant 4 : index
    %c0_36 = arith.constant 0 : index
    %c0_37 = arith.constant 0 : index
    %36 = vector.load %arg4[%c4, %c0_36, %c0_37] : memref<25x2x8xf32, #tpu.memory_space<vmem>>, vector<1x2x8xf32>
    %37 = vector.shape_cast %36 : vector<1x2x8xf32> to vector<2x8xf32>
    %cst_38 = arith.constant dense<0.000000e+00> : vector<2x64xf32>
    %38 = tpu.matmul %37, %6, %cst_38 {dimension_numbers = #tpu.dot_dimension_numbers<[1], [0], [0], [1], [0, 0, 1, 1], [], []>} : vector<2x8xf32>, vector<8x64xf32>, vector<2x64xf32> -> vector<2x64xf32>
    %c4_39 = arith.constant 4 : index
    %c0_40 = arith.constant 0 : index
    %c0_41 = arith.constant 0 : index
    %39 = vector.load %arg6[%c4_39, %c0_40, %c0_41] : memref<25x64x64xf32, #tpu.memory_space<vmem>>, vector<1x64x64xf32>
    %40 = vector.shape_cast %39 : vector<1x64x64xf32> to vector<64x64xf32>
    %cst_42 = arith.constant dense<0.000000e+00> : vector<2x64xf32>
    %41 = tpu.matmul %38, %40, %cst_42 {dimension_numbers = #tpu.dot_dimension_numbers<[1], [0], [0], [1], [0, 0, 1, 1], [], []>} : vector<2x64xf32>, vector<64x64xf32>, vector<2x64xf32> -> vector<2x64xf32>
    %42 = arith.addf %35, %41 : vector<2x64xf32>
    %c5 = arith.constant 5 : index
    %c0_43 = arith.constant 0 : index
    %c0_44 = arith.constant 0 : index
    %43 = vector.load %arg4[%c5, %c0_43, %c0_44] : memref<25x2x8xf32, #tpu.memory_space<vmem>>, vector<1x2x8xf32>
    %44 = vector.shape_cast %43 : vector<1x2x8xf32> to vector<2x8xf32>
    %cst_45 = arith.constant dense<0.000000e+00> : vector<2x64xf32>
    %45 = tpu.matmul %44, %6, %cst_45 {dimension_numbers = #tpu.dot_dimension_numbers<[1], [0], [0], [1], [0, 0, 1, 1], [], []>} : vector<2x8xf32>, vector<8x64xf32>, vector<2x64xf32> -> vector<2x64xf32>
    %c5_46 = arith.constant 5 : index
    %c0_47 = arith.constant 0 : index
    %c0_48 = arith.constant 0 : index
    %46 = vector.load %arg6[%c5_46, %c0_47, %c0_48] : memref<25x64x64xf32, #tpu.memory_space<vmem>>, vector<1x64x64xf32>
    %47 = vector.shape_cast %46 : vector<1x64x64xf32> to vector<64x64xf32>
    %cst_49 = arith.constant dense<0.000000e+00> : vector<2x64xf32>
    %48 = tpu.matmul %45, %47, %cst_49 {dimension_numbers = #tpu.dot_dimension_numbers<[1], [0], [0], [1], [0, 0, 1, 1], [], []>} : vector<2x64xf32>, vector<64x64xf32>, vector<2x64xf32> -> vector<2x64xf32>
    %49 = arith.addf %42, %48 : vector<2x64xf32>
    %c6 = arith.constant 6 : index
    %c0_50 = arith.constant 0 : index
    %c0_51 = arith.constant 0 : index
    %50 = vector.load %arg4[%c6, %c0_50, %c0_51] : memref<25x2x8xf32, #tpu.memory_space<vmem>>, vector<1x2x8xf32>
    %51 = vector.shape_cast %50 : vector<1x2x8xf32> to vector<2x8xf32>
    %cst_52 = arith.constant dense<0.000000e+00> : vector<2x64xf32>
    %52 = tpu.matmul %51, %6, %cst_52 {dimension_numbers = #tpu.dot_dimension_numbers<[1], [0], [0], [1], [0, 0, 1, 1], [], []>} : vector<2x8xf32>, vector<8x64xf32>, vector<2x64xf32> -> vector<2x64xf32>
    %c6_53 = arith.constant 6 : index
    %c0_54 = arith.constant 0 : index
    %c0_55 = arith.constant 0 : index
    %53 = vector.load %arg6[%c6_53, %c0_54, %c0_55] : memref<25x64x64xf32, #tpu.memory_space<vmem>>, vector<1x64x64xf32>
    %54 = vector.shape_cast %53 : vector<1x64x64xf32> to vector<64x64xf32>
    %cst_56 = arith.constant dense<0.000000e+00> : vector<2x64xf32>
    %55 = tpu.matmul %52, %54, %cst_56 {dimension_numbers = #tpu.dot_dimension_numbers<[1], [0], [0], [1], [0, 0, 1, 1], [], []>} : vector<2x64xf32>, vector<64x64xf32>, vector<2x64xf32> -> vector<2x64xf32>
    %56 = arith.addf %49, %55 : vector<2x64xf32>
    %c7 = arith.constant 7 : index
    %c0_57 = arith.constant 0 : index
    %c0_58 = arith.constant 0 : index
    %57 = vector.load %arg4[%c7, %c0_57, %c0_58] : memref<25x2x8xf32, #tpu.memory_space<vmem>>, vector<1x2x8xf32>
    %58 = vector.shape_cast %57 : vector<1x2x8xf32> to vector<2x8xf32>
    %cst_59 = arith.constant dense<0.000000e+00> : vector<2x64xf32>
    %59 = tpu.matmul %58, %6, %cst_59 {dimension_numbers = #tpu.dot_dimension_numbers<[1], [0], [0], [1], [0, 0, 1, 1], [], []>} : vector<2x8xf32>, vector<8x64xf32>, vector<2x64xf32> -> vector<2x64xf32>
    %c7_60 = arith.constant 7 : index
    %c0_61 = arith.constant 0 : index
    %c0_62 = arith.constant 0 : index
    %60 = vector.load %arg6[%c7_60, %c0_61, %c0_62] : memref<25x64x64xf32, #tpu.memory_space<vmem>>, vector<1x64x64xf32>
    %61 = vector.shape_cast %60 : vector<1x64x64xf32> to vector<64x64xf32>
    %cst_63 = arith.constant dense<0.000000e+00> : vector<2x64xf32>
    %62 = tpu.matmul %59, %61, %cst_63 {dimension_numbers = #tpu.dot_dimension_numbers<[1], [0], [0], [1], [0, 0, 1, 1], [], []>} : vector<2x64xf32>, vector<64x64xf32>, vector<2x64xf32> -> vector<2x64xf32>
    %63 = arith.addf %56, %62 : vector<2x64xf32>
    %c8 = arith.constant 8 : index
    %c0_64 = arith.constant 0 : index
    %c0_65 = arith.constant 0 : index
    %64 = vector.load %arg4[%c8, %c0_64, %c0_65] : memref<25x2x8xf32, #tpu.memory_space<vmem>>, vector<1x2x8xf32>
    %65 = vector.shape_cast %64 : vector<1x2x8xf32> to vector<2x8xf32>
    %cst_66 = arith.constant dense<0.000000e+00> : vector<2x64xf32>
    %66 = tpu.matmul %65, %6, %cst_66 {dimension_numbers = #tpu.dot_dimension_numbers<[1], [0], [0], [1], [0, 0, 1, 1], [], []>} : vector<2x8xf32>, vector<8x64xf32>, vector<2x64xf32> -> vector<2x64xf32>
    %c8_67 = arith.constant 8 : index
    %c0_68 = arith.constant 0 : index
    %c0_69 = arith.constant 0 : index
    %67 = vector.load %arg6[%c8_67, %c0_68, %c0_69] : memref<25x64x64xf32, #tpu.memory_space<vmem>>, vector<1x64x64xf32>
    %68 = vector.shape_cast %67 : vector<1x64x64xf32> to vector<64x64xf32>
    %cst_70 = arith.constant dense<0.000000e+00> : vector<2x64xf32>
    %69 = tpu.matmul %66, %68, %cst_70 {dimension_numbers = #tpu.dot_dimension_numbers<[1], [0], [0], [1], [0, 0, 1, 1], [], []>} : vector<2x64xf32>, vector<64x64xf32>, vector<2x64xf32> -> vector<2x64xf32>
    %70 = arith.addf %63, %69 : vector<2x64xf32>
    %c9 = arith.constant 9 : index
    %c0_71 = arith.constant 0 : index
    %c0_72 = arith.constant 0 : index
    %71 = vector.load %arg4[%c9, %c0_71, %c0_72] : memref<25x2x8xf32, #tpu.memory_space<vmem>>, vector<1x2x8xf32>
    %72 = vector.shape_cast %71 : vector<1x2x8xf32> to vector<2x8xf32>
    %cst_73 = arith.constant dense<0.000000e+00> : vector<2x64xf32>
    %73 = tpu.matmul %72, %6, %cst_73 {dimension_numbers = #tpu.dot_dimension_numbers<[1], [0], [0], [1], [0, 0, 1, 1], [], []>} : vector<2x8xf32>, vector<8x64xf32>, vector<2x64xf32> -> vector<2x64xf32>
    %c9_74 = arith.constant 9 : index
    %c0_75 = arith.constant 0 : index
    %c0_76 = arith.constant 0 : index
    %74 = vector.load %arg6[%c9_74, %c0_75, %c0_76] : memref<25x64x64xf32, #tpu.memory_space<vmem>>, vector<1x64x64xf32>
    %75 = vector.shape_cast %74 : vector<1x64x64xf32> to vector<64x64xf32>
    %cst_77 = arith.constant dense<0.000000e+00> : vector<2x64xf32>
    %76 = tpu.matmul %73, %75, %cst_77 {dimension_numbers = #tpu.dot_dimension_numbers<[1], [0], [0], [1], [0, 0, 1, 1], [], []>} : vector<2x64xf32>, vector<64x64xf32>, vector<2x64xf32> -> vector<2x64xf32>
    %77 = arith.addf %70, %76 : vector<2x64xf32>
    %c10 = arith.constant 10 : index
    %c0_78 = arith.constant 0 : index
    %c0_79 = arith.constant 0 : index
    %78 = vector.load %arg4[%c10, %c0_78, %c0_79] : memref<25x2x8xf32, #tpu.memory_space<vmem>>, vector<1x2x8xf32>
    %79 = vector.shape_cast %78 : vector<1x2x8xf32> to vector<2x8xf32>
    %cst_80 = arith.constant dense<0.000000e+00> : vector<2x64xf32>
    %80 = tpu.matmul %79, %6, %cst_80 {dimension_numbers = #tpu.dot_dimension_numbers<[1], [0], [0], [1], [0, 0, 1, 1], [], []>} : vector<2x8xf32>, vector<8x64xf32>, vector<2x64xf32> -> vector<2x64xf32>
    %c10_81 = arith.constant 10 : index
    %c0_82 = arith.constant 0 : index
    %c0_83 = arith.constant 0 : index
    %81 = vector.load %arg6[%c10_81, %c0_82, %c0_83] : memref<25x64x64xf32, #tpu.memory_space<vmem>>, vector<1x64x64xf32>
    %82 = vector.shape_cast %81 : vector<1x64x64xf32> to vector<64x64xf32>
    %cst_84 = arith.constant dense<0.000000e+00> : vector<2x64xf32>
    %83 = tpu.matmul %80, %82, %cst_84 {dimension_numbers = #tpu.dot_dimension_numbers<[1], [0], [0], [1], [0, 0, 1, 1], [], []>} : vector<2x64xf32>, vector<64x64xf32>, vector<2x64xf32> -> vector<2x64xf32>
    %84 = arith.addf %77, %83 : vector<2x64xf32>
    %c11 = arith.constant 11 : index
    %c0_85 = arith.constant 0 : index
    %c0_86 = arith.constant 0 : index
    %85 = vector.load %arg4[%c11, %c0_85, %c0_86] : memref<25x2x8xf32, #tpu.memory_space<vmem>>, vector<1x2x8xf32>
    %86 = vector.shape_cast %85 : vector<1x2x8xf32> to vector<2x8xf32>
    %cst_87 = arith.constant dense<0.000000e+00> : vector<2x64xf32>
    %87 = tpu.matmul %86, %6, %cst_87 {dimension_numbers = #tpu.dot_dimension_numbers<[1], [0], [0], [1], [0, 0, 1, 1], [], []>} : vector<2x8xf32>, vector<8x64xf32>, vector<2x64xf32> -> vector<2x64xf32>
    %c11_88 = arith.constant 11 : index
    %c0_89 = arith.constant 0 : index
    %c0_90 = arith.constant 0 : index
    %88 = vector.load %arg6[%c11_88, %c0_89, %c0_90] : memref<25x64x64xf32, #tpu.memory_space<vmem>>, vector<1x64x64xf32>
    %89 = vector.shape_cast %88 : vector<1x64x64xf32> to vector<64x64xf32>
    %cst_91 = arith.constant dense<0.000000e+00> : vector<2x64xf32>
    %90 = tpu.matmul %87, %89, %cst_91 {dimension_numbers = #tpu.dot_dimension_numbers<[1], [0], [0], [1], [0, 0, 1, 1], [], []>} : vector<2x64xf32>, vector<64x64xf32>, vector<2x64xf32> -> vector<2x64xf32>
    %91 = arith.addf %84, %90 : vector<2x64xf32>
    %c12 = arith.constant 12 : index
    %c0_92 = arith.constant 0 : index
    %c0_93 = arith.constant 0 : index
    %92 = vector.load %arg4[%c12, %c0_92, %c0_93] : memref<25x2x8xf32, #tpu.memory_space<vmem>>, vector<1x2x8xf32>
    %93 = vector.shape_cast %92 : vector<1x2x8xf32> to vector<2x8xf32>
    %cst_94 = arith.constant dense<0.000000e+00> : vector<2x64xf32>
    %94 = tpu.matmul %93, %6, %cst_94 {dimension_numbers = #tpu.dot_dimension_numbers<[1], [0], [0], [1], [0, 0, 1, 1], [], []>} : vector<2x8xf32>, vector<8x64xf32>, vector<2x64xf32> -> vector<2x64xf32>
    %c12_95 = arith.constant 12 : index
    %c0_96 = arith.constant 0 : index
    %c0_97 = arith.constant 0 : index
    %95 = vector.load %arg6[%c12_95, %c0_96, %c0_97] : memref<25x64x64xf32, #tpu.memory_space<vmem>>, vector<1x64x64xf32>
    %96 = vector.shape_cast %95 : vector<1x64x64xf32> to vector<64x64xf32>
    %cst_98 = arith.constant dense<0.000000e+00> : vector<2x64xf32>
    %97 = tpu.matmul %94, %96, %cst_98 {dimension_numbers = #tpu.dot_dimension_numbers<[1], [0], [0], [1], [0, 0, 1, 1], [], []>} : vector<2x64xf32>, vector<64x64xf32>, vector<2x64xf32> -> vector<2x64xf32>
    %98 = arith.addf %91, %97 : vector<2x64xf32>
    %c13 = arith.constant 13 : index
    %c0_99 = arith.constant 0 : index
    %c0_100 = arith.constant 0 : index
    %99 = vector.load %arg4[%c13, %c0_99, %c0_100] : memref<25x2x8xf32, #tpu.memory_space<vmem>>, vector<1x2x8xf32>
    %100 = vector.shape_cast %99 : vector<1x2x8xf32> to vector<2x8xf32>
    %cst_101 = arith.constant dense<0.000000e+00> : vector<2x64xf32>
    %101 = tpu.matmul %100, %6, %cst_101 {dimension_numbers = #tpu.dot_dimension_numbers<[1], [0], [0], [1], [0, 0, 1, 1], [], []>} : vector<2x8xf32>, vector<8x64xf32>, vector<2x64xf32> -> vector<2x64xf32>
    %c13_102 = arith.constant 13 : index
    %c0_103 = arith.constant 0 : index
    %c0_104 = arith.constant 0 : index
    %102 = vector.load %arg6[%c13_102, %c0_103, %c0_104] : memref<25x64x64xf32, #tpu.memory_space<vmem>>, vector<1x64x64xf32>
    %103 = vector.shape_cast %102 : vector<1x64x64xf32> to vector<64x64xf32>
    %cst_105 = arith.constant dense<0.000000e+00> : vector<2x64xf32>
    %104 = tpu.matmul %101, %103, %cst_105 {dimension_numbers = #tpu.dot_dimension_numbers<[1], [0], [0], [1], [0, 0, 1, 1], [], []>} : vector<2x64xf32>, vector<64x64xf32>, vector<2x64xf32> -> vector<2x64xf32>
    %105 = arith.addf %98, %104 : vector<2x64xf32>
    %c14 = arith.constant 14 : index
    %c0_106 = arith.constant 0 : index
    %c0_107 = arith.constant 0 : index
    %106 = vector.load %arg4[%c14, %c0_106, %c0_107] : memref<25x2x8xf32, #tpu.memory_space<vmem>>, vector<1x2x8xf32>
    %107 = vector.shape_cast %106 : vector<1x2x8xf32> to vector<2x8xf32>
    %cst_108 = arith.constant dense<0.000000e+00> : vector<2x64xf32>
    %108 = tpu.matmul %107, %6, %cst_108 {dimension_numbers = #tpu.dot_dimension_numbers<[1], [0], [0], [1], [0, 0, 1, 1], [], []>} : vector<2x8xf32>, vector<8x64xf32>, vector<2x64xf32> -> vector<2x64xf32>
    %c14_109 = arith.constant 14 : index
    %c0_110 = arith.constant 0 : index
    %c0_111 = arith.constant 0 : index
    %109 = vector.load %arg6[%c14_109, %c0_110, %c0_111] : memref<25x64x64xf32, #tpu.memory_space<vmem>>, vector<1x64x64xf32>
    %110 = vector.shape_cast %109 : vector<1x64x64xf32> to vector<64x64xf32>
    %cst_112 = arith.constant dense<0.000000e+00> : vector<2x64xf32>
    %111 = tpu.matmul %108, %110, %cst_112 {dimension_numbers = #tpu.dot_dimension_numbers<[1], [0], [0], [1], [0, 0, 1, 1], [], []>} : vector<2x64xf32>, vector<64x64xf32>, vector<2x64xf32> -> vector<2x64xf32>
    %112 = arith.addf %105, %111 : vector<2x64xf32>
    %c15 = arith.constant 15 : index
    %c0_113 = arith.constant 0 : index
    %c0_114 = arith.constant 0 : index
    %113 = vector.load %arg4[%c15, %c0_113, %c0_114] : memref<25x2x8xf32, #tpu.memory_space<vmem>>, vector<1x2x8xf32>
    %114 = vector.shape_cast %113 : vector<1x2x8xf32> to vector<2x8xf32>
    %cst_115 = arith.constant dense<0.000000e+00> : vector<2x64xf32>
    %115 = tpu.matmul %114, %6, %cst_115 {dimension_numbers = #tpu.dot_dimension_numbers<[1], [0], [0], [1], [0, 0, 1, 1], [], []>} : vector<2x8xf32>, vector<8x64xf32>, vector<2x64xf32> -> vector<2x64xf32>
    %c15_116 = arith.constant 15 : index
    %c0_117 = arith.constant 0 : index
    %c0_118 = arith.constant 0 : index
    %116 = vector.load %arg6[%c15_116, %c0_117, %c0_118] : memref<25x64x64xf32, #tpu.memory_space<vmem>>, vector<1x64x64xf32>
    %117 = vector.shape_cast %116 : vector<1x64x64xf32> to vector<64x64xf32>
    %cst_119 = arith.constant dense<0.000000e+00> : vector<2x64xf32>
    %118 = tpu.matmul %115, %117, %cst_119 {dimension_numbers = #tpu.dot_dimension_numbers<[1], [0], [0], [1], [0, 0, 1, 1], [], []>} : vector<2x64xf32>, vector<64x64xf32>, vector<2x64xf32> -> vector<2x64xf32>
    %119 = arith.addf %112, %118 : vector<2x64xf32>
    %c16 = arith.constant 16 : index
    %c0_120 = arith.constant 0 : index
    %c0_121 = arith.constant 0 : index
    %120 = vector.load %arg4[%c16, %c0_120, %c0_121] : memref<25x2x8xf32, #tpu.memory_space<vmem>>, vector<1x2x8xf32>
    %121 = vector.shape_cast %120 : vector<1x2x8xf32> to vector<2x8xf32>
    %cst_122 = arith.constant dense<0.000000e+00> : vector<2x64xf32>
    %122 = tpu.matmul %121, %6, %cst_122 {dimension_numbers = #tpu.dot_dimension_numbers<[1], [0], [0], [1], [0, 0, 1, 1], [], []>} : vector<2x8xf32>, vector<8x64xf32>, vector<2x64xf32> -> vector<2x64xf32>
    %c16_123 = arith.constant 16 : index
    %c0_124 = arith.constant 0 : index
    %c0_125 = arith.constant 0 : index
    %123 = vector.load %arg6[%c16_123, %c0_124, %c0_125] : memref<25x64x64xf32, #tpu.memory_space<vmem>>, vector<1x64x64xf32>
    %124 = vector.shape_cast %123 : vector<1x64x64xf32> to vector<64x64xf32>
    %cst_126 = arith.constant dense<0.000000e+00> : vector<2x64xf32>
    %125 = tpu.matmul %122, %124, %cst_126 {dimension_numbers = #tpu.dot_dimension_numbers<[1], [0], [0], [1], [0, 0, 1, 1], [], []>} : vector<2x64xf32>, vector<64x64xf32>, vector<2x64xf32> -> vector<2x64xf32>
    %126 = arith.addf %119, %125 : vector<2x64xf32>
    %c17 = arith.constant 17 : index
    %c0_127 = arith.constant 0 : index
    %c0_128 = arith.constant 0 : index
    %127 = vector.load %arg4[%c17, %c0_127, %c0_128] : memref<25x2x8xf32, #tpu.memory_space<vmem>>, vector<1x2x8xf32>
    %128 = vector.shape_cast %127 : vector<1x2x8xf32> to vector<2x8xf32>
    %cst_129 = arith.constant dense<0.000000e+00> : vector<2x64xf32>
    %129 = tpu.matmul %128, %6, %cst_129 {dimension_numbers = #tpu.dot_dimension_numbers<[1], [0], [0], [1], [0, 0, 1, 1], [], []>} : vector<2x8xf32>, vector<8x64xf32>, vector<2x64xf32> -> vector<2x64xf32>
    %c17_130 = arith.constant 17 : index
    %c0_131 = arith.constant 0 : index
    %c0_132 = arith.constant 0 : index
    %130 = vector.load %arg6[%c17_130, %c0_131, %c0_132] : memref<25x64x64xf32, #tpu.memory_space<vmem>>, vector<1x64x64xf32>
    %131 = vector.shape_cast %130 : vector<1x64x64xf32> to vector<64x64xf32>
    %cst_133 = arith.constant dense<0.000000e+00> : vector<2x64xf32>
    %132 = tpu.matmul %129, %131, %cst_133 {dimension_numbers = #tpu.dot_dimension_numbers<[1], [0], [0], [1], [0, 0, 1, 1], [], []>} : vector<2x64xf32>, vector<64x64xf32>, vector<2x64xf32> -> vector<2x64xf32>
    %133 = arith.addf %126, %132 : vector<2x64xf32>
    %c18 = arith.constant 18 : index
    %c0_134 = arith.constant 0 : index
    %c0_135 = arith.constant 0 : index
    %134 = vector.load %arg4[%c18, %c0_134, %c0_135] : memref<25x2x8xf32, #tpu.memory_space<vmem>>, vector<1x2x8xf32>
    %135 = vector.shape_cast %134 : vector<1x2x8xf32> to vector<2x8xf32>
    %cst_136 = arith.constant dense<0.000000e+00> : vector<2x64xf32>
    %136 = tpu.matmul %135, %6, %cst_136 {dimension_numbers = #tpu.dot_dimension_numbers<[1], [0], [0], [1], [0, 0, 1, 1], [], []>} : vector<2x8xf32>, vector<8x64xf32>, vector<2x64xf32> -> vector<2x64xf32>
    %c18_137 = arith.constant 18 : index
    %c0_138 = arith.constant 0 : index
    %c0_139 = arith.constant 0 : index
    %137 = vector.load %arg6[%c18_137, %c0_138, %c0_139] : memref<25x64x64xf32, #tpu.memory_space<vmem>>, vector<1x64x64xf32>
    %138 = vector.shape_cast %137 : vector<1x64x64xf32> to vector<64x64xf32>
    %cst_140 = arith.constant dense<0.000000e+00> : vector<2x64xf32>
    %139 = tpu.matmul %136, %138, %cst_140 {dimension_numbers = #tpu.dot_dimension_numbers<[1], [0], [0], [1], [0, 0, 1, 1], [], []>} : vector<2x64xf32>, vector<64x64xf32>, vector<2x64xf32> -> vector<2x64xf32>
    %140 = arith.addf %133, %139 : vector<2x64xf32>
    %c19 = arith.constant 19 : index
    %c0_141 = arith.constant 0 : index
    %c0_142 = arith.constant 0 : index
    %141 = vector.load %arg4[%c19, %c0_141, %c0_142] : memref<25x2x8xf32, #tpu.memory_space<vmem>>, vector<1x2x8xf32>
    %142 = vector.shape_cast %141 : vector<1x2x8xf32> to vector<2x8xf32>
    %cst_143 = arith.constant dense<0.000000e+00> : vector<2x64xf32>
    %143 = tpu.matmul %142, %6, %cst_143 {dimension_numbers = #tpu.dot_dimension_numbers<[1], [0], [0], [1], [0, 0, 1, 1], [], []>} : vector<2x8xf32>, vector<8x64xf32>, vector<2x64xf32> -> vector<2x64xf32>
    %c19_144 = arith.constant 19 : index
    %c0_145 = arith.constant 0 : index
    %c0_146 = arith.constant 0 : index
    %144 = vector.load %arg6[%c19_144, %c0_145, %c0_146] : memref<25x64x64xf32, #tpu.memory_space<vmem>>, vector<1x64x64xf32>
    %145 = vector.shape_cast %144 : vector<1x64x64xf32> to vector<64x64xf32>
    %cst_147 = arith.constant dense<0.000000e+00> : vector<2x64xf32>
    %146 = tpu.matmul %143, %145, %cst_147 {dimension_numbers = #tpu.dot_dimension_numbers<[1], [0], [0], [1], [0, 0, 1, 1], [], []>} : vector<2x64xf32>, vector<64x64xf32>, vector<2x64xf32> -> vector<2x64xf32>
    %147 = arith.addf %140, %146 : vector<2x64xf32>
    %c20 = arith.constant 20 : index
    %c0_148 = arith.constant 0 : index
    %c0_149 = arith.constant 0 : index
    %148 = vector.load %arg4[%c20, %c0_148, %c0_149] : memref<25x2x8xf32, #tpu.memory_space<vmem>>, vector<1x2x8xf32>
    %149 = vector.shape_cast %148 : vector<1x2x8xf32> to vector<2x8xf32>
    %cst_150 = arith.constant dense<0.000000e+00> : vector<2x64xf32>
    %150 = tpu.matmul %149, %6, %cst_150 {dimension_numbers = #tpu.dot_dimension_numbers<[1], [0], [0], [1], [0, 0, 1, 1], [], []>} : vector<2x8xf32>, vector<8x64xf32>, vector<2x64xf32> -> vector<2x64xf32>
    %c20_151 = arith.constant 20 : index
    %c0_152 = arith.constant 0 : index
    %c0_153 = arith.constant 0 : index
    %151 = vector.load %arg6[%c20_151, %c0_152, %c0_153] : memref<25x64x64xf32, #tpu.memory_space<vmem>>, vector<1x64x64xf32>
    %152 = vector.shape_cast %151 : vector<1x64x64xf32> to vector<64x64xf32>
    %cst_154 = arith.constant dense<0.000000e+00> : vector<2x64xf32>
    %153 = tpu.matmul %150, %152, %cst_154 {dimension_numbers = #tpu.dot_dimension_numbers<[1], [0], [0], [1], [0, 0, 1, 1], [], []>} : vector<2x64xf32>, vector<64x64xf32>, vector<2x64xf32> -> vector<2x64xf32>
    %154 = arith.addf %147, %153 : vector<2x64xf32>
    %c21 = arith.constant 21 : index
    %c0_155 = arith.constant 0 : index
    %c0_156 = arith.constant 0 : index
    %155 = vector.load %arg4[%c21, %c0_155, %c0_156] : memref<25x2x8xf32, #tpu.memory_space<vmem>>, vector<1x2x8xf32>
    %156 = vector.shape_cast %155 : vector<1x2x8xf32> to vector<2x8xf32>
    %cst_157 = arith.constant dense<0.000000e+00> : vector<2x64xf32>
    %157 = tpu.matmul %156, %6, %cst_157 {dimension_numbers = #tpu.dot_dimension_numbers<[1], [0], [0], [1], [0, 0, 1, 1], [], []>} : vector<2x8xf32>, vector<8x64xf32>, vector<2x64xf32> -> vector<2x64xf32>
    %c21_158 = arith.constant 21 : index
    %c0_159 = arith.constant 0 : index
    %c0_160 = arith.constant 0 : index
    %158 = vector.load %arg6[%c21_158, %c0_159, %c0_160] : memref<25x64x64xf32, #tpu.memory_space<vmem>>, vector<1x64x64xf32>
    %159 = vector.shape_cast %158 : vector<1x64x64xf32> to vector<64x64xf32>
    %cst_161 = arith.constant dense<0.000000e+00> : vector<2x64xf32>
    %160 = tpu.matmul %157, %159, %cst_161 {dimension_numbers = #tpu.dot_dimension_numbers<[1], [0], [0], [1], [0, 0, 1, 1], [], []>} : vector<2x64xf32>, vector<64x64xf32>, vector<2x64xf32> -> vector<2x64xf32>
    %161 = arith.addf %154, %160 : vector<2x64xf32>
    %c22 = arith.constant 22 : index
    %c0_162 = arith.constant 0 : index
    %c0_163 = arith.constant 0 : index
    %162 = vector.load %arg4[%c22, %c0_162, %c0_163] : memref<25x2x8xf32, #tpu.memory_space<vmem>>, vector<1x2x8xf32>
    %163 = vector.shape_cast %162 : vector<1x2x8xf32> to vector<2x8xf32>
    %cst_164 = arith.constant dense<0.000000e+00> : vector<2x64xf32>
    %164 = tpu.matmul %163, %6, %cst_164 {dimension_numbers = #tpu.dot_dimension_numbers<[1], [0], [0], [1], [0, 0, 1, 1], [], []>} : vector<2x8xf32>, vector<8x64xf32>, vector<2x64xf32> -> vector<2x64xf32>
    %c22_165 = arith.constant 22 : index
    %c0_166 = arith.constant 0 : index
    %c0_167 = arith.constant 0 : index
    %165 = vector.load %arg6[%c22_165, %c0_166, %c0_167] : memref<25x64x64xf32, #tpu.memory_space<vmem>>, vector<1x64x64xf32>
    %166 = vector.shape_cast %165 : vector<1x64x64xf32> to vector<64x64xf32>
    %cst_168 = arith.constant dense<0.000000e+00> : vector<2x64xf32>
    %167 = tpu.matmul %164, %166, %cst_168 {dimension_numbers = #tpu.dot_dimension_numbers<[1], [0], [0], [1], [0, 0, 1, 1], [], []>} : vector<2x64xf32>, vector<64x64xf32>, vector<2x64xf32> -> vector<2x64xf32>
    %168 = arith.addf %161, %167 : vector<2x64xf32>
    %c23 = arith.constant 23 : index
    %c0_169 = arith.constant 0 : index
    %c0_170 = arith.constant 0 : index
    %169 = vector.load %arg4[%c23, %c0_169, %c0_170] : memref<25x2x8xf32, #tpu.memory_space<vmem>>, vector<1x2x8xf32>
    %170 = vector.shape_cast %169 : vector<1x2x8xf32> to vector<2x8xf32>
    %cst_171 = arith.constant dense<0.000000e+00> : vector<2x64xf32>
    %171 = tpu.matmul %170, %6, %cst_171 {dimension_numbers = #tpu.dot_dimension_numbers<[1], [0], [0], [1], [0, 0, 1, 1], [], []>} : vector<2x8xf32>, vector<8x64xf32>, vector<2x64xf32> -> vector<2x64xf32>
    %c23_172 = arith.constant 23 : index
    %c0_173 = arith.constant 0 : index
    %c0_174 = arith.constant 0 : index
    %172 = vector.load %arg6[%c23_172, %c0_173, %c0_174] : memref<25x64x64xf32, #tpu.memory_space<vmem>>, vector<1x64x64xf32>
    %173 = vector.shape_cast %172 : vector<1x64x64xf32> to vector<64x64xf32>
    %cst_175 = arith.constant dense<0.000000e+00> : vector<2x64xf32>
    %174 = tpu.matmul %171, %173, %cst_175 {dimension_numbers = #tpu.dot_dimension_numbers<[1], [0], [0], [1], [0, 0, 1, 1], [], []>} : vector<2x64xf32>, vector<64x64xf32>, vector<2x64xf32> -> vector<2x64xf32>
    %175 = arith.addf %168, %174 : vector<2x64xf32>
    %c24 = arith.constant 24 : index
    %c0_176 = arith.constant 0 : index
    %c0_177 = arith.constant 0 : index
    %176 = vector.load %arg4[%c24, %c0_176, %c0_177] : memref<25x2x8xf32, #tpu.memory_space<vmem>>, vector<1x2x8xf32>
    %177 = vector.shape_cast %176 : vector<1x2x8xf32> to vector<2x8xf32>
    %cst_178 = arith.constant dense<0.000000e+00> : vector<2x64xf32>
    %178 = tpu.matmul %177, %6, %cst_178 {dimension_numbers = #tpu.dot_dimension_numbers<[1], [0], [0], [1], [0, 0, 1, 1], [], []>} : vector<2x8xf32>, vector<8x64xf32>, vector<2x64xf32> -> vector<2x64xf32>
    %c24_179 = arith.constant 24 : index
    %c0_180 = arith.constant 0 : index
    %c0_181 = arith.constant 0 : index
    %179 = vector.load %arg6[%c24_179, %c0_180, %c0_181] : memref<25x64x64xf32, #tpu.memory_space<vmem>>, vector<1x64x64xf32>
    %180 = vector.shape_cast %179 : vector<1x64x64xf32> to vector<64x64xf32>
    %cst_182 = arith.constant dense<0.000000e+00> : vector<2x64xf32>
    %181 = tpu.matmul %178, %180, %cst_182 {dimension_numbers = #tpu.dot_dimension_numbers<[1], [0], [0], [1], [0, 0, 1, 1], [], []>} : vector<2x64xf32>, vector<64x64xf32>, vector<2x64xf32> -> vector<2x64xf32>
    %182 = arith.addf %175, %181 : vector<2x64xf32>
    %c0_183 = arith.constant 0 : index
    %c0_184 = arith.constant 0 : index
    %183 = vector.load %arg5[%c0_183, %c0_184] : memref<2x1xf32, #tpu.memory_space<vmem>>, vector<2x1xf32>
    %184 = vector.broadcast %183 : vector<2x1xf32> to vector<2x64xf32>
    %185 = arith.addf %182, %184 : vector<2x64xf32>
    %186 = math.tanh %185 : vector<2x64xf32>
    %cst_185 = arith.constant 5.000000e+00 : f32
    %187 = vector.broadcast %cst_185 : f32 to vector<2x64xf32>
    %188 = arith.mulf %186, %187 : vector<2x64xf32>
    %c0_186 = arith.constant 0 : index
    %c0_187 = arith.constant 0 : index
    %189 = vector.load %arg7[%c0_186, %c0_187] : memref<2x64xf32, #tpu.memory_space<vmem>>, vector<1x64xf32>
    %190 = vector.extract_strided_slice %188 {offsets = [0, 0], sizes = [1, 64], strides = [1, 1]} : vector<2x64xf32> to vector<1x64xf32>
    %191 = arith.addf %189, %190 : vector<1x64xf32>
    %c1_188 = arith.constant 1 : index
    %c0_189 = arith.constant 0 : index
    %192 = vector.load %arg7[%c1_188, %c0_189] : memref<2x64xf32, #tpu.memory_space<vmem>>, vector<1x64xf32>
    %193 = vector.extract_strided_slice %188 {offsets = [1, 0], sizes = [1, 64], strides = [1, 1]} : vector<2x64xf32> to vector<1x64xf32>
    %194 = arith.addf %192, %193 : vector<1x64xf32>
    %cst_190 = arith.constant 2.000000e+00 : f32
    %195 = vector.broadcast %cst_190 : f32 to vector<1x64xf32>
    %196 = arith.mulf %195, %191 : vector<1x64xf32>
    %cst_191 = arith.constant 7.000000e+00 : f32
    %197 = vector.broadcast %cst_191 : f32 to vector<1x64xf32>
    %198 = arith.divf %196, %197 : vector<1x64xf32>
    %cst_192 = arith.constant 1.000000e+00 : f32
    %199 = vector.broadcast %cst_192 : f32 to vector<1x64xf32>
    %200 = arith.subf %198, %199 : vector<1x64xf32>
    %cst_193 = arith.constant 2.000000e+00 : f32
    %201 = vector.broadcast %cst_193 : f32 to vector<1x64xf32>
    %202 = arith.mulf %201, %194 : vector<1x64xf32>
    %cst_194 = arith.constant 7.000000e+00 : f32
    %203 = vector.broadcast %cst_194 : f32 to vector<1x64xf32>
    %204 = arith.divf %202, %203 : vector<1x64xf32>
    %cst_195 = arith.constant 1.000000e+00 : f32
    %205 = vector.broadcast %cst_195 : f32 to vector<1x64xf32>
    %206 = arith.subf %204, %205 : vector<1x64xf32>
    %cst_196 = arith.constant 1.000000e+00 : f32
    %207 = vector.broadcast %cst_196 : f32 to vector<1x64xf32>
    %208 = arith.addf %200, %207 : vector<1x64xf32>
    %cst_197 = arith.constant 8.000000e+00 : f32
    %209 = vector.broadcast %cst_197 : f32 to vector<1x64xf32>
    %210 = arith.mulf %208, %209 : vector<1x64xf32>
    %cst_198 = arith.constant 1.000000e+00 : f32
    %211 = vector.broadcast %cst_198 : f32 to vector<1x64xf32>
    %212 = arith.subf %210, %211 : vector<1x64xf32>
    %cst_199 = arith.constant 5.000000e-01 : f32
    %213 = vector.broadcast %cst_199 : f32 to vector<1x64xf32>
    %214 = arith.mulf %212, %213 : vector<1x64xf32>
    %cst_200 = arith.constant 1.000000e+00 : f32
    %215 = vector.broadcast %cst_200 : f32 to vector<1x64xf32>
    %216 = arith.addf %206, %215 : vector<1x64xf32>
    %cst_201 = arith.constant 8.000000e+00 : f32
    %217 = vector.broadcast %cst_201 : f32 to vector<1x64xf32>
    %218 = arith.mulf %216, %217 : vector<1x64xf32>
    %cst_202 = arith.constant 1.000000e+00 : f32
    %219 = vector.broadcast %cst_202 : f32 to vector<1x64xf32>
    %220 = arith.subf %218, %219 : vector<1x64xf32>
    %cst_203 = arith.constant 5.000000e-01 : f32
    %221 = vector.broadcast %cst_203 : f32 to vector<1x64xf32>
    %222 = arith.mulf %220, %221 : vector<1x64xf32>
    %223 = math.floor %214 : vector<1x64xf32>
    %cst_204 = arith.constant 1.000000e+00 : f32
    %224 = vector.broadcast %cst_204 : f32 to vector<1x64xf32>
    %225 = arith.addf %223, %224 : vector<1x64xf32>
    %226 = math.floor %222 : vector<1x64xf32>
    %cst_205 = arith.constant 1.000000e+00 : f32
    %227 = vector.broadcast %cst_205 : f32 to vector<1x64xf32>
    %228 = arith.addf %226, %227 : vector<1x64xf32>
    %229 = arith.subf %214, %223 : vector<1x64xf32>
    %cst_206 = arith.constant 1.000000e+00 : f32
    %230 = vector.broadcast %cst_206 : f32 to vector<1x64xf32>
    %231 = arith.subf %230, %229 : vector<1x64xf32>
    %232 = arith.subf %222, %226 : vector<1x64xf32>
    %cst_207 = arith.constant 1.000000e+00 : f32
    %233 = vector.broadcast %cst_207 : f32 to vector<1x64xf32>
    %234 = arith.subf %233, %232 : vector<1x64xf32>
    %235 = tpu.iota {dimensions = array<i32: 0>} : vector<64x64xi32>
    %236 = arith.mulf %231, %234 : vector<1x64xf32>
    %cst_208 = arith.constant 0.000000e+00 : f32
    %237 = vector.broadcast %cst_208 : f32 to vector<1x64xf32>
    %238 = arith.cmpf oge, %223, %237 : vector<1x64xf32>
    %cst_209 = arith.constant 7.000000e+00 : f32
    %239 = vector.broadcast %cst_209 : f32 to vector<1x64xf32>
    %240 = arith.cmpf ole, %223, %239 : vector<1x64xf32>
    %241 = arith.andi %238, %240 : vector<1x64xi1>
    %cst_210 = arith.constant 0.000000e+00 : f32
    %242 = vector.broadcast %cst_210 : f32 to vector<1x64xf32>
    %243 = arith.cmpf oge, %226, %242 : vector<1x64xf32>
    %244 = arith.andi %241, %243 : vector<1x64xi1>
    %cst_211 = arith.constant 7.000000e+00 : f32
    %245 = vector.broadcast %cst_211 : f32 to vector<1x64xf32>
    %246 = arith.cmpf ole, %226, %245 : vector<1x64xf32>
    %247 = arith.andi %244, %246 : vector<1x64xi1>
    %248 = arith.extui %247 : vector<1x64xi1> to vector<1x64xi32>
    %249 = arith.sitofp %248 : vector<1x64xi32> to vector<1x64xf32>
    %cst_212 = arith.constant 0.000000e+00 : f32
    %cst_213 = arith.constant 7.000000e+00 : f32
    %250 = vector.broadcast %cst_212 : f32 to vector<1x64xf32>
    %251 = arith.maximumf %250, %226 : vector<1x64xf32>
    %252 = vector.broadcast %cst_213 : f32 to vector<1x64xf32>
    %253 = arith.minimumf %252, %251 : vector<1x64xf32>
    %254 = arith.fptosi %253 : vector<1x64xf32> to vector<1x64xi32>
    %c8_i32 = arith.constant 8 : i32
    %255 = vector.broadcast %c8_i32 : i32 to vector<1x64xi32>
    %256 = arith.muli %254, %255 : vector<1x64xi32>
    %cst_214 = arith.constant 0.000000e+00 : f32
    %cst_215 = arith.constant 7.000000e+00 : f32
    %257 = vector.broadcast %cst_214 : f32 to vector<1x64xf32>
    %258 = arith.maximumf %257, %223 : vector<1x64xf32>
    %259 = vector.broadcast %cst_215 : f32 to vector<1x64xf32>
    %260 = arith.minimumf %259, %258 : vector<1x64xf32>
    %261 = arith.fptosi %260 : vector<1x64xf32> to vector<1x64xi32>
    %262 = arith.addi %256, %261 : vector<1x64xi32>
    %263 = vector.broadcast %262 : vector<1x64xi32> to vector<64x64xi32>
    %264 = arith.cmpi eq, %235, %263 : vector<64x64xi32>
    %265 = arith.extui %264 : vector<64x64xi1> to vector<64x64xi32>
    %266 = arith.sitofp %265 : vector<64x64xi32> to vector<64x64xf32>
    %267 = arith.mulf %236, %249 : vector<1x64xf32>
    %268 = vector.broadcast %267 : vector<1x64xf32> to vector<64x64xf32>
    %269 = arith.mulf %266, %268 : vector<64x64xf32>
    %270 = arith.mulf %229, %234 : vector<1x64xf32>
    %cst_216 = arith.constant 0.000000e+00 : f32
    %271 = vector.broadcast %cst_216 : f32 to vector<1x64xf32>
    %272 = arith.cmpf oge, %225, %271 : vector<1x64xf32>
    %cst_217 = arith.constant 7.000000e+00 : f32
    %273 = vector.broadcast %cst_217 : f32 to vector<1x64xf32>
    %274 = arith.cmpf ole, %225, %273 : vector<1x64xf32>
    %275 = arith.andi %272, %274 : vector<1x64xi1>
    %cst_218 = arith.constant 0.000000e+00 : f32
    %276 = vector.broadcast %cst_218 : f32 to vector<1x64xf32>
    %277 = arith.cmpf oge, %226, %276 : vector<1x64xf32>
    %278 = arith.andi %275, %277 : vector<1x64xi1>
    %cst_219 = arith.constant 7.000000e+00 : f32
    %279 = vector.broadcast %cst_219 : f32 to vector<1x64xf32>
    %280 = arith.cmpf ole, %226, %279 : vector<1x64xf32>
    %281 = arith.andi %278, %280 : vector<1x64xi1>
    %282 = arith.extui %281 : vector<1x64xi1> to vector<1x64xi32>
    %283 = arith.sitofp %282 : vector<1x64xi32> to vector<1x64xf32>
    %cst_220 = arith.constant 0.000000e+00 : f32
    %cst_221 = arith.constant 7.000000e+00 : f32
    %284 = vector.broadcast %cst_220 : f32 to vector<1x64xf32>
    %285 = arith.maximumf %284, %226 : vector<1x64xf32>
    %286 = vector.broadcast %cst_221 : f32 to vector<1x64xf32>
    %287 = arith.minimumf %286, %285 : vector<1x64xf32>
    %288 = arith.fptosi %287 : vector<1x64xf32> to vector<1x64xi32>
    %c8_i32_222 = arith.constant 8 : i32
    %289 = vector.broadcast %c8_i32_222 : i32 to vector<1x64xi32>
    %290 = arith.muli %288, %289 : vector<1x64xi32>
    %cst_223 = arith.constant 0.000000e+00 : f32
    %cst_224 = arith.constant 7.000000e+00 : f32
    %291 = vector.broadcast %cst_223 : f32 to vector<1x64xf32>
    %292 = arith.maximumf %291, %225 : vector<1x64xf32>
    %293 = vector.broadcast %cst_224 : f32 to vector<1x64xf32>
    %294 = arith.minimumf %293, %292 : vector<1x64xf32>
    %295 = arith.fptosi %294 : vector<1x64xf32> to vector<1x64xi32>
    %296 = arith.addi %290, %295 : vector<1x64xi32>
    %297 = vector.broadcast %296 : vector<1x64xi32> to vector<64x64xi32>
    %298 = arith.cmpi eq, %235, %297 : vector<64x64xi32>
    %299 = arith.extui %298 : vector<64x64xi1> to vector<64x64xi32>
    %300 = arith.sitofp %299 : vector<64x64xi32> to vector<64x64xf32>
    %301 = arith.mulf %270, %283 : vector<1x64xf32>
    %302 = vector.broadcast %301 : vector<1x64xf32> to vector<64x64xf32>
    %303 = arith.mulf %300, %302 : vector<64x64xf32>
    %304 = arith.addf %269, %303 : vector<64x64xf32>
    %305 = arith.mulf %231, %232 : vector<1x64xf32>
    %cst_225 = arith.constant 0.000000e+00 : f32
    %306 = vector.broadcast %cst_225 : f32 to vector<1x64xf32>
    %307 = arith.cmpf oge, %223, %306 : vector<1x64xf32>
    %cst_226 = arith.constant 7.000000e+00 : f32
    %308 = vector.broadcast %cst_226 : f32 to vector<1x64xf32>
    %309 = arith.cmpf ole, %223, %308 : vector<1x64xf32>
    %310 = arith.andi %307, %309 : vector<1x64xi1>
    %cst_227 = arith.constant 0.000000e+00 : f32
    %311 = vector.broadcast %cst_227 : f32 to vector<1x64xf32>
    %312 = arith.cmpf oge, %228, %311 : vector<1x64xf32>
    %313 = arith.andi %310, %312 : vector<1x64xi1>
    %cst_228 = arith.constant 7.000000e+00 : f32
    %314 = vector.broadcast %cst_228 : f32 to vector<1x64xf32>
    %315 = arith.cmpf ole, %228, %314 : vector<1x64xf32>
    %316 = arith.andi %313, %315 : vector<1x64xi1>
    %317 = arith.extui %316 : vector<1x64xi1> to vector<1x64xi32>
    %318 = arith.sitofp %317 : vector<1x64xi32> to vector<1x64xf32>
    %cst_229 = arith.constant 0.000000e+00 : f32
    %cst_230 = arith.constant 7.000000e+00 : f32
    %319 = vector.broadcast %cst_229 : f32 to vector<1x64xf32>
    %320 = arith.maximumf %319, %228 : vector<1x64xf32>
    %321 = vector.broadcast %cst_230 : f32 to vector<1x64xf32>
    %322 = arith.minimumf %321, %320 : vector<1x64xf32>
    %323 = arith.fptosi %322 : vector<1x64xf32> to vector<1x64xi32>
    %c8_i32_231 = arith.constant 8 : i32
    %324 = vector.broadcast %c8_i32_231 : i32 to vector<1x64xi32>
    %325 = arith.muli %323, %324 : vector<1x64xi32>
    %cst_232 = arith.constant 0.000000e+00 : f32
    %cst_233 = arith.constant 7.000000e+00 : f32
    %326 = vector.broadcast %cst_232 : f32 to vector<1x64xf32>
    %327 = arith.maximumf %326, %223 : vector<1x64xf32>
    %328 = vector.broadcast %cst_233 : f32 to vector<1x64xf32>
    %329 = arith.minimumf %328, %327 : vector<1x64xf32>
    %330 = arith.fptosi %329 : vector<1x64xf32> to vector<1x64xi32>
    %331 = arith.addi %325, %330 : vector<1x64xi32>
    %332 = vector.broadcast %331 : vector<1x64xi32> to vector<64x64xi32>
    %333 = arith.cmpi eq, %235, %332 : vector<64x64xi32>
    %334 = arith.extui %333 : vector<64x64xi1> to vector<64x64xi32>
    %335 = arith.sitofp %334 : vector<64x64xi32> to vector<64x64xf32>
    %336 = arith.mulf %305, %318 : vector<1x64xf32>
    %337 = vector.broadcast %336 : vector<1x64xf32> to vector<64x64xf32>
    %338 = arith.mulf %335, %337 : vector<64x64xf32>
    %339 = arith.addf %304, %338 : vector<64x64xf32>
    %340 = arith.mulf %229, %232 : vector<1x64xf32>
    %cst_234 = arith.constant 0.000000e+00 : f32
    %341 = vector.broadcast %cst_234 : f32 to vector<1x64xf32>
    %342 = arith.cmpf oge, %225, %341 : vector<1x64xf32>
    %cst_235 = arith.constant 7.000000e+00 : f32
    %343 = vector.broadcast %cst_235 : f32 to vector<1x64xf32>
    %344 = arith.cmpf ole, %225, %343 : vector<1x64xf32>
    %345 = arith.andi %342, %344 : vector<1x64xi1>
    %cst_236 = arith.constant 0.000000e+00 : f32
    %346 = vector.broadcast %cst_236 : f32 to vector<1x64xf32>
    %347 = arith.cmpf oge, %228, %346 : vector<1x64xf32>
    %348 = arith.andi %345, %347 : vector<1x64xi1>
    %cst_237 = arith.constant 7.000000e+00 : f32
    %349 = vector.broadcast %cst_237 : f32 to vector<1x64xf32>
    %350 = arith.cmpf ole, %228, %349 : vector<1x64xf32>
    %351 = arith.andi %348, %350 : vector<1x64xi1>
    %352 = arith.extui %351 : vector<1x64xi1> to vector<1x64xi32>
    %353 = arith.sitofp %352 : vector<1x64xi32> to vector<1x64xf32>
    %cst_238 = arith.constant 0.000000e+00 : f32
    %cst_239 = arith.constant 7.000000e+00 : f32
    %354 = vector.broadcast %cst_238 : f32 to vector<1x64xf32>
    %355 = arith.maximumf %354, %228 : vector<1x64xf32>
    %356 = vector.broadcast %cst_239 : f32 to vector<1x64xf32>
    %357 = arith.minimumf %356, %355 : vector<1x64xf32>
    %358 = arith.fptosi %357 : vector<1x64xf32> to vector<1x64xi32>
    %c8_i32_240 = arith.constant 8 : i32
    %359 = vector.broadcast %c8_i32_240 : i32 to vector<1x64xi32>
    %360 = arith.muli %358, %359 : vector<1x64xi32>
    %cst_241 = arith.constant 0.000000e+00 : f32
    %cst_242 = arith.constant 7.000000e+00 : f32
    %361 = vector.broadcast %cst_241 : f32 to vector<1x64xf32>
    %362 = arith.maximumf %361, %225 : vector<1x64xf32>
    %363 = vector.broadcast %cst_242 : f32 to vector<1x64xf32>
    %364 = arith.minimumf %363, %362 : vector<1x64xf32>
    %365 = arith.fptosi %364 : vector<1x64xf32> to vector<1x64xi32>
    %366 = arith.addi %360, %365 : vector<1x64xi32>
    %367 = vector.broadcast %366 : vector<1x64xi32> to vector<64x64xi32>
    %368 = arith.cmpi eq, %235, %367 : vector<64x64xi32>
    %369 = arith.extui %368 : vector<64x64xi1> to vector<64x64xi32>
    %370 = arith.sitofp %369 : vector<64x64xi32> to vector<64x64xf32>
    %371 = arith.mulf %340, %353 : vector<1x64xf32>
    %372 = vector.broadcast %371 : vector<1x64xf32> to vector<64x64xf32>
    %373 = arith.mulf %370, %372 : vector<64x64xf32>
    %374 = arith.addf %339, %373 : vector<64x64xf32>
    %375 = arith.truncf %1 : vector<8x64xf32> to vector<8x64xbf16>
    %376 = arith.truncf %374 : vector<64x64xf32> to vector<64x64xbf16>
    %cst_243 = arith.constant dense<0.000000e+00> : vector<8x64xf32>
    %377 = tpu.matmul %375, %376, %cst_243 {dimension_numbers = #tpu.dot_dimension_numbers<[1], [0], [0], [1], [0, 0, 1, 1], [], []>} : vector<8x64xbf16>, vector<64x64xbf16>, vector<8x64xf32> -> vector<8x64xf32>
    %c0_244 = arith.constant 0 : index
    %c0_245 = arith.constant 0 : index
    %378 = vector.load %arg8[%c0_244, %c0_245] : memref<16x8xf32, #tpu.memory_space<vmem>>, vector<16x8xf32>
    %379 = arith.truncf %378 : vector<16x8xf32> to vector<16x8xbf16>
    %380 = arith.truncf %377 : vector<8x64xf32> to vector<8x64xbf16>
    %cst_246 = arith.constant dense<0.000000e+00> : vector<16x64xf32>
    %381 = tpu.matmul %379, %380, %cst_246 {dimension_numbers = #tpu.dot_dimension_numbers<[1], [0], [0], [1], [0, 0, 1, 1], [], []>} : vector<16x8xbf16>, vector<8x64xbf16>, vector<16x64xf32> -> vector<16x64xf32>
    %c0_247 = arith.constant 0 : index
    %c0_248 = arith.constant 0 : index
    %382 = vector.load %arg9[%c0_247, %c0_248] : memref<16x1xf32, #tpu.memory_space<vmem>>, vector<16x1xf32>
    %383 = vector.broadcast %382 : vector<16x1xf32> to vector<16x64xf32>
    %384 = arith.addf %381, %383 : vector<16x64xf32>
    %385 = vector.extract_strided_slice %384 {offsets = [0, 0], sizes = [8, 64], strides = [1, 1]} : vector<16x64xf32> to vector<8x64xf32>
    %386 = vector.extract_strided_slice %384 {offsets = [8, 0], sizes = [8, 64], strides = [1, 1]} : vector<16x64xf32> to vector<8x64xf32>
    %c0_249 = arith.constant 0 : index
    %c0_250 = arith.constant 0 : index
    %387 = vector.load %arg10[%c0_249, %c0_250] : memref<8x64xf32, #tpu.memory_space<vmem>>, vector<8x64xf32>
    %388 = arith.addf %386, %387 : vector<8x64xf32>
    %389 = vector.extract_strided_slice %6 {offsets = [0, 0], sizes = [8, 8], strides = [1, 1]} : vector<8x64xf32> to vector<8x8xf32>
    %390 = vector.extract_strided_slice %6 {offsets = [0, 8], sizes = [8, 8], strides = [1, 1]} : vector<8x64xf32> to vector<8x8xf32>
    %391 = vector.extract_strided_slice %6 {offsets = [0, 16], sizes = [8, 8], strides = [1, 1]} : vector<8x64xf32> to vector<8x8xf32>
    %392 = vector.extract_strided_slice %6 {offsets = [0, 24], sizes = [8, 8], strides = [1, 1]} : vector<8x64xf32> to vector<8x8xf32>
    %393 = vector.extract_strided_slice %6 {offsets = [0, 32], sizes = [8, 8], strides = [1, 1]} : vector<8x64xf32> to vector<8x8xf32>
    %394 = vector.extract_strided_slice %6 {offsets = [0, 40], sizes = [8, 8], strides = [1, 1]} : vector<8x64xf32> to vector<8x8xf32>
    %395 = vector.extract_strided_slice %6 {offsets = [0, 48], sizes = [8, 8], strides = [1, 1]} : vector<8x64xf32> to vector<8x8xf32>
    %396 = vector.extract_strided_slice %6 {offsets = [0, 56], sizes = [8, 8], strides = [1, 1]} : vector<8x64xf32> to vector<8x8xf32>
    %397 = tpu.concatenate %389, %390, %391, %392, %393, %394, %395, %396 in 0 : vector<8x8xf32>, vector<8x8xf32>, vector<8x8xf32>, vector<8x8xf32>, vector<8x8xf32>, vector<8x8xf32>, vector<8x8xf32>, vector<8x8xf32> -> vector<64x8xf32>
    %398 = vector.extract_strided_slice %385 {offsets = [0, 0], sizes = [8, 8], strides = [1, 1]} : vector<8x64xf32> to vector<8x8xf32>
    %399 = vector.extract_strided_slice %385 {offsets = [0, 8], sizes = [8, 8], strides = [1, 1]} : vector<8x64xf32> to vector<8x8xf32>
    %400 = vector.extract_strided_slice %385 {offsets = [0, 16], sizes = [8, 8], strides = [1, 1]} : vector<8x64xf32> to vector<8x8xf32>
    %401 = vector.extract_strided_slice %385 {offsets = [0, 24], sizes = [8, 8], strides = [1, 1]} : vector<8x64xf32> to vector<8x8xf32>
    %402 = vector.extract_strided_slice %385 {offsets = [0, 32], sizes = [8, 8], strides = [1, 1]} : vector<8x64xf32> to vector<8x8xf32>
    %403 = vector.extract_strided_slice %385 {offsets = [0, 40], sizes = [8, 8], strides = [1, 1]} : vector<8x64xf32> to vector<8x8xf32>
    %404 = vector.extract_strided_slice %385 {offsets = [0, 48], sizes = [8, 8], strides = [1, 1]} : vector<8x64xf32> to vector<8x8xf32>
    %405 = vector.extract_strided_slice %385 {offsets = [0, 56], sizes = [8, 8], strides = [1, 1]} : vector<8x64xf32> to vector<8x8xf32>
    %406 = tpu.concatenate %398, %399, %400, %401, %402, %403, %404, %405 in 0 : vector<8x8xf32>, vector<8x8xf32>, vector<8x8xf32>, vector<8x8xf32>, vector<8x8xf32>, vector<8x8xf32>, vector<8x8xf32>, vector<8x8xf32> -> vector<64x8xf32>
    %407 = vector.extract_strided_slice %388 {offsets = [0, 0], sizes = [8, 8], strides = [1, 1]} : vector<8x64xf32> to vector<8x8xf32>
    %408 = vector.extract_strided_slice %388 {offsets = [0, 8], sizes = [8, 8], strides = [1, 1]} : vector<8x64xf32> to vector<8x8xf32>
    %409 = vector.extract_strided_slice %388 {offsets = [0, 16], sizes = [8, 8], strides = [1, 1]} : vector<8x64xf32> to vector<8x8xf32>
    %410 = vector.extract_strided_slice %388 {offsets = [0, 24], sizes = [8, 8], strides = [1, 1]} : vector<8x64xf32> to vector<8x8xf32>
    %411 = vector.extract_strided_slice %388 {offsets = [0, 32], sizes = [8, 8], strides = [1, 1]} : vector<8x64xf32> to vector<8x8xf32>
    %412 = vector.extract_strided_slice %388 {offsets = [0, 40], sizes = [8, 8], strides = [1, 1]} : vector<8x64xf32> to vector<8x8xf32>
    %413 = vector.extract_strided_slice %388 {offsets = [0, 48], sizes = [8, 8], strides = [1, 1]} : vector<8x64xf32> to vector<8x8xf32>
    %414 = vector.extract_strided_slice %388 {offsets = [0, 56], sizes = [8, 8], strides = [1, 1]} : vector<8x64xf32> to vector<8x8xf32>
    %415 = tpu.concatenate %407, %408, %409, %410, %411, %412, %413, %414 in 0 : vector<8x8xf32>, vector<8x8xf32>, vector<8x8xf32>, vector<8x8xf32>, vector<8x8xf32>, vector<8x8xf32>, vector<8x8xf32>, vector<8x8xf32> -> vector<64x8xf32>
    %416 = arith.truncf %397 : vector<64x8xf32> to vector<64x8xbf16>
    %417 = arith.truncf %406 : vector<64x8xf32> to vector<64x8xbf16>
    %cst_251 = arith.constant dense<0.000000e+00> : vector<64x64xf32>
    %418 = tpu.matmul %416, %417, %cst_251 {dimension_numbers = #tpu.dot_dimension_numbers<[1], [1], [0], [0], [0, 0, 1, 0], [], []>} : vector<64x8xbf16>, vector<64x8xbf16>, vector<64x64xf32> -> vector<64x64xf32>
    %cst_252 = arith.constant 0.353553385 : f32
    %419 = vector.broadcast %cst_252 : f32 to vector<64x64xf32>
    %420 = arith.mulf %418, %419 : vector<64x64xf32>
    %c0_253 = arith.constant 0 : index
    %c0_254 = arith.constant 0 : index
    %421 = vector.load %arg11[%c0_253, %c0_254] : memref<64x64xf32, #tpu.memory_space<vmem>>, vector<64x64xf32>
    %422 = arith.addf %420, %421 : vector<64x64xf32>
    %cst_255 = arith.constant dense<0xFF800000> : vector<64xf32>
    %423 = vector.multi_reduction <maximumf>, %422, %cst_255 [1] : vector<64x64xf32> to vector<64xf32>
    %424 = vector.shape_cast %423 : vector<64xf32> to vector<64x1xf32>
    %425 = vector.broadcast %424 : vector<64x1xf32> to vector<64x64xf32>
    %426 = arith.subf %422, %425 : vector<64x64xf32>
    %427 = math.exp %426 : vector<64x64xf32>
    %cst_256 = arith.constant dense<0.000000e+00> : vector<64xf32>
    %428 = vector.multi_reduction <add>, %427, %cst_256 [1] : vector<64x64xf32> to vector<64xf32>
    %429 = vector.shape_cast %428 : vector<64xf32> to vector<64x1xf32>
    %430 = tpu.reciprocal %429 {approx = true} : vector<64x1xf32> -> vector<64x1xf32>
    %431 = vector.broadcast %430 : vector<64x1xf32> to vector<64x64xf32>
    %432 = arith.mulf %427, %431 : vector<64x64xf32>
    %433 = arith.truncf %432 : vector<64x64xf32> to vector<64x64xbf16>
    %434 = arith.truncf %415 : vector<64x8xf32> to vector<64x8xbf16>
    %cst_257 = arith.constant dense<0.000000e+00> : vector<64x8xf32>
    %435 = tpu.matmul %433, %434, %cst_257 {dimension_numbers = #tpu.dot_dimension_numbers<[1], [0], [0], [1], [0, 0, 1, 1], [], []>} : vector<64x64xbf16>, vector<64x8xbf16>, vector<64x8xf32> -> vector<64x8xf32>
    %c0_258 = arith.constant 0 : index
    %c0_259 = arith.constant 0 : index
    %436 = vector.load %arg12[%c0_258, %c0_259] : memref<64x64xf32, #tpu.memory_space<vmem>>, vector<64x64xf32>
    %cst_260 = arith.constant dense<0.000000e+00> : vector<64x8xf32>
    %437 = tpu.matmul %436, %435, %cst_260 {dimension_numbers = #tpu.dot_dimension_numbers<[1], [0], [0], [1], [0, 0, 1, 1], [], []>} : vector<64x64xf32>, vector<64x8xf32>, vector<64x8xf32> -> vector<64x8xf32>
    %c0_261 = arith.constant 0 : index
    %c0_262 = arith.constant 0 : index
    %438 = vector.load %arg13[%c0_261, %c0_262] : memref<8x8xf32, #tpu.memory_space<vmem>>, vector<8x8xf32>
    %cst_263 = arith.constant dense<0.000000e+00> : vector<64x8xf32>
    %439 = tpu.matmul %437, %438, %cst_263 {dimension_numbers = #tpu.dot_dimension_numbers<[1], [0], [0], [1], [0, 0, 1, 1], [], []>} : vector<64x8xf32>, vector<8x8xf32>, vector<64x8xf32> -> vector<64x8xf32>
    %c0_264 = arith.constant 0 : index
    %c0_265 = arith.constant 0 : index
    %440 = vector.load %arg14[%c0_264, %c0_265] : memref<1x8xf32, #tpu.memory_space<vmem>>, vector<1x8xf32>
    %441 = vector.broadcast %440 : vector<1x8xf32> to vector<64x8xf32>
    %442 = arith.addf %439, %441 : vector<64x8xf32>
    %c0_266 = arith.constant 0 : index
    %c0_267 = arith.constant 0 : index
    %c0_268 = arith.constant 0 : index
    %443 = vector.load %arg15[%c0_266, %c0_267, %c0_268] : memref<1x64x8xf32, #tpu.memory_space<vmem>>, vector<1x64x8xf32>
    %444 = vector.shape_cast %443 : vector<1x64x8xf32> to vector<64x8xf32>
    %445 = vector.shape_cast %442 : vector<64x8xf32> to vector<1x64x8xf32>
    tpu.vector_store %arg15[%c0_266, %c0_267, %c0_268], %445 {strides = array<i32>} : memref<1x64x8xf32, #tpu.memory_space<vmem>>, vector<1x64x8xf32>,
    return
  }
  func.func @transform_0(%arg0: i32) -> (i32, i32, i32) {
    %c0_i32 = arith.constant 0 : i32
    %c0_i32_0 = arith.constant 0 : i32
    %c0_i32_1 = arith.constant 0 : i32
    return %arg0, %c0_i32, %c0_i32_0 : i32, i32, i32
  }
  func.func @transform_1(%arg0: i32) -> (i32, i32) {
    %c0_i32 = arith.constant 0 : i32
    %c0_i32_0 = arith.constant 0 : i32
    %c0_i32_1 = arith.constant 0 : i32
    return %c0_i32, %c0_i32_0 : i32, i32
  }
  func.func @transform_2(%arg0: i32) -> (i32, i32) {
    %c0_i32 = arith.constant 0 : i32
    %c0_i32_0 = arith.constant 0 : i32
    %c0_i32_1 = arith.constant 0 : i32
    return %c0_i32, %c0_i32_0 : i32, i32
  }
  func.func @transform_3(%arg0: i32) -> (i32, i32, i32) {
    %c0_i32 = arith.constant 0 : i32
    %c0_i32_0 = arith.constant 0 : i32
    %c0_i32_1 = arith.constant 0 : i32
    %c0_i32_2 = arith.constant 0 : i32
    return %c0_i32, %c0_i32_0, %c0_i32_1 : i32, i32, i32
  }
  func.func @transform_4(%arg0: i32) -> (i32, i32) {
    %c0_i32 = arith.constant 0 : i32
    %c0_i32_0 = arith.constant 0 : i32
    %c0_i32_1 = arith.constant 0 : i32
    return %c0_i32, %c0_i32_0 : i32, i32
  }
  func.func @transform_5(%arg0: i32) -> (i32, i32, i32) {
    %c0_i32 = arith.constant 0 : i32
    %c0_i32_0 = arith.constant 0 : i32
    %c0_i32_1 = arith.constant 0 : i32
    %c0_i32_2 = arith.constant 0 : i32
    return %c0_i32, %c0_i32_0, %c0_i32_1 : i32, i32, i32
  }
  func.func @transform_6(%arg0: i32) -> (i32, i32) {
    %c0_i32 = arith.constant 0 : i32
    %c0_i32_0 = arith.constant 0 : i32
    %c0_i32_1 = arith.constant 0 : i32
    return %c0_i32, %c0_i32_0 : i32, i32
  }
  func.func @transform_7(%arg0: i32) -> (i32, i32) {
    %c0_i32 = arith.constant 0 : i32
    %c0_i32_0 = arith.constant 0 : i32
    %c0_i32_1 = arith.constant 0 : i32
    return %c0_i32, %c0_i32_0 : i32, i32
  }
  func.func @transform_8(%arg0: i32) -> (i32, i32) {
    %c0_i32 = arith.constant 0 : i32
    %c0_i32_0 = arith.constant 0 : i32
    %c0_i32_1 = arith.constant 0 : i32
    return %c0_i32, %c0_i32_0 : i32, i32
  }
  func.func @transform_9(%arg0: i32) -> (i32, i32) {
    %c0_i32 = arith.constant 0 : i32
    %c0_i32_0 = arith.constant 0 : i32
    %c0_i32_1 = arith.constant 0 : i32
    return %c0_i32, %c0_i32_0 : i32, i32
  }
  func.func @transform_10(%arg0: i32) -> (i32, i32) {
    %c0_i32 = arith.constant 0 : i32
    %c0_i32_0 = arith.constant 0 : i32
    %c0_i32_1 = arith.constant 0 : i32
    return %c0_i32, %c0_i32_0 : i32, i32
  }
  func.func @transform_11(%arg0: i32) -> (i32, i32) {
    %c0_i32 = arith.constant 0 : i32
    %c0_i32_0 = arith.constant 0 : i32
    %c0_i32_1 = arith.constant 0 : i32
    return %c0_i32, %c0_i32_0 : i32, i32
  }
  func.func @transform_12(%arg0: i32) -> (i32, i32) {
    %c0_i32 = arith.constant 0 : i32
    %c0_i32_0 = arith.constant 0 : i32
    %c0_i32_1 = arith.constant 0 : i32
    return %c0_i32, %c0_i32_0 : i32, i32
  }
  func.func @transform_13(%arg0: i32) -> (i32, i32) {
    %c0_i32 = arith.constant 0 : i32
    %c0_i32_0 = arith.constant 0 : i32
    %c0_i32_1 = arith.constant 0 : i32
    return %c0_i32, %c0_i32_0 : i32, i32
  }
  func.func @transform_14(%arg0: i32) -> (i32, i32, i32) {
    %c0_i32 = arith.constant 0 : i32
    %c0_i32_0 = arith.constant 0 : i32
    %c0_i32_1 = arith.constant 0 : i32
    return %arg0, %c0_i32, %c0_i32_0 : i32, i32, i32
  }
}

</mosaic_0001>

<bundles_post_ra>
// kernel: deform_atten2d_forward.1
= control target key start
LH: loop header
LB: loop body
LE: loop exit
PB: predicated region body
PF: predicated region fallthrough
CT: control target
= control target key end

     0   :  { %s8160_s0 = inlined_call_operand.vmem [shape: f32[2,8,64], index: 0, kind: input, shape index: {}]   ;;  %s8161_s1 = inlined_call_operand.vmem [shape: f32[8,8], index: 1, kind: input, shape index: {}]   ;;  %s8162_s2 = inlined_call_operand.vmem [shape: f32[8,1], index: 2, kind: input, shape index: {}]   ;;  %s8163_s3 = inlined_call_operand.vmem [shape: f32[25,2,8], index: 3, kind: input, shape index: {}]   ;;  %s8164_s4 = inlined_call_operand.vmem [shape: f32[2,1], index: 4, kind: input, shape index: {}]   ;;  %s8165_s5 = inlined_call_operand.hbm [shape: f32[25,64,64], index: 5, kind: input, shape index: {}]   ;;  %s8166_s6 = inlined_call_operand.vmem [shape: f32[2,64], index: 6, kind: input, shape index: {}]   ;;  %s8167_s7 = inlined_call_operand.vmem [shape: f32[16,8], index: 7, kind: input, shape index: {}]   ;;  %s8168_s8 = inlined_call_operand.vmem [shape: f32[16,1], index: 8, kind: input, shape index: {}]   ;;  %s8169_s9 = inlined_call_operand.vmem [shape: f32[8,64], index: 9, kind: input, shape index: {}]   ;;  %s8170_s10 = inlined_call_operand.vmem [shape: f32[64,64], index: 10, kind: input, shape index: {}]   ;;  %s8171_s11 = inlined_call_operand.vmem [shape: f32[64,64], index: 11, kind: input, shape index: {}]   ;;  %s8172_s12 = inlined_call_operand.vmem [shape: f32[8,8], index: 12, kind: input, shape index: {}]   ;;  %s8173_s13 = inlined_call_operand.vmem [shape: f32[1,8], index: 13, kind: input, shape index: {}]   ;;  %s8174_s14 = inlined_call_operand.hbm [shape: f32[2,64,8], index: 14, kind: output, shape index: {}]  }
   0x1   :  { %8179 = sst [smem:[#allocation10_spill]] %s8160_s0 }
   0x2   :  { %8180 = sst [smem:[#allocation11_spill]] %s8165_s5 }
   0x3   :  { %19 = vsyncpa [#allocation3], 0 }
   0x4   :  { %20 = vsyncpa [#allocation4], 0 }
   0x5   :  { %22 = vsyncpa [#allocation4 + $0x1], 0  ;;  %s7110_s29 = smov 0   ;;  %s7112_s30 = smov 0  }
   0x6   :  { %s7114_s15 = smov 0   ;;  %s7116_s16 = smov 0  }
   0x7 LB: > { %8181 = sst [smem:[#allocation8_spill]] %s7013_s15  ;;  %s7131_s17 = sadd.s32 4294967295, %s7017_s16   ;;  %s7017_s16 = sphi %s7116_s16, %s8202_s16   ;;  %s7013_s15 = sphi %s7114_s15, %s8199_s15   ;;  %s7009_s30 = sphi %s7112_s30, %s8201_s30   ;;  %s7005_s29 = sphi %s7110_s29, %s8200_s29  }
   0x8   : > { %s5636_s18 = sadd.s32 4294967294, %s7017_s16   ;;  %s7135_s19 = sadd.s32 1, %s7017_s16  }
   0x9   : > { %s334_s20 = sadd.s32 1, %s7013_s15  ;;  %s331_s21 = ssub.s32 %s7017_s16, %s7135_s19 }
   0xa   : > { %p344_p0 = scmp.ne.s32.totalorder %s7013_s15, %s7009_s30  ;;  %p332_p1 = scmp.eq.s32.totalorder %s331_s21, 0 }
   0xb   : > { %p345_p2 = scmp.eq.s32.totalorder %s7131_s17, 1  ;;  %p350_p3 = scmp.ne.s32.totalorder %s7009_s30, %s7005_s29 }
   0xc   : > { %p351_p4 = scmp.eq.s32.totalorder %s5636_s18, 1  ;;  %p5637_p7 = scmp.ge.s32.totalorder %s7017_s16, 1 }
   0xd   : > { %s7146_s22 = scalar_select %p332_p1, %s7013_s15, %s334_s20  }
   0xe   : > { %p7148_p5 = por %p345_p2, %p344_p0  ;;  %p7152_p6 = por %p351_p4, %p350_p3 }
   0xf   : > { %8182 = sst [smem:[#allocation9_spill]] %s7146_s22  ;;  %p358_p8 = scmp.lt.s32.totalorder %s7017_s16, 3 }
  0x10   : > { %s8184_s24 = scalar_select %p7152_p6, 1, 0 }
  0x11   : > { %p6840_p9 = scmp.eq.s32.totalorder %s7131_s17, 0  ;;  %p7159_p10 = pnand %p5637_p7, %p358_p8 }
  0x12   : > { %s7019_s26 = smov [#allocation2]  }
  0x13   : > { %s382_s27 = sshll.u32 %s7019_s26, 4  ;;  %p6832_p11 = pneg %p7159_p10  ;;  %s383_s27 = int_to_ptr.vmem [resolvable:$true] %s382_s27 }
  0x14   : > { %s6938_s28 = scalar_lea.vmem %s383_s27, 25600  ;;  %p6946_p3 = scmp.lt.s32.totalorder %s383_s27, %s383_s27 }
  0x15   : > { %p6833_p12 = pnand %p6840_p9, %p6832_p11  ;;  %p6939_p0 = scmp.ne.s32.totalorder %s383_s27, %s6938_s28 }
  0x16   : > { %p6947_p4 = scmp.lt.s32.totalorder %s6938_s28, %s6938_s28 }
  0x17   : > { %p6929_p13 = pneg %p6833_p12 }
  0x18   : > { %p6948_p6 = por %p6947_p4, %p6946_p3 }
  0x19   : > { %p6941_p1 = pnand %p6939_p0, %p6929_p13 }
  0x1b   : > { %p6942_p2 = pneg %p6941_p1 }
  0x1d   : > { %p6949_p7 = pnand %p6948_p6, %p6942_p2 }
  0x1f   : > { %6952 = shalt.err (!%p6949_p7)
}
  0x20   : > { %s7020_s18 = smov 128   ;;  %s7021_s20 = smov 8  }
  0x21   : > { %s8186_s5 = sld [smem:[#allocation11_spill]] }
  0x23   : > { %429 = sbr.rel (%p7159_p10) target bundleno = 4991 (0x137f), region = 76 }
  0x27   : > { %6835 = dma.hbm_to_vmem [thread:$0]  (!%p6833_p12), %s8186_s5, 25600, %s383_s27, [#allocation3], %s7020_s18, %s7020_s18, %s7021_s20  }
  0x28   : > { %6996 = dma.done.wait (%p6840_p9), [#allocation3], 25600  }
  0x29   : > { %6998 = vsyncadd (%p6840_p9), [#allocation3], 4294941696  ;;  %p474_p8 = scmp.lt.s32.totalorder %s7131_s17, 1  ;;  %v7022_v0 = vmov 0.0   ;;  %vm7023_vm0 = vmmov 0   ;;  %v7024_v1 = vmov 0  }
  0x2a   : > { %6117 = vmatprep.subr.mxu0 %v7022_v0  ;;  %6119 = vmatprep.mubr.msk.f32.mxu0 %vm7023_vm0, %v7022_v0  ;;  %s8187_s0 = sld [smem:[#allocation10_spill]]  ;;  %vm487_vm1 = vcmask 64512   ;;  %v480_v3 = vld [vmem:[%s8161_s1] sm:$0xff]  ;;  %v726_v12 = vld [vmem:[#allocation2 + $0x78] sm:$0xff]  ;;  %v725_v14 = vld [vmem:[#allocation2 + $0x70] sm:$0xff]  ;;  %vm727_vm2 = vcmask 523264  }
  0x2b   : > { %s475_s22 = scalar_select %p474_p8, %s7131_s17, 1  ;;  %6890 = vset.pattern.permute.xlu0 %v7024_v1  ;;  %6122 = vmatprep.subr.mxu1 %v7022_v0  ;;  %v481_v4 = vld [vmem:[%s8162_s2] sm:$0xff]  ;;  %v642_v13 = vld [vmem:[#allocation2 + $0x38] sm:$0xff]  ;;  %v641_v15 = vld [vmem:[#allocation2 + $0x30] sm:$0xff] }
  0x2c   : > { %6124 = vmatprep.mubr.msk.f32.mxu1 %vm7023_vm0, %v7022_v0  ;;  %6891 = vset.pattern.permute.xlu1 %v7024_v1  ;;  %v4508_v5 = vld [vmem:[%s8164_s4] sm:$0x3]  ;;  %v5646_v10 = vld [vmem:[%s8163_s3 + $0x2] sm:$0x3]  ;;  %v724_v16 = vld [vmem:[#allocation2 + $0x68] sm:$0xff]  ;;  %s7026_s20 = smov 80  }
  0x2d   : > { %s5643_s25 = sshll.u32 %s475_s22, 3  ;;  %484 = vperm.xlu0 %6890, %v481_v4   ;;  %v561_v9 = vld [vmem:[%s8163_s3] sm:$0x3]  ;;  %v640_v17 = vld [vmem:[#allocation2 + $0x28] sm:$0xff]  ;;  %v722_v20 = vld [vmem:[#allocation2 + $0x58] sm:$0xff]  ;;  %s7027_s21 = smov 88  }
  0x2e   : > { %v723_v18 = vld [vmem:[#allocation2 + $0x60] sm:$0xff]  ;;  %v638_v21 = vld [vmem:[#allocation2 + $0x18] sm:$0xff]  ;;  %v721_v22 = vld [vmem:[#allocation2 + $0x50] sm:$0xff]  ;;  %s7028_s22 = smov 96   ;;  %s8177_s5 = smov 104  }
  0x2f   : > { %v639_v19 = vld [vmem:[#allocation2 + $0x20] sm:$0xff]  ;;  %v637_v23 = vld [vmem:[#allocation2 + $0x10] sm:$0xff]  ;;  %v720_v24 = vld [vmem:[#allocation2 + $0x48] sm:$0xff]  ;;  %s8176_s26 = smov 120   ;;  %s8196_s27 = smov 120  }
  0x30   : > { %s7187_s28 = scalar_lea.vmem %s8187_s0, %s5643_s25  ;;  %v636_v25 = vld [vmem:[#allocation2 + $0x8] sm:$0xff]  ;;  %v719_v26 = vld [vmem:[#allocation2 + $0x40] sm:$0xff]  ;;  %v957_v34 = vld [vmem:[#allocation2 + $0xb8] sm:$0xff]  ;;  %s8178_s25 = smov 112  }
  0x31   : > { %v479_v2 = vld [vmem:[%s7187_s28] sm:$0xff]  ;;  %4511 = vperm.xlu0 %6890, %v4508_v5   ;;  %v1115_v35 = vld [vmem:[#allocation2 + $0xf8] sm:$0xff]  ;;  %v956_v36 = vld [vmem:[#allocation2 + $0xb0] sm:$0xff]  ;;  %s7032_s15 = smov [#allocation5]  }
  0x32   : > { %6118 = vmatpush3.msra.mxu0 %v479_v2  ;;  %v635_v27 = vld [vmem:[#allocation2] sm:$0xff]  ;;  %v1114_v37 = vld [vmem:[#allocation2 + $0xf0] sm:$0xff]  ;;  %v955_v38 = vld [vmem:[#allocation2 + $0xa8] sm:$0xff] }
  0x33   : > { %6120 = vmatmul.mubr.msk.f32.vlgmr.msra.gmra.mxu0 %vm487_vm1, %v480_v3  ;;  %6127 = vmatprep.subr.mxu0 %v7022_v0  ;;  %v5650_v31 = vld [vmem:[%s8163_s3 + $0x4] sm:$0x3]  ;;  %v5653_v32 = vld [vmem:[%s8163_s3 + $0x6] sm:$0x3]  ;;  %v1113_v39 = vld [vmem:[#allocation2 + $0xe8] sm:$0xff] }
  0x34   : > { %6129 = vmatprep.mubr.msk.f32.mxu0 %vm7023_vm0, %v7022_v0  ;;  %v954_v40 = vld [vmem:[#allocation2 + $0xa0] sm:$0xff]  ;;  %v953_v42 = vld [vmem:[#allocation2 + $0x98] sm:$0xff]  ;;  %v952_v44 = vld [vmem:[#allocation2 + $0x90] sm:$0xff] }
  0x35   : > { %v1112_v41 = vld [vmem:[#allocation2 + $0xe0] sm:$0xff]  ;;  %v1111_v43 = vld [vmem:[#allocation2 + $0xd8] sm:$0xff]  ;;  %v1110_v45 = vld [vmem:[#allocation2 + $0xd0] sm:$0xff] }
  0x36   : > { %v951_v46 = vld [vmem:[#allocation2 + $0x88] sm:$0xff]  ;;  %v950_v48 = vld [vmem:[#allocation2 + $0x80] sm:$0xff]  ;;  %v1273_v61 = vld [vmem:[#allocation2 + $0x138] sm:$0xff] }
  0x37   : > { %v1109_v47 = vld [vmem:[#allocation2 + $0xc8] sm:$0xff]  ;;  %v1108_v49 = vld [vmem:[#allocation2 + $0xc0] sm:$0xff]  ;;  %v1431_v62 = vld [vmem:[#allocation2 + $0x178] sm:$0xff] }
  0x38   : > { %v5656_v58 = vld [vmem:[%s8163_s3 + $0x8] sm:$0x3]  ;;  %v5659_v59 = vld [vmem:[%s8163_s3 + $0xa] sm:$0x3]  ;;  %v1272_v63 = vld [vmem:[#allocation2 + $0x130] sm:$0xff] }
  0x39   : > { %v1430_v1 = vld [vmem:[#allocation2 + $0x170] sm:$0xff]  ;;  %v1271_v2 = vld [vmem:[#allocation2 + $0x128] sm:$0xff]  ;;  %v1270_v4 = vld [vmem:[#allocation2 + $0x120] sm:$0xff] }
  0x3a   : > { %v1429_v3 = vld [vmem:[#allocation2 + $0x168] sm:$0xff]  ;;  %v1428_v5 = vld [vmem:[#allocation2 + $0x160] sm:$0xff] }
  0xa8   : > { %v485_v6 = vpop.permute.xlu0 %484 }
  0xf3   : > { %v557_v7 = vpop.f32.mrf.mxu0 }
  0xf4   : > { %v7203_v8 = vadd.f32 %v557_v7, %v485_v6  ;;  %v1269_v6 = vld [vmem:[#allocation2 + $0x118] sm:$0xff] }
  0xf5   : > { %v6121_v11 = vpop.f32.mrf.mxu0  ;;  %v1427_v7 = vld [vmem:[#allocation2 + $0x158] sm:$0xff] }
  0xf6   : > { %6123 = vmatpush3.msra.mxu1 %v7203_v8  ;;  %6128 = vmatpush3.msra.mxu0 %v7203_v8  ;;  %v1267_v11 = vld [vmem:[#allocation2 + $0x108] sm:$0xff] }
  0xf7   : > { %6125 = vmatmul.mubr.msk.f32.vlgmr.msra.gmra.mxu1 %vm487_vm1, %v561_v9  ;;  %6130 = vmatmul.mubr.msk.f32.vlgmr.msra.gmra.mxu0 %vm487_vm1, %v5646_v10  ;;  %v1268_v9 = vld [vmem:[#allocation2 + $0x110] sm:$0xff] }
  0xf8   : > { %6132 = vmatprep.subr.mxu1 %v7022_v0  ;;  %6151 = vmatprep.subr.mxu0 %v7022_v0  ;;  %v1426_v10 = vld [vmem:[#allocation2 + $0x150] sm:$0xff] }
  0xf9   : > { %6133 = vmatpush3.msra.mxu1 %v726_v12  ;;  %6152 = vmatpush3.msra.mxu0 %v642_v13  ;;  %v1425_v12 = vld [vmem:[#allocation2 + $0x148] sm:$0xff]  ;;  %v1266_v13 = vld [vmem:[#allocation2 + $0x100] sm:$0xff] }
  0xfa   : > { %6134 = vmatprep.subr.mxu1 %v7022_v0  ;;  %6153 = vmatprep.subr.mxu0 %v7022_v0 }
  0xfb   : > { %6135 = vmatpush3.msra.mxu1 %v725_v14  ;;  %6154 = vmatpush3.msra.mxu0 %v641_v15  ;;  %v1424_v14 = vld [vmem:[#allocation2 + $0x140] sm:$0xff] }
  0xfc   : > { %6136 = vmatprep.subr.mxu1 %v7022_v0  ;;  %6155 = vmatprep.subr.mxu0 %v7022_v0 }
  0xfd   : > { %6137 = vmatpush3.msra.mxu1 %v724_v16  ;;  %6156 = vmatpush3.msra.mxu0 %v640_v17 }
  0xfe   : > { %6138 = vmatprep.subr.mxu1 %v7022_v0  ;;  %6157 = vmatprep.subr.mxu0 %v7022_v0 }
  0xff   : > { %6139 = vmatpush3.msra.mxu1 %v723_v18  ;;  %6158 = vmatpush3.msra.mxu0 %v639_v19 }
 0x100   : > { %6140 = vmatprep.subr.mxu1 %v7022_v0  ;;  %6159 = vmatprep.subr.mxu0 %v7022_v0 }
 0x101   : > { %6141 = vmatpush3.msra.mxu1 %v722_v20  ;;  %6160 = vmatpush3.msra.mxu0 %v638_v21 }
 0x102   : > { %6142 = vmatprep.subr.mxu1 %v7022_v0  ;;  %6161 = vmatprep.subr.mxu0 %v7022_v0 }
 0x103   : > { %6143 = vmatpush3.msra.mxu1 %v721_v22  ;;  %6162 = vmatpush3.msra.mxu0 %v637_v23 }
 0x104   : > { %6144 = vmatprep.subr.mxu1 %v7022_v0  ;;  %6163 = vmatprep.subr.mxu0 %v7022_v0 }
 0x105   : > { %6145 = vmatpush3.msra.mxu1 %v720_v24  ;;  %6164 = vmatpush3.msra.mxu0 %v636_v25  ;;  %v5662_v24 = vld [vmem:[%s8163_s3 + $0xc] sm:$0x3]  ;;  %v5665_v25 = vld [vmem:[%s8163_s3 + $0xe] sm:$0x3] }
 0x106   : > { %6146 = vmatprep.subr.mxu1 %v7022_v0  ;;  %6165 = vmatprep.subr.mxu0 %v7022_v0 }
 0x107   : > { %6147 = vmatpush3.msra.mxu1 %v719_v26  ;;  %6166 = vmatpush3.msra.mxu0 %v635_v27  ;;  %v1589_v27 = vld [vmem:[#allocation2 + $0x1b8] sm:$0xff] }
 0x108   : > { %6148 = vmatprep.mubr.msk.f32.mxu1 %vm7023_vm0, %v7022_v0  ;;  %6167 = vmatprep.mubr.msk.f32.mxu0 %vm7023_vm0, %v7022_v0 }
 0x109   : > { %6170 = vmatprep.subr.mxu0 %v7022_v0  ;;  %6194 = vmatprep.subr.mxu1 %v7022_v0 }
 0x1b7   : > { %v631_v28 = vpop.f32.mrf.mxu1  ;;  %v714_v29 = vpop.f32.mrf.mxu0 }
 0x1b8   : > { %6149 = vmatmul.mubr.msk.f32.vlgmr.msra.gmra.mxu1 %vm727_vm2, %v714_v29  ;;  %6168 = vmatmul.mubr.msk.f32.vlgmr.msra.gmra.mxu0 %vm727_vm2, %v631_v28  ;;  %v1747_v28 = vld [vmem:[#allocation2 + $0x1f8] sm:$0xff]  ;;  %v1588_v29 = vld [vmem:[#allocation2 + $0x1b0] sm:$0xff] }
 0x1b9   : > { %6171 = vmatpush3.msra.mxu0 %v7203_v8  ;;  %6195 = vmatpush3.msra.mxu1 %v7203_v8  ;;  %v6126_v30 = vpop.f32.mrf.mxu1  ;;  %v6131_v33 = vpop.f32.mrf.mxu0 }
 0x1ba   : > { %6172 = vmatprep.mubr.msk.f32.mxu0 %vm7023_vm0, %v7022_v0  ;;  %6196 = vmatprep.mubr.msk.f32.mxu1 %vm7023_vm0, %v7022_v0  ;;  %v1746_v30 = vld [vmem:[#allocation2 + $0x1f0] sm:$0xff]  ;;  %v1586_v33 = vld [vmem:[#allocation2 + $0x1a0] sm:$0xff] }
 0x1bb   : > { %6175 = vmatprep.subr.mxu0 %v7022_v0  ;;  %6199 = vmatprep.subr.mxu1 %v7022_v0 }
 0x1bc   : > { %6173 = vmatmul.mubr.msk.f32.vlgmr.msra.gmra.mxu0 %vm487_vm1, %v5650_v31  ;;  %6197 = vmatmul.mubr.msk.f32.vlgmr.msra.gmra.mxu1 %vm487_vm1, %v5653_v32  ;;  %v1587_v31 = vld [vmem:[#allocation2 + $0x1a8] sm:$0xff] }
 0x1bd   : > { %6176 = vmatpush3.msra.mxu0 %v957_v34  ;;  %6200 = vmatpush3.msra.mxu1 %v1115_v35  ;;  %v1745_v32 = vld [vmem:[#allocation2 + $0x1e8] sm:$0xff]  ;;  %v1744_v34 = vld [vmem:[#allocation2 + $0x1e0] sm:$0xff]  ;;  %v1585_v35 = vld [vmem:[#allocation2 + $0x198] sm:$0xff] }
 0x1be   : > { %6177 = vmatprep.subr.mxu0 %v7022_v0  ;;  %6201 = vmatprep.subr.mxu1 %v7022_v0 }
 0x1bf   : > { %6178 = vmatpush3.msra.mxu0 %v956_v36  ;;  %6202 = vmatpush3.msra.mxu1 %v1114_v37  ;;  %v1743_v36 = vld [vmem:[#allocation2 + $0x1d8] sm:$0xff]  ;;  %v1584_v37 = vld [vmem:[#allocation2 + $0x190] sm:$0xff] }
 0x1c0   : > { %6179 = vmatprep.subr.mxu0 %v7022_v0  ;;  %6203 = vmatprep.subr.mxu1 %v7022_v0 }
 0x1c1   : > { %6180 = vmatpush3.msra.mxu0 %v955_v38  ;;  %6204 = vmatpush3.msra.mxu1 %v1113_v39  ;;  %v1742_v38 = vld [vmem:[#allocation2 + $0x1d0] sm:$0xff]  ;;  %v1583_v39 = vld [vmem:[#allocation2 + $0x188] sm:$0xff] }
 0x1c2   : > { %6181 = vmatprep.subr.mxu0 %v7022_v0  ;;  %6205 = vmatprep.subr.mxu1 %v7022_v0 }
 0x1c3   : > { %6182 = vmatpush3.msra.mxu0 %v954_v40  ;;  %6206 = vmatpush3.msra.mxu1 %v1112_v41  ;;  %v1741_v40 = vld [vmem:[#allocation2 + $0x1c8] sm:$0xff]  ;;  %v1582_v41 = vld [vmem:[#allocation2 + $0x180] sm:$0xff] }
 0x1c4   : > { %6183 = vmatprep.subr.mxu0 %v7022_v0  ;;  %6207 = vmatprep.subr.mxu1 %v7022_v0 }
 0x1c5   : > { %6184 = vmatpush3.msra.mxu0 %v953_v42  ;;  %6208 = vmatpush3.msra.mxu1 %v1111_v43  ;;  %v1740_v42 = vld [vmem:[#allocation2 + $0x1c0] sm:$0xff] }
 0x1c6   : > { %6185 = vmatprep.subr.mxu0 %v7022_v0  ;;  %6209 = vmatprep.subr.mxu1 %v7022_v0 }
 0x1c7   : > { %6186 = vmatpush3.msra.mxu0 %v952_v44  ;;  %6210 = vmatpush3.msra.mxu1 %v1110_v45 }
 0x1c8   : > { %6187 = vmatprep.subr.mxu0 %v7022_v0  ;;  %6211 = vmatprep.subr.mxu1 %v7022_v0 }
 0x1c9   : > { %6191 = vmatprep.mubr.msk.f32.mxu0 %vm7023_vm0, %v7022_v0  ;;  %6215 = vmatprep.mubr.msk.f32.mxu1 %vm7023_vm0, %v7022_v0 }
 0x1ca   : > { %6188 = vmatpush3.msra.mxu0 %v951_v46  ;;  %6212 = vmatpush3.msra.mxu1 %v1109_v47 }
 0x1cb   : > { %6189 = vmatprep.subr.mxu0 %v7022_v0  ;;  %6213 = vmatprep.subr.mxu1 %v7022_v0 }
 0x1cc   : > { %6190 = vmatpush3.msra.mxu0 %v950_v48  ;;  %6214 = vmatpush3.msra.mxu1 %v1108_v49 }
 0x1cd   : > { %6218 = vmatprep.subr.mxu0 %v7022_v0  ;;  %6242 = vmatprep.subr.mxu1 %v7022_v0 }
 0x278   : > { %v797_v50 = vpop.f32.mrf.mxu1  ;;  %v870_v51 = vpop.f32.mrf.mxu0 }
 0x279   : > { %v7275_v52 = vadd.f32 %v870_v51, %v797_v50 }
 0x27a   : > { %v6150_v53 = vpop.f32.mrf.mxu1  ;;  %v6169_v54 = vpop.f32.mrf.mxu0 }
 0x27b   : > { %v5671_v53 = vld [vmem:[%s8163_s3 + $0x12] sm:$0x3] }
 0x27c   : > { %v945_v55 = vpop.f32.mrf.mxu0  ;;  %v1103_v56 = vpop.f32.mrf.mxu1 }
 0x27d   : > { %6192 = vmatmul.mubr.msk.f32.vlgmr.msra.gmra.mxu0 %vm727_vm2, %v945_v55  ;;  %6216 = vmatmul.mubr.msk.f32.vlgmr.msra.gmra.mxu1 %vm727_vm2, %v1103_v56  ;;  %v1905_v55 = vld [vmem:[#allocation2 + $0x238] sm:$0xff] }
 0x27e   : > { %6219 = vmatpush3.msra.mxu0 %v7203_v8  ;;  %6243 = vmatpush3.msra.mxu1 %v7203_v8  ;;  %v6174_v57 = vpop.f32.mrf.mxu0  ;;  %v6198_v60 = vpop.f32.mrf.mxu1  ;;  %v2063_v56 = vld [vmem:[#allocation2 + $0x278] sm:$0xff] }
 0x27f   : > { %6220 = vmatprep.mubr.msk.f32.mxu0 %vm7023_vm0, %v7022_v0  ;;  %6244 = vmatprep.mubr.msk.f32.mxu1 %vm7023_vm0, %v7022_v0  ;;  %v1904_v57 = vld [vmem:[#allocation2 + $0x230] sm:$0xff]  ;;  %v2061_v60 = vld [vmem:[#allocation2 + $0x268] sm:$0xff] }
 0x280   : > { %6223 = vmatprep.subr.mxu0 %v7022_v0  ;;  %6247 = vmatprep.subr.mxu1 %v7022_v0 }
 0x281   : > { %6221 = vmatmul.mubr.msk.f32.vlgmr.msra.gmra.mxu0 %vm487_vm1, %v5656_v58  ;;  %6245 = vmatmul.mubr.msk.f32.vlgmr.msra.gmra.mxu1 %vm487_vm1, %v5659_v59  ;;  %v2062_v58 = vld [vmem:[#allocation2 + $0x270] sm:$0xff]  ;;  %v1903_v59 = vld [vmem:[#allocation2 + $0x228] sm:$0xff] }
 0x282   : > { %6224 = vmatpush3.msra.mxu0 %v1273_v61  ;;  %6248 = vmatpush3.msra.mxu1 %v1431_v62  ;;  %v1902_v61 = vld [vmem:[#allocation2 + $0x220] sm:$0xff] }
 0x283   : > { %6225 = vmatprep.subr.mxu0 %v7022_v0  ;;  %6249 = vmatprep.subr.mxu1 %v7022_v0  ;;  %v2060_v62 = vld [vmem:[#allocation2 + $0x260] sm:$0xff] }
 0x284   : > { %6226 = vmatpush3.msra.mxu0 %v1272_v63  ;;  %6250 = vmatpush3.msra.mxu1 %v1430_v1  ;;  %v1901_v63 = vld [vmem:[#allocation2 + $0x218] sm:$0xff] }
 0x285   : > { %6227 = vmatprep.subr.mxu0 %v7022_v0  ;;  %6251 = vmatprep.subr.mxu1 %v7022_v0  ;;  %v2059_v1 = vld [vmem:[#allocation2 + $0x258] sm:$0xff] }
 0x286   : > { %6228 = vmatpush3.msra.mxu0 %v1271_v2  ;;  %6252 = vmatpush3.msra.mxu1 %v1429_v3  ;;  %v1900_v2 = vld [vmem:[#allocation2 + $0x210] sm:$0xff] }
 0x287   : > { %6229 = vmatprep.subr.mxu0 %v7022_v0  ;;  %6253 = vmatprep.subr.mxu1 %v7022_v0  ;;  %v2058_v3 = vld [vmem:[#allocation2 + $0x250] sm:$0xff] }
 0x288   : > { %6230 = vmatpush3.msra.mxu0 %v1270_v4  ;;  %6254 = vmatpush3.msra.mxu1 %v1428_v5  ;;  %v1899_v4 = vld [vmem:[#allocation2 + $0x208] sm:$0xff] }
 0x289   : > { %6231 = vmatprep.subr.mxu0 %v7022_v0  ;;  %6255 = vmatprep.subr.mxu1 %v7022_v0  ;;  %v2057_v5 = vld [vmem:[#allocation2 + $0x248] sm:$0xff] }
 0x28a   : > { %6232 = vmatpush3.msra.mxu0 %v1269_v6  ;;  %6256 = vmatpush3.msra.mxu1 %v1427_v7  ;;  %v1898_v6 = vld [vmem:[#allocation2 + $0x200] sm:$0xff] }
 0x28b   : > { %6233 = vmatprep.subr.mxu0 %v7022_v0  ;;  %6257 = vmatprep.subr.mxu1 %v7022_v0  ;;  %v2056_v7 = vld [vmem:[#allocation2 + $0x240] sm:$0xff] }
 0x28c   : > { %6234 = vmatpush3.msra.mxu0 %v1268_v9  ;;  %6258 = vmatpush3.msra.mxu1 %v1426_v10 }
 0x28d   : > { %6235 = vmatprep.subr.mxu0 %v7022_v0  ;;  %6259 = vmatprep.subr.mxu1 %v7022_v0 }
 0x28e   : > { %6239 = vmatprep.mubr.msk.f32.mxu0 %vm7023_vm0, %v7022_v0  ;;  %6263 = vmatprep.mubr.msk.f32.mxu1 %vm7023_vm0, %v7022_v0 }
 0x28f   : > { %6236 = vmatpush3.msra.mxu0 %v1267_v11  ;;  %6260 = vmatpush3.msra.mxu1 %v1425_v12 }
 0x290   : > { %6237 = vmatprep.subr.mxu0 %v7022_v0  ;;  %6261 = vmatprep.subr.mxu1 %v7022_v0 }
 0x291   : > { %6238 = vmatpush3.msra.mxu0 %v1266_v13  ;;  %6262 = vmatpush3.msra.mxu1 %v1424_v14 }
 0x292   : > { %6266 = vmatprep.subr.mxu0 %v7022_v0  ;;  %6290 = vmatprep.subr.mxu1 %v7022_v0 }
 0x33d   : > { %v1027_v15 = vpop.f32.mrf.mxu0  ;;  %v1185_v16 = vpop.f32.mrf.mxu1 }
 0x33e   : > { %v1031_v17 = vadd.f32 %v1027_v15, %v7275_v52  ;;  %v5668_v52 = vld [vmem:[%s8163_s3 + $0x10] sm:$0x3] }
 0x33f   : > { %v6193_v18 = vpop.f32.mrf.mxu0  ;;  %v6217_v19 = vpop.f32.mrf.mxu1 }
 0x340   : > { %v7316_v20 = vadd.f32 %v1185_v16, %v1031_v17  ;;  %v5674_v18 = vld [vmem:[%s8163_s3 + $0x14] sm:$0x3]  ;;  %v5677_v19 = vld [vmem:[%s8163_s3 + $0x16] sm:$0x3] }
 0x341   : > { %v1261_v21 = vpop.f32.mrf.mxu0  ;;  %v1419_v22 = vpop.f32.mrf.mxu1 }
 0x342   : > { %6240 = vmatmul.mubr.msk.f32.vlgmr.msra.gmra.mxu0 %vm727_vm2, %v1261_v21  ;;  %6264 = vmatmul.mubr.msk.f32.vlgmr.msra.gmra.mxu1 %vm727_vm2, %v1419_v22  ;;  %v2221_v21 = vld [vmem:[#allocation2 + $0x2b8] sm:$0xff] }
 0x343   : > { %6267 = vmatpush3.msra.mxu0 %v7203_v8  ;;  %6291 = vmatpush3.msra.mxu1 %v7203_v8  ;;  %v6222_v23 = vpop.f32.mrf.mxu0  ;;  %v6246_v26 = vpop.f32.mrf.mxu1  ;;  %v2379_v22 = vld [vmem:[#allocation2 + $0x2f8] sm:$0xff] }
 0x344   : > { %6268 = vmatprep.mubr.msk.f32.mxu0 %vm7023_vm0, %v7022_v0  ;;  %6292 = vmatprep.mubr.msk.f32.mxu1 %vm7023_vm0, %v7022_v0  ;;  %v2220_v23 = vld [vmem:[#allocation2 + $0x2b0] sm:$0xff]  ;;  %v2377_v26 = vld [vmem:[#allocation2 + $0x2e8] sm:$0xff] }
 0x345   : > { %6271 = vmatprep.subr.mxu0 %v7022_v0  ;;  %6295 = vmatprep.subr.mxu1 %v7022_v0 }
 0x346   : > { %6269 = vmatmul.mubr.msk.f32.vlgmr.msra.gmra.mxu0 %vm487_vm1, %v5662_v24  ;;  %6293 = vmatmul.mubr.msk.f32.vlgmr.msra.gmra.mxu1 %vm487_vm1, %v5665_v25  ;;  %v2378_v24 = vld [vmem:[#allocation2 + $0x2f0] sm:$0xff]  ;;  %v2219_v25 = vld [vmem:[#allocation2 + $0x2a8] sm:$0xff] }
 0x347   : > { %6272 = vmatpush3.msra.mxu0 %v1589_v27  ;;  %6296 = vmatpush3.msra.mxu1 %v1747_v28  ;;  %v2218_v27 = vld [vmem:[#allocation2 + $0x2a0] sm:$0xff] }
 0x348   : > { %6273 = vmatprep.subr.mxu0 %v7022_v0  ;;  %6297 = vmatprep.subr.mxu1 %v7022_v0  ;;  %v2376_v28 = vld [vmem:[#allocation2 + $0x2e0] sm:$0xff] }
 0x349   : > { %6274 = vmatpush3.msra.mxu0 %v1588_v29  ;;  %6298 = vmatpush3.msra.mxu1 %v1746_v30  ;;  %v2217_v29 = vld [vmem:[#allocation2 + $0x298] sm:$0xff] }
 0x34a   : > { %6275 = vmatprep.subr.mxu0 %v7022_v0  ;;  %6299 = vmatprep.subr.mxu1 %v7022_v0  ;;  %v2375_v30 = vld [vmem:[#allocation2 + $0x2d8] sm:$0xff] }
 0x34b   : > { %6276 = vmatpush3.msra.mxu0 %v1587_v31  ;;  %6300 = vmatpush3.msra.mxu1 %v1745_v32  ;;  %v2216_v31 = vld [vmem:[#allocation2 + $0x290] sm:$0xff] }
 0x34c   : > { %6277 = vmatprep.subr.mxu0 %v7022_v0  ;;  %6301 = vmatprep.subr.mxu1 %v7022_v0  ;;  %v2374_v32 = vld [vmem:[#allocation2 + $0x2d0] sm:$0xff] }
 0x34d   : > { %6278 = vmatpush3.msra.mxu0 %v1586_v33  ;;  %6302 = vmatpush3.msra.mxu1 %v1744_v34  ;;  %v2215_v33 = vld [vmem:[#allocation2 + $0x288] sm:$0xff] }
 0x34e   : > { %6279 = vmatprep.subr.mxu0 %v7022_v0  ;;  %6303 = vmatprep.subr.mxu1 %v7022_v0  ;;  %v2373_v34 = vld [vmem:[#allocation2 + $0x2c8] sm:$0xff] }
 0x34f   : > { %6280 = vmatpush3.msra.mxu0 %v1585_v35  ;;  %6304 = vmatpush3.msra.mxu1 %v1743_v36  ;;  %v2214_v35 = vld [vmem:[#allocation2 + $0x280] sm:$0xff] }
 0x350   : > { %6281 = vmatprep.subr.mxu0 %v7022_v0  ;;  %6305 = vmatprep.subr.mxu1 %v7022_v0  ;;  %v2372_v36 = vld [vmem:[#allocation2 + $0x2c0] sm:$0xff] }
 0x351   : > { %6282 = vmatpush3.msra.mxu0 %v1584_v37  ;;  %6306 = vmatpush3.msra.mxu1 %v1742_v38 }
 0x352   : > { %6283 = vmatprep.subr.mxu0 %v7022_v0  ;;  %6307 = vmatprep.subr.mxu1 %v7022_v0 }
 0x353   : > { %6287 = vmatprep.mubr.msk.f32.mxu0 %vm7023_vm0, %v7022_v0  ;;  %6311 = vmatprep.mubr.msk.f32.mxu1 %vm7023_vm0, %v7022_v0 }
 0x354   : > { %6284 = vmatpush3.msra.mxu0 %v1583_v39  ;;  %6308 = vmatpush3.msra.mxu1 %v1741_v40 }
 0x355   : > { %6285 = vmatprep.subr.mxu0 %v7022_v0  ;;  %6309 = vmatprep.subr.mxu1 %v7022_v0 }
 0x356   : > { %6286 = vmatpush3.msra.mxu0 %v1582_v41  ;;  %6310 = vmatpush3.msra.mxu1 %v1740_v42 }
 0x357   : > { %6314 = vmatprep.subr.mxu0 %v7022_v0  ;;  %6338 = vmatprep.subr.mxu1 %v7022_v0 }
 0x402   : > { %v1343_v43 = vpop.f32.mrf.mxu0  ;;  %v1501_v44 = vpop.f32.mrf.mxu1 }
 0x403   : > { %v1347_v45 = vadd.f32 %v1343_v43, %v7316_v20 }
 0x404   : > { %v6241_v46 = vpop.f32.mrf.mxu0  ;;  %v6265_v47 = vpop.f32.mrf.mxu1 }
 0x405   : > { %v7357_v48 = vadd.f32 %v1501_v44, %v1347_v45  ;;  %v5680_v46 = vld [vmem:[%s8163_s3 + $0x18] sm:$0x3]  ;;  %v5683_v47 = vld [vmem:[%s8163_s3 + $0x1a] sm:$0x3] }
 0x406   : > { %v1577_v49 = vpop.f32.mrf.mxu0  ;;  %v1735_v50 = vpop.f32.mrf.mxu1 }
 0x407   : > { %6288 = vmatmul.mubr.msk.f32.vlgmr.msra.gmra.mxu0 %vm727_vm2, %v1577_v49  ;;  %6312 = vmatmul.mubr.msk.f32.vlgmr.msra.gmra.mxu1 %vm727_vm2, %v1735_v50  ;;  %v2537_v49 = vld [vmem:[#allocation2 + $0x338] sm:$0xff] }
 0x408   : > { %6315 = vmatpush3.msra.mxu0 %v7203_v8  ;;  %6339 = vmatpush3.msra.mxu1 %v7203_v8  ;;  %v6270_v51 = vpop.f32.mrf.mxu0  ;;  %v6294_v54 = vpop.f32.mrf.mxu1  ;;  %v2695_v50 = vld [vmem:[#allocation2 + $0x378] sm:$0xff] }
 0x409   : > { %6316 = vmatprep.mubr.msk.f32.mxu0 %vm7023_vm0, %v7022_v0  ;;  %6340 = vmatprep.mubr.msk.f32.mxu1 %vm7023_vm0, %v7022_v0  ;;  %v2536_v51 = vld [vmem:[#allocation2 + $0x330] sm:$0xff]  ;;  %v2693_v54 = vld [vmem:[#allocation2 + $0x368] sm:$0xff] }
 0x40a   : > { %6319 = vmatprep.subr.mxu0 %v7022_v0  ;;  %6343 = vmatprep.subr.mxu1 %v7022_v0 }
 0x40b   : > { %6317 = vmatmul.mubr.msk.f32.vlgmr.msra.gmra.mxu0 %vm487_vm1, %v5668_v52  ;;  %6341 = vmatmul.mubr.msk.f32.vlgmr.msra.gmra.mxu1 %vm487_vm1, %v5671_v53  ;;  %v2694_v52 = vld [vmem:[#allocation2 + $0x370] sm:$0xff]  ;;  %v2535_v53 = vld [vmem:[#allocation2 + $0x328] sm:$0xff] }
 0x40c   : > { %6320 = vmatpush3.msra.mxu0 %v1905_v55  ;;  %6344 = vmatpush3.msra.mxu1 %v2063_v56  ;;  %v2534_v55 = vld [vmem:[#allocation2 + $0x320] sm:$0xff] }
 0x40d   : > { %6321 = vmatprep.subr.mxu0 %v7022_v0  ;;  %6345 = vmatprep.subr.mxu1 %v7022_v0  ;;  %v2692_v56 = vld [vmem:[#allocation2 + $0x360] sm:$0xff] }
 0x40e   : > { %6322 = vmatpush3.msra.mxu0 %v1904_v57  ;;  %6346 = vmatpush3.msra.mxu1 %v2062_v58  ;;  %v2533_v57 = vld [vmem:[#allocation2 + $0x318] sm:$0xff] }
 0x40f   : > { %6323 = vmatprep.subr.mxu0 %v7022_v0  ;;  %6347 = vmatprep.subr.mxu1 %v7022_v0  ;;  %v2691_v58 = vld [vmem:[#allocation2 + $0x358] sm:$0xff] }
 0x410   : > { %6324 = vmatpush3.msra.mxu0 %v1903_v59  ;;  %6348 = vmatpush3.msra.mxu1 %v2061_v60  ;;  %v2532_v59 = vld [vmem:[#allocation2 + $0x310] sm:$0xff] }
 0x411   : > { %6325 = vmatprep.subr.mxu0 %v7022_v0  ;;  %6349 = vmatprep.subr.mxu1 %v7022_v0  ;;  %v2690_v60 = vld [vmem:[#allocation2 + $0x350] sm:$0xff] }
 0x412   : > { %6326 = vmatpush3.msra.mxu0 %v1902_v61  ;;  %6350 = vmatpush3.msra.mxu1 %v2060_v62  ;;  %v2531_v61 = vld [vmem:[#allocation2 + $0x308] sm:$0xff] }
 0x413   : > { %6327 = vmatprep.subr.mxu0 %v7022_v0  ;;  %6351 = vmatprep.subr.mxu1 %v7022_v0  ;;  %v2689_v62 = vld [vmem:[#allocation2 + $0x348] sm:$0xff] }
 0x414   : > { %6328 = vmatpush3.msra.mxu0 %v1901_v63  ;;  %6352 = vmatpush3.msra.mxu1 %v2059_v1  ;;  %v2530_v63 = vld [vmem:[#allocation2 + $0x300] sm:$0xff] }
 0x415   : > { %6329 = vmatprep.subr.mxu0 %v7022_v0  ;;  %6353 = vmatprep.subr.mxu1 %v7022_v0  ;;  %v2688_v1 = vld [vmem:[#allocation2 + $0x340] sm:$0xff] }
 0x416   : > { %6330 = vmatpush3.msra.mxu0 %v1900_v2  ;;  %6354 = vmatpush3.msra.mxu1 %v2058_v3 }
 0x417   : > { %6331 = vmatprep.subr.mxu0 %v7022_v0  ;;  %6355 = vmatprep.subr.mxu1 %v7022_v0 }
 0x418   : > { %6335 = vmatprep.mubr.msk.f32.mxu0 %vm7023_vm0, %v7022_v0  ;;  %6359 = vmatprep.mubr.msk.f32.mxu1 %vm7023_vm0, %v7022_v0 }
 0x419   : > { %6332 = vmatpush3.msra.mxu0 %v1899_v4  ;;  %6356 = vmatpush3.msra.mxu1 %v2057_v5 }
 0x41a   : > { %6333 = vmatprep.subr.mxu0 %v7022_v0  ;;  %6357 = vmatprep.subr.mxu1 %v7022_v0 }
 0x41b   : > { %6334 = vmatpush3.msra.mxu0 %v1898_v6  ;;  %6358 = vmatpush3.msra.mxu1 %v2056_v7 }
 0x41c   : > { %6362 = vmatprep.subr.mxu0 %v7022_v0  ;;  %6386 = vmatprep.subr.mxu1 %v7022_v0 }
 0x4c7   : > { %v1659_v9 = vpop.f32.mrf.mxu0  ;;  %v1817_v10 = vpop.f32.mrf.mxu1 }
 0x4c8   : > { %v1663_v11 = vadd.f32 %v1659_v9, %v7357_v48 }
 0x4c9   : > { %v6289_v12 = vpop.f32.mrf.mxu0  ;;  %v6313_v13 = vpop.f32.mrf.mxu1 }
 0x4ca   : > { %v7398_v14 = vadd.f32 %v1817_v10, %v1663_v11  ;;  %v5686_v12 = vld [vmem:[%s8163_s3 + $0x1c] sm:$0x3]  ;;  %v5689_v13 = vld [vmem:[%s8163_s3 + $0x1e] sm:$0x3] }
 0x4cb   : > { %v1893_v15 = vpop.f32.mrf.mxu0  ;;  %v2051_v16 = vpop.f32.mrf.mxu1 }
 0x4cc   : > { %6336 = vmatmul.mubr.msk.f32.vlgmr.msra.gmra.mxu0 %vm727_vm2, %v1893_v15  ;;  %6360 = vmatmul.mubr.msk.f32.vlgmr.msra.gmra.mxu1 %vm727_vm2, %v2051_v16  ;;  %v2853_v15 = vld [vmem:[#allocation2 + $0x3b8] sm:$0xff] }
 0x4cd   : > { %6363 = vmatpush3.msra.mxu0 %v7203_v8  ;;  %6387 = vmatpush3.msra.mxu1 %v7203_v8  ;;  %v6318_v17 = vpop.f32.mrf.mxu0  ;;  %v6342_v20 = vpop.f32.mrf.mxu1  ;;  %v3011_v16 = vld [vmem:[#allocation2 + $0x3f8] sm:$0xff] }
 0x4ce   : > { %6364 = vmatprep.mubr.msk.f32.mxu0 %vm7023_vm0, %v7022_v0  ;;  %6388 = vmatprep.mubr.msk.f32.mxu1 %vm7023_vm0, %v7022_v0  ;;  %v2852_v17 = vld [vmem:[#allocation2 + $0x3b0] sm:$0xff]  ;;  %v3009_v20 = vld [vmem:[#allocation2 + $0x3e8] sm:$0xff] }
 0x4cf   : > { %6367 = vmatprep.subr.mxu0 %v7022_v0  ;;  %6391 = vmatprep.subr.mxu1 %v7022_v0 }
 0x4d0   : > { %6365 = vmatmul.mubr.msk.f32.vlgmr.msra.gmra.mxu0 %vm487_vm1, %v5674_v18  ;;  %6389 = vmatmul.mubr.msk.f32.vlgmr.msra.gmra.mxu1 %vm487_vm1, %v5677_v19  ;;  %v3010_v18 = vld [vmem:[#allocation2 + $0x3f0] sm:$0xff]  ;;  %v2851_v19 = vld [vmem:[#allocation2 + $0x3a8] sm:$0xff] }
 0x4d1   : > { %6368 = vmatpush3.msra.mxu0 %v2221_v21  ;;  %6392 = vmatpush3.msra.mxu1 %v2379_v22  ;;  %v2850_v21 = vld [vmem:[#allocation2 + $0x3a0] sm:$0xff] }
 0x4d2   : > { %6369 = vmatprep.subr.mxu0 %v7022_v0  ;;  %6393 = vmatprep.subr.mxu1 %v7022_v0  ;;  %v3008_v22 = vld [vmem:[#allocation2 + $0x3e0] sm:$0xff] }
 0x4d3   : > { %6370 = vmatpush3.msra.mxu0 %v2220_v23  ;;  %6394 = vmatpush3.msra.mxu1 %v2378_v24  ;;  %v2849_v23 = vld [vmem:[#allocation2 + $0x398] sm:$0xff] }
 0x4d4   : > { %6371 = vmatprep.subr.mxu0 %v7022_v0  ;;  %6395 = vmatprep.subr.mxu1 %v7022_v0  ;;  %v3007_v24 = vld [vmem:[#allocation2 + $0x3d8] sm:$0xff] }
 0x4d5   : > { %6372 = vmatpush3.msra.mxu0 %v2219_v25  ;;  %6396 = vmatpush3.msra.mxu1 %v2377_v26  ;;  %v2848_v25 = vld [vmem:[#allocation2 + $0x390] sm:$0xff] }
 0x4d6   : > { %6373 = vmatprep.subr.mxu0 %v7022_v0  ;;  %6397 = vmatprep.subr.mxu1 %v7022_v0  ;;  %v3006_v26 = vld [vmem:[#allocation2 + $0x3d0] sm:$0xff] }
 0x4d7   : > { %6374 = vmatpush3.msra.mxu0 %v2218_v27  ;;  %6398 = vmatpush3.msra.mxu1 %v2376_v28  ;;  %v2847_v27 = vld [vmem:[#allocation2 + $0x388] sm:$0xff] }
 0x4d8   : > { %6375 = vmatprep.subr.mxu0 %v7022_v0  ;;  %6399 = vmatprep.subr.mxu1 %v7022_v0  ;;  %v3005_v28 = vld [vmem:[#allocation2 + $0x3c8] sm:$0xff] }
 0x4d9   : > { %6376 = vmatpush3.msra.mxu0 %v2217_v29  ;;  %6400 = vmatpush3.msra.mxu1 %v2375_v30  ;;  %v2846_v29 = vld [vmem:[#allocation2 + $0x380] sm:$0xff] }
 0x4da   : > { %6377 = vmatprep.subr.mxu0 %v7022_v0  ;;  %6401 = vmatprep.subr.mxu1 %v7022_v0  ;;  %v3004_v30 = vld [vmem:[#allocation2 + $0x3c0] sm:$0xff] }
 0x4db   : > { %6378 = vmatpush3.msra.mxu0 %v2216_v31  ;;  %6402 = vmatpush3.msra.mxu1 %v2374_v32 }
 0x4dc   : > { %6379 = vmatprep.subr.mxu0 %v7022_v0  ;;  %6403 = vmatprep.subr.mxu1 %v7022_v0 }
 0x4dd   : > { %6383 = vmatprep.mubr.msk.f32.mxu0 %vm7023_vm0, %v7022_v0  ;;  %6407 = vmatprep.mubr.msk.f32.mxu1 %vm7023_vm0, %v7022_v0 }
 0x4de   : > { %6380 = vmatpush3.msra.mxu0 %v2215_v33  ;;  %6404 = vmatpush3.msra.mxu1 %v2373_v34 }
 0x4df   : > { %6381 = vmatprep.subr.mxu0 %v7022_v0  ;;  %6405 = vmatprep.subr.mxu1 %v7022_v0 }
 0x4e0   : > { %6382 = vmatpush3.msra.mxu0 %v2214_v35  ;;  %6406 = vmatpush3.msra.mxu1 %v2372_v36 }
 0x4e1   : > { %6410 = vmatprep.subr.mxu0 %v7022_v0  ;;  %6434 = vmatprep.subr.mxu1 %v7022_v0 }
 0x58c   : > { %v1975_v37 = vpop.f32.mrf.mxu0  ;;  %v2133_v38 = vpop.f32.mrf.mxu1 }
 0x58d   : > { %v1979_v39 = vadd.f32 %v1975_v37, %v7398_v14 }
 0x58e   : > { %v6337_v40 = vpop.f32.mrf.mxu0  ;;  %v6361_v41 = vpop.f32.mrf.mxu1 }
 0x58f   : > { %v7439_v42 = vadd.f32 %v2133_v38, %v1979_v39  ;;  %v5692_v40 = vld [vmem:[%s8163_s3 + $0x20] sm:$0x3]  ;;  %v5695_v41 = vld [vmem:[%s8163_s3 + $0x22] sm:$0x3] }
 0x590   : > { %v2209_v43 = vpop.f32.mrf.mxu0  ;;  %v2367_v44 = vpop.f32.mrf.mxu1 }
 0x591   : > { %6384 = vmatmul.mubr.msk.f32.vlgmr.msra.gmra.mxu0 %vm727_vm2, %v2209_v43  ;;  %6408 = vmatmul.mubr.msk.f32.vlgmr.msra.gmra.mxu1 %vm727_vm2, %v2367_v44  ;;  %v3169_v43 = vld [vmem:[#allocation2 + $0x438] sm:$0xff] }
 0x592   : > { %6411 = vmatpush3.msra.mxu0 %v7203_v8  ;;  %6435 = vmatpush3.msra.mxu1 %v7203_v8  ;;  %v6366_v45 = vpop.f32.mrf.mxu0  ;;  %v6390_v48 = vpop.f32.mrf.mxu1  ;;  %v3327_v44 = vld [vmem:[#allocation2 + $0x478] sm:$0xff] }
 0x593   : > { %6412 = vmatprep.mubr.msk.f32.mxu0 %vm7023_vm0, %v7022_v0  ;;  %6436 = vmatprep.mubr.msk.f32.mxu1 %vm7023_vm0, %v7022_v0  ;;  %v3168_v45 = vld [vmem:[#allocation2 + $0x430] sm:$0xff]  ;;  %v3325_v48 = vld [vmem:[#allocation2 + $0x468] sm:$0xff] }
 0x594   : > { %6415 = vmatprep.subr.mxu0 %v7022_v0  ;;  %6439 = vmatprep.subr.mxu1 %v7022_v0 }
 0x595   : > { %6413 = vmatmul.mubr.msk.f32.vlgmr.msra.gmra.mxu0 %vm487_vm1, %v5680_v46  ;;  %6437 = vmatmul.mubr.msk.f32.vlgmr.msra.gmra.mxu1 %vm487_vm1, %v5683_v47  ;;  %v3326_v46 = vld [vmem:[#allocation2 + $0x470] sm:$0xff]  ;;  %v3167_v47 = vld [vmem:[#allocation2 + $0x428] sm:$0xff] }
 0x596   : > { %6416 = vmatpush3.msra.mxu0 %v2537_v49  ;;  %6440 = vmatpush3.msra.mxu1 %v2695_v50  ;;  %v3166_v49 = vld [vmem:[#allocation2 + $0x420] sm:$0xff] }
 0x597   : > { %6417 = vmatprep.subr.mxu0 %v7022_v0  ;;  %6441 = vmatprep.subr.mxu1 %v7022_v0  ;;  %v3324_v50 = vld [vmem:[#allocation2 + $0x460] sm:$0xff] }
 0x598   : > { %6418 = vmatpush3.msra.mxu0 %v2536_v51  ;;  %6442 = vmatpush3.msra.mxu1 %v2694_v52  ;;  %v3165_v51 = vld [vmem:[#allocation2 + $0x418] sm:$0xff] }
 0x599   : > { %6419 = vmatprep.subr.mxu0 %v7022_v0  ;;  %6443 = vmatprep.subr.mxu1 %v7022_v0  ;;  %v3323_v52 = vld [vmem:[#allocation2 + $0x458] sm:$0xff] }
 0x59a   : > { %6420 = vmatpush3.msra.mxu0 %v2535_v53  ;;  %6444 = vmatpush3.msra.mxu1 %v2693_v54  ;;  %v3164_v53 = vld [vmem:[#allocation2 + $0x410] sm:$0xff] }
 0x59b   : > { %6421 = vmatprep.subr.mxu0 %v7022_v0  ;;  %6445 = vmatprep.subr.mxu1 %v7022_v0  ;;  %v3322_v54 = vld [vmem:[#allocation2 + $0x450] sm:$0xff] }
 0x59c   : > { %6422 = vmatpush3.msra.mxu0 %v2534_v55  ;;  %6446 = vmatpush3.msra.mxu1 %v2692_v56  ;;  %v3163_v55 = vld [vmem:[#allocation2 + $0x408] sm:$0xff] }
 0x59d   : > { %6423 = vmatprep.subr.mxu0 %v7022_v0  ;;  %6447 = vmatprep.subr.mxu1 %v7022_v0  ;;  %v3321_v56 = vld [vmem:[#allocation2 + $0x448] sm:$0xff] }
 0x59e   : > { %6424 = vmatpush3.msra.mxu0 %v2533_v57  ;;  %6448 = vmatpush3.msra.mxu1 %v2691_v58  ;;  %v3162_v57 = vld [vmem:[#allocation2 + $0x400] sm:$0xff] }
 0x59f   : > { %6425 = vmatprep.subr.mxu0 %v7022_v0  ;;  %6449 = vmatprep.subr.mxu1 %v7022_v0  ;;  %v3320_v58 = vld [vmem:[#allocation2 + $0x440] sm:$0xff] }
 0x5a0   : > { %6426 = vmatpush3.msra.mxu0 %v2532_v59  ;;  %6450 = vmatpush3.msra.mxu1 %v2690_v60 }
 0x5a1   : > { %6427 = vmatprep.subr.mxu0 %v7022_v0  ;;  %6451 = vmatprep.subr.mxu1 %v7022_v0 }
 0x5a2   : > { %6431 = vmatprep.mubr.msk.f32.mxu0 %vm7023_vm0, %v7022_v0  ;;  %6455 = vmatprep.mubr.msk.f32.mxu1 %vm7023_vm0, %v7022_v0 }
 0x5a3   : > { %6428 = vmatpush3.msra.mxu0 %v2531_v61  ;;  %6452 = vmatpush3.msra.mxu1 %v2689_v62 }
 0x5a4   : > { %6429 = vmatprep.subr.mxu0 %v7022_v0  ;;  %6453 = vmatprep.subr.mxu1 %v7022_v0 }
 0x5a5   : > { %6430 = vmatpush3.msra.mxu0 %v2530_v63  ;;  %6454 = vmatpush3.msra.mxu1 %v2688_v1 }
 0x5a6   : > { %6458 = vmatprep.subr.mxu0 %v7022_v0  ;;  %6482 = vmatprep.subr.mxu1 %v7022_v0 }
 0x651   : > { %v2291_v2 = vpop.f32.mrf.mxu0  ;;  %v2449_v3 = vpop.f32.mrf.mxu1 }
 0x652   : > { %v2295_v4 = vadd.f32 %v2291_v2, %v7439_v42 }
 0x653   : > { %v6385_v5 = vpop.f32.mrf.mxu0  ;;  %v6409_v6 = vpop.f32.mrf.mxu1 }
 0x654   : > { %v7480_v7 = vadd.f32 %v2449_v3, %v2295_v4  ;;  %v5698_v5 = vld [vmem:[%s8163_s3 + $0x24] sm:$0x3]  ;;  %v5701_v6 = vld [vmem:[%s8163_s3 + $0x26] sm:$0x3] }
 0x655   : > { %v2525_v9 = vpop.f32.mrf.mxu0  ;;  %v2683_v10 = vpop.f32.mrf.mxu1 }
 0x656   : > { %6432 = vmatmul.mubr.msk.f32.vlgmr.msra.gmra.mxu0 %vm727_vm2, %v2525_v9  ;;  %6456 = vmatmul.mubr.msk.f32.vlgmr.msra.gmra.mxu1 %vm727_vm2, %v2683_v10  ;;  %v3485_v9 = vld [vmem:[#allocation2 + $0x4b8] sm:$0xff] }
 0x657   : > { %6459 = vmatpush3.msra.mxu0 %v7203_v8  ;;  %6483 = vmatpush3.msra.mxu1 %v7203_v8  ;;  %v6414_v11 = vpop.f32.mrf.mxu0  ;;  %v6438_v14 = vpop.f32.mrf.mxu1  ;;  %v3643_v10 = vld [vmem:[#allocation2 + $0x4f8] sm:$0xff] }
 0x658   : > { %6460 = vmatprep.mubr.msk.f32.mxu0 %vm7023_vm0, %v7022_v0  ;;  %6484 = vmatprep.mubr.msk.f32.mxu1 %vm7023_vm0, %v7022_v0  ;;  %v3484_v11 = vld [vmem:[#allocation2 + $0x4b0] sm:$0xff]  ;;  %v3641_v14 = vld [vmem:[#allocation2 + $0x4e8] sm:$0xff] }
 0x659   : > { %6463 = vmatprep.subr.mxu0 %v7022_v0  ;;  %6487 = vmatprep.subr.mxu1 %v7022_v0 }
 0x65a   : > { %6461 = vmatmul.mubr.msk.f32.vlgmr.msra.gmra.mxu0 %vm487_vm1, %v5686_v12  ;;  %6485 = vmatmul.mubr.msk.f32.vlgmr.msra.gmra.mxu1 %vm487_vm1, %v5689_v13  ;;  %v3642_v12 = vld [vmem:[#allocation2 + $0x4f0] sm:$0xff]  ;;  %v3483_v13 = vld [vmem:[#allocation2 + $0x4a8] sm:$0xff] }
 0x65b   : > { %6464 = vmatpush3.msra.mxu0 %v2853_v15  ;;  %6488 = vmatpush3.msra.mxu1 %v3011_v16  ;;  %v3482_v15 = vld [vmem:[#allocation2 + $0x4a0] sm:$0xff] }
 0x65c   : > { %6465 = vmatprep.subr.mxu0 %v7022_v0  ;;  %6489 = vmatprep.subr.mxu1 %v7022_v0  ;;  %v3640_v16 = vld [vmem:[#allocation2 + $0x4e0] sm:$0xff] }
 0x65d   : > { %6466 = vmatpush3.msra.mxu0 %v2852_v17  ;;  %6490 = vmatpush3.msra.mxu1 %v3010_v18  ;;  %v3481_v17 = vld [vmem:[#allocation2 + $0x498] sm:$0xff] }
 0x65e   : > { %6467 = vmatprep.subr.mxu0 %v7022_v0  ;;  %6491 = vmatprep.subr.mxu1 %v7022_v0  ;;  %v3639_v18 = vld [vmem:[#allocation2 + $0x4d8] sm:$0xff] }
 0x65f   : > { %6468 = vmatpush3.msra.mxu0 %v2851_v19  ;;  %6492 = vmatpush3.msra.mxu1 %v3009_v20  ;;  %v3480_v19 = vld [vmem:[#allocation2 + $0x490] sm:$0xff] }
 0x660   : > { %6469 = vmatprep.subr.mxu0 %v7022_v0  ;;  %6493 = vmatprep.subr.mxu1 %v7022_v0  ;;  %v3638_v20 = vld [vmem:[#allocation2 + $0x4d0] sm:$0xff] }
 0x661   : > { %6470 = vmatpush3.msra.mxu0 %v2850_v21  ;;  %6494 = vmatpush3.msra.mxu1 %v3008_v22  ;;  %v3479_v21 = vld [vmem:[#allocation2 + $0x488] sm:$0xff] }
 0x662   : > { %6471 = vmatprep.subr.mxu0 %v7022_v0  ;;  %6495 = vmatprep.subr.mxu1 %v7022_v0  ;;  %v3637_v22 = vld [vmem:[#allocation2 + $0x4c8] sm:$0xff] }
 0x663   : > { %6472 = vmatpush3.msra.mxu0 %v2849_v23  ;;  %6496 = vmatpush3.msra.mxu1 %v3007_v24  ;;  %v3478_v23 = vld [vmem:[#allocation2 + $0x480] sm:$0xff] }
 0x664   : > { %6473 = vmatprep.subr.mxu0 %v7022_v0  ;;  %6497 = vmatprep.subr.mxu1 %v7022_v0  ;;  %v3636_v24 = vld [vmem:[#allocation2 + $0x4c0] sm:$0xff] }
 0x665   : > { %6474 = vmatpush3.msra.mxu0 %v2848_v25  ;;  %6498 = vmatpush3.msra.mxu1 %v3006_v26 }
 0x666   : > { %6475 = vmatprep.subr.mxu0 %v7022_v0  ;;  %6499 = vmatprep.subr.mxu1 %v7022_v0 }
 0x667   : > { %6479 = vmatprep.mubr.msk.f32.mxu0 %vm7023_vm0, %v7022_v0  ;;  %6503 = vmatprep.mubr.msk.f32.mxu1 %vm7023_vm0, %v7022_v0 }
 0x668   : > { %6476 = vmatpush3.msra.mxu0 %v2847_v27  ;;  %6500 = vmatpush3.msra.mxu1 %v3005_v28 }
 0x669   : > { %6477 = vmatprep.subr.mxu0 %v7022_v0  ;;  %6501 = vmatprep.subr.mxu1 %v7022_v0 }
 0x66a   : > { %6478 = vmatpush3.msra.mxu0 %v2846_v29  ;;  %6502 = vmatpush3.msra.mxu1 %v3004_v30 }
 0x66b   : > { %6506 = vmatprep.subr.mxu0 %v7022_v0  ;;  %6530 = vmatprep.subr.mxu1 %v7022_v0 }
 0x716   : > { %v2607_v31 = vpop.f32.mrf.mxu0  ;;  %v2765_v32 = vpop.f32.mrf.mxu1 }
 0x717   : > { %v2611_v33 = vadd.f32 %v2607_v31, %v7480_v7 }
 0x718   : > { %v6433_v34 = vpop.f32.mrf.mxu0  ;;  %v6457_v35 = vpop.f32.mrf.mxu1 }
 0x719   : > { %v7521_v36 = vadd.f32 %v2765_v32, %v2611_v33  ;;  %v5704_v34 = vld [vmem:[%s8163_s3 + $0x28] sm:$0x3]  ;;  %v5707_v35 = vld [vmem:[%s8163_s3 + $0x2a] sm:$0x3] }
 0x71a   : > { %v2841_v37 = vpop.f32.mrf.mxu0  ;;  %v2999_v38 = vpop.f32.mrf.mxu1 }
 0x71b   : > { %6480 = vmatmul.mubr.msk.f32.vlgmr.msra.gmra.mxu0 %vm727_vm2, %v2841_v37  ;;  %6504 = vmatmul.mubr.msk.f32.vlgmr.msra.gmra.mxu1 %vm727_vm2, %v2999_v38  ;;  %v3801_v37 = vld [vmem:[#allocation2 + $0x538] sm:$0xff] }
 0x71c   : > { %6507 = vmatpush3.msra.mxu0 %v7203_v8  ;;  %6531 = vmatpush3.msra.mxu1 %v7203_v8  ;;  %v6462_v39 = vpop.f32.mrf.mxu0  ;;  %v6486_v42 = vpop.f32.mrf.mxu1  ;;  %v3959_v38 = vld [vmem:[#allocation2 + $0x578] sm:$0xff] }
 0x71d   : > { %6508 = vmatprep.mubr.msk.f32.mxu0 %vm7023_vm0, %v7022_v0  ;;  %6532 = vmatprep.mubr.msk.f32.mxu1 %vm7023_vm0, %v7022_v0  ;;  %v3800_v39 = vld [vmem:[#allocation2 + $0x530] sm:$0xff]  ;;  %v3957_v42 = vld [vmem:[#allocation2 + $0x568] sm:$0xff] }
 0x71e   : > { %6511 = vmatprep.subr.mxu0 %v7022_v0  ;;  %6535 = vmatprep.subr.mxu1 %v7022_v0 }
 0x71f   : > { %6509 = vmatmul.mubr.msk.f32.vlgmr.msra.gmra.mxu0 %vm487_vm1, %v5692_v40  ;;  %6533 = vmatmul.mubr.msk.f32.vlgmr.msra.gmra.mxu1 %vm487_vm1, %v5695_v41  ;;  %v3958_v40 = vld [vmem:[#allocation2 + $0x570] sm:$0xff]  ;;  %v3799_v41 = vld [vmem:[#allocation2 + $0x528] sm:$0xff] }
 0x720   : > { %6512 = vmatpush3.msra.mxu0 %v3169_v43  ;;  %6536 = vmatpush3.msra.mxu1 %v3327_v44  ;;  %v3798_v43 = vld [vmem:[#allocation2 + $0x520] sm:$0xff] }
 0x721   : > { %6513 = vmatprep.subr.mxu0 %v7022_v0  ;;  %6537 = vmatprep.subr.mxu1 %v7022_v0  ;;  %v3956_v44 = vld [vmem:[#allocation2 + $0x560] sm:$0xff] }
 0x722   : > { %6514 = vmatpush3.msra.mxu0 %v3168_v45  ;;  %6538 = vmatpush3.msra.mxu1 %v3326_v46  ;;  %v3797_v45 = vld [vmem:[#allocation2 + $0x518] sm:$0xff] }
 0x723   : > { %6515 = vmatprep.subr.mxu0 %v7022_v0  ;;  %6539 = vmatprep.subr.mxu1 %v7022_v0  ;;  %v3955_v46 = vld [vmem:[#allocation2 + $0x558] sm:$0xff] }
 0x724   : > { %6516 = vmatpush3.msra.mxu0 %v3167_v47  ;;  %6540 = vmatpush3.msra.mxu1 %v3325_v48  ;;  %v3796_v47 = vld [vmem:[#allocation2 + $0x510] sm:$0xff] }
 0x725   : > { %6517 = vmatprep.subr.mxu0 %v7022_v0  ;;  %6541 = vmatprep.subr.mxu1 %v7022_v0  ;;  %v3954_v48 = vld [vmem:[#allocation2 + $0x550] sm:$0xff] }
 0x726   : > { %6518 = vmatpush3.msra.mxu0 %v3166_v49  ;;  %6542 = vmatpush3.msra.mxu1 %v3324_v50  ;;  %v3795_v49 = vld [vmem:[#allocation2 + $0x508] sm:$0xff] }
 0x727   : > { %6519 = vmatprep.subr.mxu0 %v7022_v0  ;;  %6543 = vmatprep.subr.mxu1 %v7022_v0  ;;  %v3953_v50 = vld [vmem:[#allocation2 + $0x548] sm:$0xff] }
 0x728   : > { %6520 = vmatpush3.msra.mxu0 %v3165_v51  ;;  %6544 = vmatpush3.msra.mxu1 %v3323_v52  ;;  %v3794_v51 = vld [vmem:[#allocation2 + $0x500] sm:$0xff] }
 0x729   : > { %6521 = vmatprep.subr.mxu0 %v7022_v0  ;;  %6545 = vmatprep.subr.mxu1 %v7022_v0  ;;  %v3952_v52 = vld [vmem:[#allocation2 + $0x540] sm:$0xff] }
 0x72a   : > { %6522 = vmatpush3.msra.mxu0 %v3164_v53  ;;  %6546 = vmatpush3.msra.mxu1 %v3322_v54 }
 0x72b   : > { %6523 = vmatprep.subr.mxu0 %v7022_v0  ;;  %6547 = vmatprep.subr.mxu1 %v7022_v0 }
 0x72c   : > { %6527 = vmatprep.mubr.msk.f32.mxu0 %vm7023_vm0, %v7022_v0  ;;  %6551 = vmatprep.mubr.msk.f32.mxu1 %vm7023_vm0, %v7022_v0 }
 0x72d   : > { %6524 = vmatpush3.msra.mxu0 %v3163_v55  ;;  %6548 = vmatpush3.msra.mxu1 %v3321_v56 }
 0x72e   : > { %6525 = vmatprep.subr.mxu0 %v7022_v0  ;;  %6549 = vmatprep.subr.mxu1 %v7022_v0 }
 0x72f   : > { %6526 = vmatpush3.msra.mxu0 %v3162_v57  ;;  %6550 = vmatpush3.msra.mxu1 %v3320_v58 }
 0x730   : > { %6554 = vmatprep.subr.mxu0 %v7022_v0  ;;  %6578 = vmatprep.subr.mxu1 %v7022_v0 }
 0x7db   : > { %v2923_v59 = vpop.f32.mrf.mxu0  ;;  %v3081_v60 = vpop.f32.mrf.mxu1 }
 0x7dc   : > { %v2927_v61 = vadd.f32 %v2923_v59, %v7521_v36 }
 0x7dd   : > { %v6481_v62 = vpop.f32.mrf.mxu0  ;;  %v6505_v63 = vpop.f32.mrf.mxu1 }
 0x7de   : > { %v7562_v1 = vadd.f32 %v3081_v60, %v2927_v61  ;;  %v5710_v62 = vld [vmem:[%s8163_s3 + $0x2c] sm:$0x3]  ;;  %v5713_v63 = vld [vmem:[%s8163_s3 + $0x2e] sm:$0x3] }
 0x7df   : > { %v3157_v2 = vpop.f32.mrf.mxu0  ;;  %v3315_v3 = vpop.f32.mrf.mxu1 }
 0x7e0   : > { %6528 = vmatmul.mubr.msk.f32.vlgmr.msra.gmra.mxu0 %vm727_vm2, %v3157_v2  ;;  %6552 = vmatmul.mubr.msk.f32.vlgmr.msra.gmra.mxu1 %vm727_vm2, %v3315_v3  ;;  %v4117_v2 = vld [vmem:[#allocation2 + $0x5b8] sm:$0xff] }
 0x7e1   : > { %6555 = vmatpush3.msra.mxu0 %v7203_v8  ;;  %6579 = vmatpush3.msra.mxu1 %v7203_v8  ;;  %v6510_v4 = vpop.f32.mrf.mxu0  ;;  %v6534_v7 = vpop.f32.mrf.mxu1  ;;  %v4275_v3 = vld [vmem:[#allocation2 + $0x5f8] sm:$0xff] }
 0x7e2   : > { %6556 = vmatprep.mubr.msk.f32.mxu0 %vm7023_vm0, %v7022_v0  ;;  %6580 = vmatprep.mubr.msk.f32.mxu1 %vm7023_vm0, %v7022_v0  ;;  %v4116_v4 = vld [vmem:[#allocation2 + $0x5b0] sm:$0xff]  ;;  %v4273_v7 = vld [vmem:[#allocation2 + $0x5e8] sm:$0xff] }
 0x7e3   : > { %6559 = vmatprep.subr.mxu0 %v7022_v0  ;;  %6583 = vmatprep.subr.mxu1 %v7022_v0 }
 0x7e4   : > { %6557 = vmatmul.mubr.msk.f32.vlgmr.msra.gmra.mxu0 %vm487_vm1, %v5698_v5  ;;  %6581 = vmatmul.mubr.msk.f32.vlgmr.msra.gmra.mxu1 %vm487_vm1, %v5701_v6  ;;  %v4274_v5 = vld [vmem:[#allocation2 + $0x5f0] sm:$0xff]  ;;  %v4115_v6 = vld [vmem:[#allocation2 + $0x5a8] sm:$0xff] }
 0x7e5   : > { %6560 = vmatpush3.msra.mxu0 %v3485_v9  ;;  %6584 = vmatpush3.msra.mxu1 %v3643_v10  ;;  %v4114_v9 = vld [vmem:[#allocation2 + $0x5a0] sm:$0xff] }
 0x7e6   : > { %6561 = vmatprep.subr.mxu0 %v7022_v0  ;;  %6585 = vmatprep.subr.mxu1 %v7022_v0  ;;  %v4272_v10 = vld [vmem:[#allocation2 + $0x5e0] sm:$0xff] }
 0x7e7   : > { %6562 = vmatpush3.msra.mxu0 %v3484_v11  ;;  %6586 = vmatpush3.msra.mxu1 %v3642_v12  ;;  %v4113_v11 = vld [vmem:[#allocation2 + $0x598] sm:$0xff]  ;;  %v4112_v12 = vld [vmem:[#allocation2 + $0x590] sm:$0xff] }
 0x7e8   : > { %6563 = vmatprep.subr.mxu0 %v7022_v0  ;;  %6587 = vmatprep.subr.mxu1 %v7022_v0 }
 0x7e9   : > { %6564 = vmatpush3.msra.mxu0 %v3483_v13  ;;  %6588 = vmatpush3.msra.mxu1 %v3641_v14  ;;  %v4271_v13 = vld [vmem:[#allocation2 + $0x5d8] sm:$0xff]  ;;  %v4111_v14 = vld [vmem:[#allocation2 + $0x588] sm:$0xff] }
 0x7ea   : > { %6565 = vmatprep.subr.mxu0 %v7022_v0  ;;  %6589 = vmatprep.subr.mxu1 %v7022_v0 }
 0x7eb   : > { %6566 = vmatpush3.msra.mxu0 %v3482_v15  ;;  %6590 = vmatpush3.msra.mxu1 %v3640_v16  ;;  %v4270_v15 = vld [vmem:[#allocation2 + $0x5d0] sm:$0xff]  ;;  %v4110_v16 = vld [vmem:[#allocation2 + $0x580] sm:$0xff] }
 0x7ec   : > { %6567 = vmatprep.subr.mxu0 %v7022_v0  ;;  %6591 = vmatprep.subr.mxu1 %v7022_v0 }
 0x7ed   : > { %6568 = vmatpush3.msra.mxu0 %v3481_v17  ;;  %6592 = vmatpush3.msra.mxu1 %v3639_v18  ;;  %v4269_v17 = vld [vmem:[#allocation2 + $0x5c8] sm:$0xff]  ;;  %v4268_v18 = vld [vmem:[#allocation2 + $0x5c0] sm:$0xff] }
 0x7ee   : > { %6569 = vmatprep.subr.mxu0 %v7022_v0  ;;  %6593 = vmatprep.subr.mxu1 %v7022_v0 }
 0x7ef   : > { %6570 = vmatpush3.msra.mxu0 %v3480_v19  ;;  %6594 = vmatpush3.msra.mxu1 %v3638_v20 }
 0x7f0   : > { %6571 = vmatprep.subr.mxu0 %v7022_v0  ;;  %6595 = vmatprep.subr.mxu1 %v7022_v0 }
 0x7f1   : > { %6575 = vmatprep.mubr.msk.f32.mxu0 %vm7023_vm0, %v7022_v0  ;;  %6599 = vmatprep.mubr.msk.f32.mxu1 %vm7023_vm0, %v7022_v0 }
 0x7f2   : > { %6572 = vmatpush3.msra.mxu0 %v3479_v21  ;;  %6596 = vmatpush3.msra.mxu1 %v3637_v22 }
 0x7f3   : > { %6573 = vmatprep.subr.mxu0 %v7022_v0  ;;  %6597 = vmatprep.subr.mxu1 %v7022_v0 }
 0x7f4   : > { %6574 = vmatpush3.msra.mxu0 %v3478_v23  ;;  %6598 = vmatpush3.msra.mxu1 %v3636_v24 }
 0x7f5   : > { %6602 = vmatprep.subr.mxu0 %v7022_v0  ;;  %6626 = vmatprep.subr.mxu1 %v7022_v0 }
 0x8a0   : > { %v3239_v25 = vpop.f32.mrf.mxu0  ;;  %v3397_v26 = vpop.f32.mrf.mxu1 }
 0x8a1   : > { %v3243_v27 = vadd.f32 %v3239_v25, %v7562_v1 }
 0x8a2   : > { %v6529_v28 = vpop.f32.mrf.mxu0  ;;  %v6553_v29 = vpop.f32.mrf.mxu1 }
 0x8a3   : > { %v7603_v30 = vadd.f32 %v3397_v26, %v3243_v27  ;;  %v5716_v28 = vld [vmem:[%s8163_s3 + $0x30] sm:$0x3] }
 0x8a4   : > { %v3473_v31 = vpop.f32.mrf.mxu0  ;;  %v3631_v32 = vpop.f32.mrf.mxu1 }
 0x8a5   : > { %6576 = vmatmul.mubr.msk.f32.vlgmr.msra.gmra.mxu0 %vm727_vm2, %v3473_v31  ;;  %6600 = vmatmul.mubr.msk.f32.vlgmr.msra.gmra.mxu1 %vm727_vm2, %v3631_v32  ;;  %v4432_v31 = vld [vmem:[#allocation2 + $0x630] sm:$0xff]  ;;  %v4431_v32 = vld [vmem:[#allocation2 + $0x628] sm:$0xff] }
 0x8a6   : > { %6603 = vmatpush3.msra.mxu0 %v7203_v8  ;;  %6627 = vmatpush3.msra.mxu1 %v7203_v8  ;;  %v6558_v33 = vpop.f32.mrf.mxu0  ;;  %v6582_v36 = vpop.f32.mrf.mxu1 }
 0x8a7   : > { %6604 = vmatprep.mubr.msk.f32.mxu0 %vm7023_vm0, %v7022_v0  ;;  %6628 = vmatprep.mubr.msk.f32.mxu1 %vm7023_vm0, %v7022_v0  ;;  %v4430_v33 = vld [vmem:[#allocation2 + $0x620] sm:$0xff]  ;;  %v4427_v36 = vld [vmem:[#allocation2 + $0x608] sm:$0xff] }
 0x8a8   : > { %6607 = vmatprep.subr.mxu0 %v7022_v0  ;;  %6631 = vmatprep.subr.mxu1 %v7022_v0 }
 0x8a9   : > { %6605 = vmatmul.mubr.msk.f32.vlgmr.msra.gmra.mxu0 %vm487_vm1, %v5704_v34  ;;  %6629 = vmatmul.mubr.msk.f32.vlgmr.msra.gmra.mxu1 %vm487_vm1, %v5707_v35  ;;  %v4429_v34 = vld [vmem:[#allocation2 + $0x618] sm:$0xff]  ;;  %v4428_v35 = vld [vmem:[#allocation2 + $0x610] sm:$0xff] }
 0x8aa   : > { %6608 = vmatpush3.msra.mxu0 %v3801_v37  ;;  %6632 = vmatpush3.msra.mxu1 %v3959_v38  ;;  %v4426_v37 = vld [vmem:[#allocation2 + $0x600] sm:$0xff] }
 0x8ab   : > { %6609 = vmatprep.subr.mxu0 %v7022_v0  ;;  %6633 = vmatprep.subr.mxu1 %v7022_v0 }
 0x8ac   : > { %6610 = vmatpush3.msra.mxu0 %v3800_v39  ;;  %6634 = vmatpush3.msra.mxu1 %v3958_v40 }
 0x8ad   : > { %6611 = vmatprep.subr.mxu0 %v7022_v0  ;;  %6635 = vmatprep.subr.mxu1 %v7022_v0 }
 0x8ae   : > { %6612 = vmatpush3.msra.mxu0 %v3799_v41  ;;  %6636 = vmatpush3.msra.mxu1 %v3957_v42 }
 0x8af   : > { %6613 = vmatprep.subr.mxu0 %v7022_v0  ;;  %6637 = vmatprep.subr.mxu1 %v7022_v0 }
 0x8b0   : > { %6614 = vmatpush3.msra.mxu0 %v3798_v43  ;;  %6638 = vmatpush3.msra.mxu1 %v3956_v44 }
 0x8b1   : > { %6615 = vmatprep.subr.mxu0 %v7022_v0  ;;  %6639 = vmatprep.subr.mxu1 %v7022_v0 }
 0x8b2   : > { %6616 = vmatpush3.msra.mxu0 %v3797_v45  ;;  %6640 = vmatpush3.msra.mxu1 %v3955_v46 }
 0x8b3   : > { %6617 = vmatprep.subr.mxu0 %v7022_v0  ;;  %6641 = vmatprep.subr.mxu1 %v7022_v0 }
 0x8b4   : > { %6618 = vmatpush3.msra.mxu0 %v3796_v47  ;;  %6642 = vmatpush3.msra.mxu1 %v3954_v48  ;;  %v4512_v48 = vpop.permute.xlu0 %4511 }
 0x8b5   : > { %6619 = vmatprep.subr.mxu0 %v7022_v0  ;;  %6643 = vmatprep.subr.mxu1 %v7022_v0 }
 0x8b6   : > { %6623 = vmatprep.mubr.msk.f32.mxu0 %vm7023_vm0, %v7022_v0  ;;  %6647 = vmatprep.mubr.msk.f32.mxu1 %vm7023_vm0, %v7022_v0 }
 0x8b7   : > { %6620 = vmatpush3.msra.mxu0 %v3795_v49  ;;  %6644 = vmatpush3.msra.mxu1 %v3953_v50 }
 0x8b8   : > { %6621 = vmatprep.subr.mxu0 %v7022_v0  ;;  %6645 = vmatprep.subr.mxu1 %v7022_v0 }
 0x8b9   : > { %6622 = vmatpush3.msra.mxu0 %v3794_v51  ;;  %6646 = vmatpush3.msra.mxu1 %v3952_v52  ;;  %v4517_v52 = vld [vmem:[%s8166_s6] sm:$0x1] }
 0x8ba   : > { %6650 = vmatprep.subr.mxu0 %v7022_v0  ;;  %6674 = vmatprep.subr.mxu1 %v7022_v0 }
 0x965   : > { %v3555_v53 = vpop.f32.mrf.mxu0  ;;  %v3713_v54 = vpop.f32.mrf.mxu1 }
 0x966   : > { %v3559_v55 = vadd.f32 %v3555_v53, %v7603_v30  ;;  %v4433_v30 = vld [vmem:[#allocation2 + $0x638] sm:$0xff] }
 0x967   : > { %v6577_v56 = vpop.f32.mrf.mxu0  ;;  %v6601_v57 = vpop.f32.mrf.mxu1 }
 0x968   : > { %v7644_v58 = vadd.f32 %v3713_v54, %v3559_v55  ;;  %v4519_v54 = vld [vmem:[%s8166_s6 + $0x1] sm:$0x1] }
 0x969   : > { %v3789_v59 = vpop.f32.mrf.mxu0  ;;  %v3947_v60 = vpop.f32.mrf.mxu1 }
 0x96a   : > { %6624 = vmatmul.mubr.msk.f32.vlgmr.msra.gmra.mxu0 %vm727_vm2, %v3789_v59  ;;  %6648 = vmatmul.mubr.msk.f32.vlgmr.msra.gmra.mxu1 %vm727_vm2, %v3947_v60 }
 0x96b   : > { %6651 = vmatpush3.msra.mxu0 %v7203_v8  ;;  %6675 = vmatpush3.msra.mxu1 %v7203_v8  ;;  %v6606_v61 = vpop.f32.mrf.mxu0  ;;  %v6630_v1 = vpop.f32.mrf.mxu1 }
 0x96c   : > { %6652 = vmatprep.mubr.msk.f32.mxu0 %vm7023_vm0, %v7022_v0  ;;  %6676 = vmatprep.mubr.msk.f32.mxu1 %vm7023_vm0, %v7022_v0 }
 0x96d   : > { %6655 = vmatprep.subr.mxu0 %v7022_v0  ;;  %6679 = vmatprep.subr.mxu1 %v7022_v0 }
 0x96e   : > { %6653 = vmatmul.mubr.msk.f32.vlgmr.msra.gmra.mxu0 %vm487_vm1, %v5710_v62  ;;  %6677 = vmatmul.mubr.msk.f32.vlgmr.msra.gmra.mxu1 %vm487_vm1, %v5713_v63 }
 0x96f   : > { %6656 = vmatpush3.msra.mxu0 %v4117_v2  ;;  %6680 = vmatpush3.msra.mxu1 %v4275_v3 }
 0x970   : > { %6657 = vmatprep.subr.mxu0 %v7022_v0  ;;  %6681 = vmatprep.subr.mxu1 %v7022_v0 }
 0x971   : > { %6658 = vmatpush3.msra.mxu0 %v4116_v4  ;;  %6682 = vmatpush3.msra.mxu1 %v4274_v5 }
 0x972   : > { %6659 = vmatprep.subr.mxu0 %v7022_v0  ;;  %6683 = vmatprep.subr.mxu1 %v7022_v0 }
 0x973   : > { %6660 = vmatpush3.msra.mxu0 %v4115_v6  ;;  %6684 = vmatpush3.msra.mxu1 %v4273_v7 }
 0x974   : > { %6661 = vmatprep.subr.mxu0 %v7022_v0  ;;  %6685 = vmatprep.subr.mxu1 %v7022_v0 }
 0x975   : > { %6662 = vmatpush3.msra.mxu0 %v4114_v9  ;;  %6686 = vmatpush3.msra.mxu1 %v4272_v10  ;;  %v4547_v9 = vlaneseq }
 0x976   : > { %6663 = vmatprep.subr.mxu0 %v7022_v0  ;;  %6687 = vmatprep.subr.mxu1 %v7022_v0 }
 0x977   : > { %6664 = vmatpush3.msra.mxu0 %v4113_v11  ;;  %6671 = vmatprep.mubr.msk.f32.mxu0 %vm7023_vm0, %v7022_v0 }
 0x978   : > { %6665 = vmatprep.subr.mxu0 %v7022_v0  ;;  %6695 = vmatprep.mubr.msk.f32.mxu1 %vm7023_vm0, %v7022_v0 }
 0x979   : > { %6666 = vmatpush3.msra.mxu0 %v4112_v12  ;;  %6688 = vmatpush3.msra.mxu1 %v4271_v13 }
 0x97a   : > { %6667 = vmatprep.subr.mxu0 %v7022_v0  ;;  %6689 = vmatprep.subr.mxu1 %v7022_v0 }
 0x97b   : > { %6668 = vmatpush3.msra.mxu0 %v4111_v14  ;;  %6690 = vmatpush3.msra.mxu1 %v4270_v15  ;;  %v7716_v14 = vshrl.u32 %v4547_v9, 7 }
 0x97c   : > { %6669 = vmatprep.subr.mxu0 %v7022_v0  ;;  %6691 = vmatprep.subr.mxu1 %v7022_v0 }
 0x97d   : > { %6670 = vmatpush3.msra.mxu0 %v4110_v16  ;;  %6692 = vmatpush3.msra.mxu1 %v4269_v17 }
 0x97e   : > { %6698 = vmatprep.subr.mxu0 %v7022_v0  ;;  %6693 = vmatprep.subr.mxu1 %v7022_v0 }
 0x97f   : > { %6694 = vmatpush3.msra.mxu1 %v4268_v18 }
 0x980   : > { %6722 = vmatprep.subr.bf16.mxu1 %v7022_v0 }
 0xa2a   : > { %v3871_v19 = vpop.f32.mrf.mxu0  ;;  %v4029_v20 = vpop.f32.mrf.mxu1 }
 0xa2b   : > { %v3875_v21 = vadd.f32 %v3871_v19, %v7644_v58 }
 0xa2c   : > { %v6625_v22 = vpop.f32.mrf.mxu0  ;;  %v6649_v23 = vpop.f32.mrf.mxu1 }
 0xa2d   : > { %v4033_v24 = vadd.f32 %v4029_v20, %v3875_v21 }
 0xa2e   : > { %v4105_v25 = vpop.f32.mrf.mxu0  ;;  %v4263_v26 = vpop.f32.mrf.mxu1 }
 0xa2f   : > { %6672 = vmatmul.mubr.msk.f32.vlgmr.msra.gmra.mxu0 %vm727_vm2, %v4105_v25  ;;  %6696 = vmatmul.mubr.msk.f32.vlgmr.msra.gmra.mxu1 %vm727_vm2, %v4263_v26 }
 0xa30   : > { %6699 = vmatpush3.msra.mxu0 %v7203_v8  ;;  %v6654_v27 = vpop.f32.mrf.mxu0  ;;  %6700 = vmatprep.mubr.msk.f32.mxu0 %vm7023_vm0, %v7022_v0  ;;  %v6678_v29 = vpop.f32.mrf.mxu1 }
 0xa31   : > { %6703 = vmatprep.subr.mxu0 %v7022_v0  ;;  %6730 = vmatprep.mubr.msk.bf16.mxu1 %vm7023_vm0, %v7022_v0 }
 0xa33   : > { %6701 = vmatmul.mubr.msk.f32.vlgmr.msra.gmra.mxu0 %vm487_vm1, %v5716_v28 }
 0xa34   : > { %6704 = vmatpush3.msra.mxu0 %v4433_v30  ;;  %6719 = vmatprep.mubr.msk.f32.mxu0 %vm7023_vm0, %v7022_v0 }
 0xa35   : > { %6705 = vmatprep.subr.mxu0 %v7022_v0 }
 0xa36   : > { %6706 = vmatpush3.msra.mxu0 %v4432_v31  ;;  %v4576_v31 = vsub.s32 0, %v7716_v14 }
 0xa37   : > { %6707 = vmatprep.subr.mxu0 %v7022_v0 }
 0xa38   : > { %6708 = vmatpush3.msra.mxu0 %v4431_v32 }
 0xa39   : > { %6709 = vmatprep.subr.mxu0 %v7022_v0 }
 0xa3a   : > { %6710 = vmatpush3.msra.mxu0 %v4430_v33 }
 0xa3b   : > { %6711 = vmatprep.subr.mxu0 %v7022_v0 }
 0xa3c   : > { %6712 = vmatpush3.msra.mxu0 %v4429_v34 }
 0xa3d   : > { %6713 = vmatprep.subr.mxu0 %v7022_v0 }
 0xa3e   : > { %6714 = vmatpush3.msra.mxu0 %v4428_v35 }
 0xa3f   : > { %6715 = vmatprep.subr.mxu0 %v7022_v0 }
 0xa40   : > { %6716 = vmatpush3.msra.mxu0 %v4427_v36  ;;  %v7743_v36 = vadd.s32 48, %v7716_v14 }
 0xa41   : > { %6717 = vmatprep.subr.mxu0 %v7022_v0 }
 0xa42   : > { %6718 = vmatpush3.msra.mxu0 %v4426_v37 }
 0xa43   : > { %6734 = vmatprep.subr.bf16.mxu0 %v7022_v0 }
 0xaef   : > { %v4187_v38 = vpop.f32.mrf.mxu0  ;;  %v4345_v39 = vpop.f32.mrf.mxu1 }
 0xaf0   : > { %v4191_v40 = vadd.f32 %v4187_v38, %v4033_v24 }
 0xaf1   : > { %v6673_v41 = vpop.f32.mrf.mxu0  ;;  %v6697_v42 = vpop.f32.mrf.mxu1 }
 0xaf2   : > { %v4349_v43 = vadd.f32 %v4345_v39, %v4191_v40  ;;  %v4555_v40 = vadd.s32 56, %v7716_v14 }
 0xaf3   : > { %v4421_v44 = vpop.f32.mrf.mxu0 }
 0xaf4   : > { %6720 = vmatmul.mubr.msk.f32.vlgmr.msra.gmra.mxu0 %vm727_vm2, %v4421_v44 }
 0xaf5   : > { %v6702_v45 = vpop.f32.mrf.mxu0  ;;  %6736 = vmatprep.mubr.msk.bf16.mxu0 %vm7023_vm0, %v7022_v0 }
 0xbb4   : > { %v4503_v46 = vpop.f32.mrf.mxu0 }
 0xbb5   : > { %v4507_v47 = vadd.f32 %v4503_v46, %v4349_v43 }
 0xbb6   : > { %v6721_v49 = vpop.f32.mrf.mxu0 }
 0xbb7   : > { %v4514_v50 = vadd.f32 %v4512_v48, %v4507_v47 }
 0xbb9   : > { %6892 = vtanh.f32 %v4514_v50 }
 0xbc6   : > { %v6893_v51 = vpop.eup %6892 }
 0xbc7   : > { %v4516_v53 = vmul.f32 5.0, %v6893_v51 }
 0xbc9   : > { %v4518_v55 = vadd.f32 %v4517_v52, %v4516_v53  ;;  %v4521_v56 = vrot.slane %v4516_v53, 1 }
 0xbcb   : > { %v4523_v57 = vadd.f32 %v4521_v56, %v4519_v54  ;;  %v4524_v58 = vmul.f32 2.0, %v4518_v55  ;;  %v7758_v56 = vadd.s32 32, %v7716_v14 }
 0xbcd   : > { %v4526_v59 = vmul.f32 0.14285715, %v4524_v58  ;;  %v4528_v60 = vmul.f32 2.0, %v4523_v57  ;;  %v7761_v58 = vadd.s32 40, %v7716_v14 }
 0xbcf   : > { %v5719_v61 = vadd.f32 -1.0, %v4526_v59  ;;  %v4529_v62 = vmul.f32 0.14285715, %v4528_v60  ;;  %v7764_v59 = vadd.s32 16, %v7716_v14  ;;  %v7767_v60 = vadd.s32 24, %v7716_v14 }
 0xbd1   : > { %v5720_v63 = vadd.f32 -1.0, %v4529_v62  ;;  %v4531_v1 = vadd.f32 1.0, %v5719_v61 }
 0xbd3   : > { %v4532_v2 = vmul.f32 8.0, %v4531_v1  ;;  %v4535_v3 = vadd.f32 1.0, %v5720_v63  ;;  %v7774_v1 = vadd.s32 8, %v7716_v14 }
 0xbd5   : > { %v5721_v4 = vadd.f32 -1.0, %v4532_v2  ;;  %v4536_v5 = vmul.f32 8.0, %v4535_v3 }
 0xbd7   : > { %v4534_v6 = vmul.f32 0.5, %v5721_v4  ;;  %v5722_v7 = vadd.f32 -1.0, %v4536_v5 }
 0xbd9   : > { %v4538_v10 = vmul.f32 0.5, %v5722_v7  ;;  %v4539_v11 = vfloor.f32 %v4534_v6 }
 0xbdb   : > { %v4540_v12 = vadd.f32 1.0, %v4539_v11  ;;  %v4541_v13 = vfloor.f32 %v4538_v10  ;;  %vm4557_vm3 = vcmp.ge.f32.partialorder %v4539_v11, 0.0  ;;  %vm4558_vm4 = vcmp.le.f32.partialorder %v4539_v11, 7.0 }
 0xbdc   : > { %v4570_v15 = vmax.f32 %v4539_v11, 0.0  ;;  %v4543_v17 = vsub.f32 %v4534_v6, %v4539_v11  ;;  %vm7718_vm5 = vmand %vm4557_vm3, %vm4558_vm4 }
 0xbdd   : > { %v4542_v16 = vadd.f32 1.0, %v4541_v13  ;;  %v4545_v18 = vsub.f32 %v4538_v10, %v4541_v13  ;;  %vm4560_vm6 = vcmp.ge.f32.partialorder %v4541_v13, 0.0  ;;  %vm4562_vm8 = vcmp.le.f32.partialorder %v4541_v13, 7.0 }
 0xbde   : > { %vm4561_vm7 = vmand %vm7718_vm5, %vm4560_vm6  ;;  %v4566_v20 = vmax.f32 %v4541_v13, 0.0  ;;  %v4571_v21 = vmin.f32 %v4570_v15, 7.0  ;;  %vm4616_vm9 = vcmp.ge.f32.partialorder %v4540_v12, 0.0  ;;  %vm4617_vm11 = vcmp.le.f32.partialorder %v4540_v12, 7.0 }
 0xbdf   : > { %v4546_v22 = vsub.f32 1.0, %v4545_v18  ;;  %vm7726_vm10 = vmand %vm4561_vm7, %vm4562_vm8  ;;  %v4623_v24 = vmax.f32 %v4540_v12, 0.0  ;;  %vm4677_vm13 = vcmp.ge.f32.partialorder %v4542_v16, 0.0  ;;  %v4544_v27 = vsub.f32 1.0, %v4543_v17 }
 0xbe0   : > { %v4567_v25 = vmin.f32 %v4566_v20, 7.0  ;;  %vm7730_vm12 = vmand %vm4616_vm9, %vm4617_vm11  ;;  %v6820_v28 = vtrunc.f32 %v4571_v21  ;;  %vm4679_vm15 = vcmp.le.f32.partialorder %v4542_v16, 7.0  ;;  %v4683_v32 = vmax.f32 %v4542_v16, 0.0 }
 0xbe1   : > { %vm4619_vm14 = vmand %vm7730_vm12, %vm4560_vm6  ;;  %v4624_v29 = vmin.f32 %v4623_v24, 7.0  ;;  %v4556_v33 = vmul.f32 %v4546_v22, %v4544_v27  ;;  %v4615_v34 = vmul.f32 %v4546_v22, %v4543_v17  ;;  %v5723_v41 = vsel %vm7726_vm10, 1.0, %v7022_v0 }
 0xbe2   : > { %v6818_v30 = vtrunc.f32 %v4567_v25  ;;  %vm4620_vm0 = vmand %vm4619_vm14, %vm4562_vm8  ;;  %v4684_v39 = vmin.f32 %v4683_v32, 7.0  ;;  %v6821_v42 = vcvt.f32.s32 %v6820_v28  ;;  %v4676_v43 = vmul.f32 %v4545_v18, %v4544_v27 }
 0xbe3   : > { %v6822_v35 = vtrunc.f32 %v4624_v29  ;;  %vm4678_vm3 = vmand %vm7718_vm5, %vm4677_vm13  ;;  %v5732_v38 = vsel %vm4620_vm0, 1.0, %v7022_v0  ;;  %v4737_v48 = vmul.f32 %v4545_v18, %v4543_v17  ;;  %v4602_v49 = vmul.f32 %v5723_v41, %v4556_v33 }
 0xbe4   : > { %v6819_v37 = vcvt.f32.s32 %v6818_v30  ;;  %vm4680_vm4 = vmand %vm4678_vm3, %vm4679_vm15  ;;  %v6824_v47 = vtrunc.f32 %v4684_v39  ;;  %v4655_v50 = vmul.f32 %v5732_v38, %v4615_v34 }
 0xbe5   : > { %v5741_v44 = vsel %vm4680_vm4, 1.0, %v7022_v0  ;;  %vm4738_vm5 = vmand %vm7730_vm12, %vm4677_vm13  ;;  %v6823_v46 = vcvt.f32.s32 %v6822_v35  ;;  %v7776_v2 = vrot.slane %v4602_v49, %v4576_v31 }
 0xbe6   : > { %v4569_v45 = vmul.u32 8, %v6819_v37  ;;  %vm4739_vm6 = vmand %vm4738_vm5, %vm4679_vm15  ;;  %v4716_v51 = vmul.f32 %v5741_v44, %v4676_v43  ;;  %v6825_v55 = vcvt.f32.s32 %v6824_v47  ;;  %v7778_v3 = vrot.slane %v4655_v50, %v4576_v31 }
 0xbe7   : > { %v5750_v52 = vsel %vm4739_vm6, 1.0, %v7022_v0 }
 0xbe8   : > { %v4573_v53 = vadd.s32 %v6821_v42, %v4569_v45  ;;  %v4626_v54 = vadd.s32 %v6823_v46, %v4569_v45  ;;  %v4771_v57 = vmul.f32 %v5750_v52, %v4737_v48  ;;  %v4686_v63 = vmul.u32 8, %v6825_v55 }
 0xbe9   : > { %v7780_v4 = vrot.slane %v4716_v51, %v4576_v31 }
 0xbea   : > { %v7769_v61 = vrot.slane %v4573_v53, %v4576_v31  ;;  %v7771_v62 = vrot.slane %v4626_v54, %v4576_v31  ;;  %v7782_v5 = vrot.slane %v4771_v57, %v4576_v31  ;;  %v4687_v6 = vadd.s32 %v6821_v42, %v4686_v63 }
 0xbeb   : > { %v4742_v7 = vadd.s32 %v6823_v46, %v4686_v63 }
 0xbec   : > { %vm4584_vm7 = vcmp.eq.s32.totalorder %v7743_v36, %v7769_v61  ;;  %vm4585_vm8 = vcmp.eq.s32.totalorder %v4555_v40, %v7769_v61  ;;  %vm4637_vm9 = vcmp.eq.s32.totalorder %v7743_v36, %v7771_v62  ;;  %vm4638_vm10 = vcmp.eq.s32.totalorder %v4555_v40, %v7771_v62 }
 0xbed   : > { %v5730_v9 = vsel %vm4584_vm7, 1.0, %v7022_v0  ;;  %v5731_v10 = vsel %vm4585_vm8, 1.0, %v7022_v0  ;;  %v7792_v11 = vrot.slane %v4687_v6, %v4576_v31  ;;  %v7794_v12 = vrot.slane %v4742_v7, %v4576_v31 }
 0xbee   : > { %v4613_v13 = vmul.f32 %v5730_v9, %v7776_v2  ;;  %v4614_v15 = vmul.f32 %v5731_v10, %v7776_v2  ;;  %v5739_v16 = vsel %vm4637_vm9, 1.0, %v7022_v0  ;;  %v5740_v17 = vsel %vm4638_vm10, 1.0, %v7022_v0 }
 0xbef   : > { %vm4582_vm11 = vcmp.eq.s32.totalorder %v7758_v56, %v7769_v61  ;;  %vm4583_vm12 = vcmp.eq.s32.totalorder %v7761_v58, %v7769_v61  ;;  %v4666_v18 = vmul.f32 %v5739_v16, %v7778_v3  ;;  %v4667_v19 = vmul.f32 %v5740_v17, %v7778_v3 }
 0xbf0   : > { %vm4698_vm13 = vcmp.eq.s32.totalorder %v7743_v36, %v7792_v11  ;;  %vm4699_vm14 = vcmp.eq.s32.totalorder %v4555_v40, %v7792_v11  ;;  %vm4753_vm15 = vcmp.eq.s32.totalorder %v7743_v36, %v7794_v12  ;;  %vm4754_vm0 = vcmp.eq.s32.totalorder %v4555_v40, %v7794_v12 }
 0xbf1   : > { %v5748_v20 = vsel %vm4698_vm13, 1.0, %v7022_v0  ;;  %v5749_v21 = vsel %vm4699_vm14, 1.0, %v7022_v0  ;;  %v4674_v22 = vadd.f32 %v4666_v18, %v4613_v13  ;;  %v4675_v23 = vadd.f32 %v4667_v19, %v4614_v15 }
 0xbf2   : > { %v4727_v24 = vmul.f32 %v5748_v20, %v7780_v4  ;;  %v4728_v25 = vmul.f32 %v5749_v21, %v7780_v4  ;;  %v5757_v26 = vsel %vm4753_vm15, 1.0, %v7022_v0  ;;  %v5758_v27 = vsel %vm4754_vm0, 1.0, %v7022_v0 }
 0xbf3   : > { %v5728_v28 = vsel %vm4582_vm11, 1.0, %v7022_v0  ;;  %v5729_v29 = vsel %vm4583_vm12, 1.0, %v7022_v0  ;;  %v4782_v32 = vmul.f32 %v5757_v26, %v7782_v5  ;;  %v4783_v33 = vmul.f32 %v5758_v27, %v7782_v5 }
 0xbf4   : > { %v4735_v30 = vadd.f32 %v4727_v24, %v4674_v22  ;;  %v4736_v31 = vadd.f32 %v4728_v25, %v4675_v23  ;;  %v4611_v34 = vmul.f32 %v5728_v28, %v7776_v2  ;;  %v4612_v35 = vmul.f32 %v5729_v29, %v7776_v2 }
 0xbf5   : > { %vm4635_vm3 = vcmp.eq.s32.totalorder %v7758_v56, %v7771_v62  ;;  %vm4636_vm4 = vcmp.eq.s32.totalorder %v7761_v58, %v7771_v62  ;;  %vm4696_vm5 = vcmp.eq.s32.totalorder %v7758_v56, %v7792_v11  ;;  %vm4697_vm6 = vcmp.eq.s32.totalorder %v7761_v58, %v7792_v11 }
 0xbf6   : > { %v4790_v36 = vadd.f32 %v4782_v32, %v4735_v30  ;;  %v4791_v37 = vadd.f32 %v4783_v33, %v4736_v31  ;;  %v5737_v38 = vsel %vm4635_vm3, 1.0, %v7022_v0  ;;  %v5738_v39 = vsel %vm4636_vm4, 1.0, %v7022_v0 }
 0xbf7   : > { %v4664_v40 = vmul.f32 %v5737_v38, %v7778_v3  ;;  %v4665_v41 = vmul.f32 %v5738_v39, %v7778_v3  ;;  %v5746_v43 = vsel %vm4696_vm5, 1.0, %v7022_v0  ;;  %v5747_v44 = vsel %vm4697_vm6, 1.0, %v7022_v0 }
 0xbf8   : > { %v4796_v42 = vpack.c.bf16 %v4791_v37, %v4790_v36  ;;  %vm4751_vm7 = vcmp.eq.s32.totalorder %v7758_v56, %v7794_v12  ;;  %v4725_v47 = vmul.f32 %v5746_v43, %v7780_v4  ;;  %v4726_v48 = vmul.f32 %v5747_v44, %v7780_v4 }
 0xbf9   : > { %v4672_v45 = vadd.f32 %v4664_v40, %v4611_v34  ;;  %v4673_v46 = vadd.f32 %v4665_v41, %v4612_v35  ;;  %vm4752_vm8 = vcmp.eq.s32.totalorder %v7761_v58, %v7794_v12  ;;  %v5755_v49 = vsel %vm4751_vm7, 1.0, %v7022_v0 }
 0xbfa   : > { %6723 = vmatpush3.bf16.msra.mxu1 %v4796_v42  ;;  %vm4580_vm9 = vcmp.eq.s32.totalorder %v7764_v59, %v7769_v61  ;;  %vm4581_vm10 = vcmp.eq.s32.totalorder %v7767_v60, %v7769_v61  ;;  %v5756_v52 = vsel %vm4752_vm8, 1.0, %v7022_v0  ;;  %v4780_v53 = vmul.f32 %v5755_v49, %v7782_v5 }
 0xbfb   : > { %6724 = vmatprep.subr.bf16.mxu1 %v7022_v0  ;;  %v4733_v50 = vadd.f32 %v4725_v47, %v4672_v45  ;;  %v4734_v51 = vadd.f32 %v4726_v48, %v4673_v46  ;;  %v4781_v54 = vmul.f32 %v5756_v52, %v7782_v5  ;;  %v5726_v55 = vsel %vm4580_vm9, 1.0, %v7022_v0  ;;  %v4840_v46 = vld [vmem:[%s8167_s7] sm:$0xff] }
 0xbfc   : > { %v5727_v56 = vsel %vm4581_vm10, 1.0, %v7022_v0  ;;  %vm4633_vm11 = vcmp.eq.s32.totalorder %v7764_v59, %v7771_v62  ;;  %v4609_v58 = vmul.f32 %v5726_v55, %v7776_v2  ;;  %vm4634_vm12 = vcmp.eq.s32.totalorder %v7767_v60, %v7771_v62 }
 0xbfd   : > { %v4788_v57 = vadd.f32 %v4780_v53, %v4733_v50  ;;  %v4610_v63 = vmul.f32 %v5727_v56, %v7776_v2  ;;  %v4789_v6 = vadd.f32 %v4781_v54, %v4734_v51  ;;  %v5735_v7 = vsel %vm4633_vm11, 1.0, %v7022_v0 }
 0xbfe   : > { %v5736_v9 = vsel %vm4634_vm12, 1.0, %v7022_v0  ;;  %vm4694_vm13 = vcmp.eq.s32.totalorder %v7764_v59, %v7792_v11  ;;  %v4662_v10 = vmul.f32 %v5735_v7, %v7778_v3  ;;  %vm4695_vm14 = vcmp.eq.s32.totalorder %v7767_v60, %v7792_v11 }
 0xbff   : > { %v4663_v13 = vmul.f32 %v5736_v9, %v7778_v3  ;;  %v5744_v15 = vsel %vm4694_vm13, 1.0, %v7022_v0  ;;  %v4795_v16 = vpack.c.bf16 %v4789_v6, %v4788_v57  ;;  %v5745_v17 = vsel %vm4695_vm14, 1.0, %v7022_v0 }
 0xc00   : > { %v4723_v18 = vmul.f32 %v5744_v15, %v7780_v4  ;;  %vm4749_vm15 = vcmp.eq.s32.totalorder %v7764_v59, %v7794_v12  ;;  %v4670_v19 = vadd.f32 %v4662_v10, %v4609_v58  ;;  %v4724_v21 = vmul.f32 %v5745_v17, %v7780_v4 }
 0xc01   : > { %v4671_v20 = vadd.f32 %v4663_v13, %v4610_v63  ;;  %vm4750_vm0 = vcmp.eq.s32.totalorder %v7767_v60, %v7794_v12  ;;  %6725 = vmatpush3.bf16.msra.mxu1 %v4795_v16  ;;  %v5753_v22 = vsel %vm4749_vm15, 1.0, %v7022_v0  ;;  %vm4578_vm3 = vcmp.eq.s32.totalorder %v7716_v14, %v7769_v61 }
 0xc02   : > { %v5754_v23 = vsel %vm4750_vm0, 1.0, %v7022_v0  ;;  %vm4579_vm4 = vcmp.eq.s32.totalorder %v7774_v1, %v7769_v61  ;;  %6726 = vmatprep.subr.bf16.mxu1 %v7022_v0  ;;  %v4731_v59 = vadd.f32 %v4723_v18, %v4670_v19  ;;  %v4778_v25 = vmul.f32 %v5753_v22, %v7782_v5 }
 0xc03   : > { %v4732_v24 = vadd.f32 %v4724_v21, %v4671_v20  ;;  %v4779_v26 = vmul.f32 %v5754_v23, %v7782_v5  ;;  %v5724_v60 = vsel %vm4578_vm3, 1.0, %v7022_v0  ;;  %v5725_v27 = vsel %vm4579_vm4, 1.0, %v7022_v0 }
 0xc04   : > { %vm4631_vm5 = vcmp.eq.s32.totalorder %v7716_v14, %v7771_v62  ;;  %vm4632_vm6 = vcmp.eq.s32.totalorder %v7774_v1, %v7771_v62  ;;  %v4786_v28 = vadd.f32 %v4778_v25, %v4731_v59  ;;  %v4607_v29 = vmul.f32 %v5724_v60, %v7776_v2 }
 0xc05   : > { %v4787_v61 = vadd.f32 %v4779_v26, %v4732_v24  ;;  %v4608_v30 = vmul.f32 %v5725_v27, %v7776_v2  ;;  %v5733_v31 = vsel %vm4631_vm5, 1.0, %v7022_v0  ;;  %v5734_v32 = vsel %vm4632_vm6, 1.0, %v7022_v0 }
 0xc06   : > { %vm4692_vm7 = vcmp.eq.s32.totalorder %v7716_v14, %v7792_v11  ;;  %vm4693_vm8 = vcmp.eq.s32.totalorder %v7774_v1, %v7792_v11  ;;  %v4660_v34 = vmul.f32 %v5733_v31, %v7778_v3  ;;  %v4661_v62 = vmul.f32 %v5734_v32, %v7778_v3  ;;  %v5079_v32 = vld [vmem:[%s8170_s10 + $0x10] sm:$0xff] }
 0xc07   : > { %v4794_v33 = vpack.c.bf16 %v4787_v61, %v4786_v28  ;;  %v5742_v35 = vsel %vm4692_vm7, 1.0, %v7022_v0  ;;  %v5743_v36 = vsel %vm4693_vm8, 1.0, %v7022_v0  ;;  %vm4747_vm9 = vcmp.eq.s32.totalorder %v7716_v14, %v7794_v12 }
 0xc08   : > { %v4721_v2 = vmul.f32 %v5742_v35, %v7780_v4  ;;  %vm4748_vm10 = vcmp.eq.s32.totalorder %v7774_v1, %v7794_v12  ;;  %v4668_v11 = vadd.f32 %v4660_v34, %v4607_v29  ;;  %v4669_v37 = vadd.f32 %v4661_v62, %v4608_v30  ;;  %v6926_v12 = vld [vmem:[%s7187_s28] sm:$0xff]  ;;  %s7025_s28 = smov 72  }
 0xc09   : > { %6727 = vmatpush3.bf16.msra.mxu1 %v4794_v33  ;;  %v4722_v38 = vmul.f32 %v5743_v36, %v7780_v4  ;;  %v5751_v3 = vsel %vm4747_vm9, 1.0, %v7022_v0  ;;  %v5752_v39 = vsel %vm4748_vm10, 1.0, %v7022_v0  ;;  %v4792_v45 = vpack.c.bf16 %v6926_v12, %v6926_v12  ;;  %v4844_v4 = vld [vmem:[%s8168_s8] sm:$0xff] }
 0xc0a   : > { %6728 = vmatprep.subr.bf16.mxu1 %v7022_v0  ;;  %v4729_v40 = vadd.f32 %v4721_v2, %v4668_v11  ;;  %v4776_v42 = vmul.f32 %v5751_v3, %v7782_v5  ;;  %v4777_v14 = vmul.f32 %v5752_v39, %v7782_v5  ;;  %4848 = vperm.xlu1 %6891, %v4844_v4   ;;  %vm4859_vm11 = vcmask 1043456   ;;  %v4841_v5 = vld [vmem:[%s8167_s7 + $0x8] sm:$0xff]  ;;  %v5077_v62 = vld [vmem:[%s8170_s10] sm:$0xff]  ;;  %v5080_v11 = vld [vmem:[%s8170_s10 + $0x18] sm:$0xff] }
 0xc0b   : > { %v4730_v41 = vadd.f32 %v4722_v38, %v4669_v37  ;;  %v4842_v50 = vpack.c.bf16 %v4841_v5, %v4840_v46 }
 0xc0c   : > { %v4784_v43 = vadd.f32 %v4776_v42, %v4729_v40  ;;  %v5078_v40 = vld [vmem:[%s8170_s10 + $0x8] sm:$0xff] }
 0xc0d   : > { %v4785_v44 = vadd.f32 %v4777_v14, %v4730_v41 }
 0xc0f   : > { %v4793_v1 = vpack.c.bf16 %v4785_v44, %v4784_v43  ;;  %v5083_v44 = vld [vmem:[%s8170_s10 + $0x30] sm:$0xff] }
 0xc11   : > { %6729 = vmatpush3.bf16.msra.mxu1 %v4793_v1 }
 0xc14   : > { %6731 = vmatmul.mubr.msk.bf16.vlgmr.msra.gmra.mxu1 %vm727_vm2, %v4792_v45 }
 0xc85   : > { %v4849_v53 = vpop.permute.xlu1 %4848 }
 0xcd4   : > { %v4834_v0 = vpop.f32.mrf.mxu1 }
 0xcd5   : > { %v4843_v47 = vpack.c.bf16 %v4834_v0, %v4834_v0 }
 0xcd6   : > { %v6732_v48 = vpop.f32.mrf.mxu1 }
 0xcd7   : > { %v4861_v49 = vsel %vm4859_vm11, %v4843_v47, 0  ;;  %v5081_v47 = vld [vmem:[%s8170_s10 + $0x20] sm:$0xff] }
 0xcd8   : > { %v4837_v51 = vpop.f32.mrf.mxu1  ;;  %6735 = vmatpush3.bf16.msra.mxu0 %v4861_v49 }
 0xcd9   : > { %v4845_v51 = vld [vmem:[%s8168_s8 + $0x8] sm:$0xff] }
 0xcda   : > { %v6733_v52 = vpop.f32.mrf.mxu1 }
 0xcdb   : > { %6737 = vmatmul.mubr.msk.bf16.vlgmr.msra.gmra.mxu0 %vm487_vm1, %v4842_v50 }
 0xd9b   : > { %v4897_v54 = vpop.f32.mrf.mxu0 }
 0xd9c   : > { %v4898_v55 = vadd.f32 %v4897_v54, %v4849_v53 }
 0xd9d   : > { %v6738_v56 = vpop.f32.mrf.mxu0 }
 0xd9e   : > { %4947 = vrot.lane.b32.xlu0 %v4898_v55, %s7025_s28  ;;  %4944 = vrot.lane.b32.xlu1 %v4898_v55, %s7026_s20 }
 0xd9f   : > { %v7935_v57 = vpop.f32.mrf.mxu0 }
 0xda1   : > { %v6739_v58 = vpop.f32.mrf.mxu0 }
 0xda2   : > { %4941 = vrot.lane.b32.xlu0 %v4898_v55, %s7027_s21  ;;  %4938 = vrot.lane.b32.xlu1 %v4898_v55, %s7028_s22 }
 0xda6   : > { %4935 = vrot.lane.b32.xlu0 %v4898_v55, %s8177_s5  ;;  %4932 = vrot.lane.b32.xlu1 %v4898_v55, %s8178_s25 }
 0xdaa   : > { %4907 = vrot.lane.b32.xlu0 %v7203_v8, %s8176_s26  ;;  %4929 = vrot.lane.b32.xlu1 %v4898_v55, %s8176_s26  ;;  %s6957_s26 = sshll.u32 %s7032_s15, 4  ;;  %s6958_s26 = int_to_ptr.vmem [resolvable:$false] %s6957_s26 }
 0xdae   : > { %4913 = vrot.lane.b32.xlu0 %v7203_v8, %s8177_s5  ;;  %4910 = vrot.lane.b32.xlu1 %v7203_v8, %s8178_s25  ;;  %s8195_s25 = smov 104  }
 0xdb2   : > { %4919 = vrot.lane.b32.xlu0 %v7203_v8, %s7027_s21  ;;  %4916 = vrot.lane.b32.xlu1 %v7203_v8, %s7028_s22 }
 0xdb6   : > { %4925 = vrot.lane.b32.xlu0 %v7203_v8, %s7025_s28  ;;  %4922 = vrot.lane.b32.xlu1 %v7203_v8, %s7026_s20 }
 0xe10   : > { %v4948_v63 = vpop.permute.xlu0 %4947  ;;  %v4945_v6 = vpop.permute.xlu1 %4944 }
 0xe11   : > { %v4979_v7 = vpack.c.bf16 %v4948_v63, %v4945_v6  ;;  %v4904_v63 = vld [vmem:[%s8169_s9] sm:$0xff] }
 0xe13   : > { %v5002_v9 = vsel %vm487_vm1, %v4979_v7, 0  ;;  %6814 = vmatprep.subr.msk.bf16.mxu1 %vm487_vm1, %v4979_v7 }
 0xe14   : > { %v4942_v10 = vpop.permute.xlu0 %4941  ;;  %6741 = vmatpush3.bf16.xpose.msra.mxu1 %v5002_v9  ;;  %v4939_v13 = vpop.permute.xlu1 %4938 }
 0xe15   : > { %v4978_v15 = vpack.c.bf16 %v4942_v10, %v4939_v13 }
 0xe17   : > { %6815 = vmatprep.subr.msk.bf16.mxu1 %vm487_vm1, %v4978_v15  ;;  %v4999_v18 = vsel %vm487_vm1, %v4978_v15, 0 }
 0xe18   : > { %v4936_v16 = vpop.permute.xlu0 %4935  ;;  %v4933_v17 = vpop.permute.xlu1 %4932 }
 0xe19   : > { %v4977_v19 = vpack.c.bf16 %v4936_v16, %v4933_v17 }
 0xe1b   : > { %v4996_v23 = vsel %vm487_vm1, %v4977_v19, 0 }
 0xe1c   : > { %v4908_v20 = vpop.permute.xlu0 %4907  ;;  %6743 = vmatpush3.bf16.xpose.msra.mxu1 %v4999_v18  ;;  %v4930_v22 = vpop.permute.xlu1 %4929 }
 0xe1d   : > { %v4972_v21 = vpack.c.bf16 %v4908_v20, %v7203_v8  ;;  %6816 = vmatprep.subr.msk.bf16.mxu1 %vm487_vm1, %v4977_v19  ;;  %v4976_v59 = vpack.c.bf16 %v4930_v22, %v4898_v55 }
 0xe1f   : > { %6748 = vmatprep.mubr.msk.bf16.mxu1 %vm487_vm1, %v4972_v21  ;;  %v4993_v26 = vsel %vm487_vm1, %v4976_v59, 0 }
 0xe20   : > { %v4914_v24 = vpop.permute.xlu0 %4913  ;;  %v4911_v25 = vpop.permute.xlu1 %4910 }
 0xe21   : > { %v4973_v28 = vpack.c.bf16 %v4914_v24, %v4911_v25 }
 0xe24   : > { %6745 = vmatpush3.bf16.xpose.msra.mxu1 %v4996_v23  ;;  %v4920_v60 = vpop.permute.xlu0 %4919  ;;  %v4917_v27 = vpop.permute.xlu1 %4916 }
 0xe25   : > { %6817 = vmatprep.subr.msk.bf16.mxu1 %vm487_vm1, %v4976_v59  ;;  %v4974_v8 = vpack.c.bf16 %v4920_v60, %v4917_v27  ;;  %v5084_v59 = vld [vmem:[%s8170_s10 + $0x38] sm:$0xff]  ;;  %v5082_v27 = vld [vmem:[%s8170_s10 + $0x28] sm:$0xff] }
 0xe28   : > { %v4926_v61 = vpop.permute.xlu0 %4925  ;;  %v4923_v29 = vpop.permute.xlu1 %4922 }
 0xe29   : > { %v4975_v30 = vpack.c.bf16 %v4926_v61, %v4923_v29 }
 0xe2c   : > { %6747 = vmatpush3.bf16.xpose.msra.mxu1 %v4993_v26 }
 0xe33   : > { %6749 = vmatmul.mubr.msk.bf16.vlgmr.msra.gmra.mxu1 %vm487_vm1, %v4973_v28 }
 0xe34   : > { %6752 = vmatprep.mubr.msk.bf16.mxu1 %vm487_vm1, %v4974_v8 }
 0xe3b   : > { %6753 = vmatmul.mubr.msk.bf16.gmra.mxu1 %vm487_vm1, %v4975_v30 }
 0xef3   : > { %v6750_v31 = vpop.f32.mrf.mxu1 }
 0xef4   : > { %v5071_v33 = vmul.f32 0.35355338, %v6750_v31 }
 0xef5   : > { %v5038_v34 = vpop.f32.mrf.mxu1 }
 0xef6   : > { %v5069_v35 = vmul.f32 0.35355338, %v5038_v34  ;;  %v5087_v36 = vadd.f32 %v5079_v32, %v5071_v33 }
 0xef7   : > { %v6751_v2 = vpop.f32.mrf.mxu1 }
 0xef8   : > { %v5072_v37 = vmul.f32 0.35355338, %v6751_v2  ;;  %v5099_v38 = vsel %vm727_vm2, %v5087_v36, -inf  ;;  %v5085_v3 = vadd.f32 %v5077_v62, %v5069_v35 }
 0xef9   : > { %5100 = vmax.xlane.f32.xlu0 %v5099_v38  ;;  %v5041_v39 = vpop.f32.mrf.mxu1 }
 0xefa   : > { %v5070_v41 = vmul.f32 0.35355338, %v5041_v39  ;;  %v5093_v42 = vsel %vm727_vm2, %v5085_v3, -inf  ;;  %v5088_v14 = vadd.f32 %v5080_v11, %v5072_v37 }
 0xefb   : > { %5094 = vmax.xlane.f32.xlu1 %v5093_v42  ;;  %v6754_v43 = vpop.f32.mrf.mxu1 }
 0xefc   : > { %v5075_v1 = vmul.f32 0.35355338, %v6754_v43  ;;  %v5086_v12 = vadd.f32 %v5078_v40, %v5070_v41  ;;  %v5102_v0 = vsel %vm727_vm2, %v5088_v14, -inf }
 0xefd   : > { %v5054_v45 = vpop.f32.mrf.mxu1 }
 0xefe   : > { %v5073_v4 = vmul.f32 0.35355338, %v5054_v45  ;;  %v5096_v46 = vsel %vm727_vm2, %v5086_v12, -inf  ;;  %v5091_v5 = vadd.f32 %v5083_v44, %v5075_v1 }
 0xeff   : > { %5103 = vmax.xlane.f32.xlu1 %v5102_v0  ;;  %5097 = vmax.xlane.f32.xlu0 %v5096_v46  ;;  %v6755_v16 = vpop.f32.mrf.mxu1 }
 0xf00   : > { %v5111_v48 = vsel %vm727_vm2, %v5091_v5, -inf  ;;  %v7992_v49 = vadd.f32 %v5081_v47, %v5073_v4  ;;  %v5076_v20 = vmul.f32 0.35355338, %v6755_v16 }
 0xf01   : > { %v5057_v21 = vpop.f32.mrf.mxu1 }
 0xf02   : > { %v5105_v50 = vsel %vm727_vm2, %v7992_v49, -inf  ;;  %v5074_v24 = vmul.f32 0.35355338, %v5057_v21  ;;  %v5092_v60 = vadd.f32 %v5084_v59, %v5076_v20 }
 0xf03   : > { %5112 = vmax.xlane.f32.xlu0 %v5111_v48 }
 0xf04   : > { %v5114_v8 = vsel %vm727_vm2, %v5092_v60, -inf  ;;  %v5090_v61 = vadd.f32 %v5082_v27, %v5074_v24 }
 0xf06   : > { %v5108_v29 = vsel %vm727_vm2, %v5090_v61, -inf }
 0xf07   : > { %5106 = vmax.xlane.f32.xlu0 %v5105_v50 }
 0xf1d   : > { %4853 = vperm.xlu0 %6890, %v4845_v51  }
 0xf82   : > { %v5101_v52 = vpop.xlane.xlu0 %5100 }
 0xf83   : > { %v5119_v15 = vsub.f32 %v5087_v36, %v5101_v52 }
 0xf85   : > { %v5129_v17 = vmul.f32 1.442695, %v5119_v15 }
 0xf88   : > { %v5098_v53 = vpop.xlane.xlu0 %5097 }
 0xf89   : > { %v5118_v25 = vsub.f32 %v5086_v12, %v5098_v53 }
 0xf8b   : > { %v5127_v28 = vmul.f32 1.442695, %v5118_v25 }
 0xf8c   : > { %v5113_v54 = vpop.xlane.xlu0 %5112 }
 0xf8d   : > { %v5123_v55 = vsub.f32 %v5091_v5, %v5113_v54 }
 0xf8f   : > { %v5137_v56 = vmul.f32 1.442695, %v5123_v55 }
 0xf90   : > { %v5107_v58 = vpop.xlane.xlu0 %5106 }
 0xf91   : > { %6894 = vpow2.f32 %v5137_v56  ;;  %v5121_v2 = vsub.f32 %v7992_v49, %v5107_v58 }
 0xf92   : > { %6896 = vpow2.f32 %v5129_v17 }
 0xf93   : > { %v5133_v11 = vmul.f32 1.442695, %v5121_v2  ;;  %v5268_v2 = vld [vmem:[%s8171_s11 + $0x10] sm:$0xff] }
 0xf98   : > { %v4854_v6 = vpop.permute.xlu0 %4853 }
 0xf99   : > { %v4901_v7 = vadd.f32 %v7935_v57, %v4854_v6  ;;  %v5095_v57 = vpop.xlane.xlu1 %5094 }
 0xf9a   : > { %v5117_v18 = vsub.f32 %v5085_v3, %v5095_v57 }
 0xf9b   : > { %v8003_v9 = vadd.f32 %v4904_v63, %v4901_v7 }
 0xf9c   : > { %v5125_v22 = vmul.f32 1.442695, %v5117_v18 }
 0xf9d   : > { %4966 = vrot.lane.b32.xlu1 %v8003_v9, %s7026_s20  ;;  %v5104_v19 = vpop.xlane.xlu1 %5103  ;;  %s5791_s20 = sshll.u32 %s7131_s17, 10 }
 0xf9e   : > { %v8007_v10 = vpop.eup %6894  ;;  %v5120_v23 = vsub.f32 %v5088_v14, %v5104_v19  ;;  %6898 = vpow2.f32 %v5125_v22 }
 0xf9f   : > { %v5159_v13 = vsel %vm727_vm2, %v8007_v10, 0.0  ;;  %v6897_v30 = vpop.eup %6896 }
 0xfa0   : > { %5160 = vadd.xlane.f32.xlu0 %v5159_v13  ;;  %v5131_v26 = vmul.f32 1.442695, %v5120_v23  ;;  %v5147_v31 = vsel %vm727_vm2, %v6897_v30, 0.0 }
 0xfa1   : > { %4969 = vrot.lane.b32.xlu1 %v8003_v9, %s7025_s28 }
 0xfa2   : > { %6900 = vpow2.f32 %v5131_v26 }
 0xfa3   : > { %6902 = vpow2.f32 %v5127_v28 }
 0xfa4   : > { %6904 = vpow2.f32 %v5133_v11  ;;  %v5269_v11 = vld [vmem:[%s8171_s11 + $0x18] sm:$0xff] }
 0xfa5   : > { %4960 = vrot.lane.b32.xlu1 %v8003_v9, %s7028_s22  ;;  %s8194_s22 = smov 112  }
 0xfab   : > { %v8026_v32 = vpop.eup %6898 }
 0xfac   : > { %v5141_v33 = vsel %vm727_vm2, %v8026_v32, 0.0 }
 0xfaf   : > { %v6901_v34 = vpop.eup %6900 }
 0xfb0   : > { %v5150_v62 = vsel %vm727_vm2, %v6901_v34, 0.0  ;;  %v6903_v35 = vpop.eup %6902 }
 0xfb1   : > { %v5144_v36 = vsel %vm727_vm2, %v6903_v35, 0.0  ;;  %v8037_v38 = vpop.eup %6904 }
 0xfb2   : > { %v5153_v40 = vsel %vm727_vm2, %v8037_v38, 0.0 }
 0xfb6   : > { %4963 = vrot.lane.b32.xlu0 %v8003_v9, %s7027_s21 }
 0xfc9   : > { %5115 = vmax.xlane.f32.xlu1 %v5114_v8 }
 0xfcd   : > { %5109 = vmax.xlane.f32.xlu1 %v5108_v29  ;;  %v5403_v29 = vld [vmem:[%s8172_s12] sm:$0xff] }
 0xfce   : > { %6800 = vmatprep.subr.mxu1 %v5403_v29 }
 0xfcf   : > { %6801 = vmatpush3.msra.mxu1 %v5403_v29 }
 0xfd1   : > { %5148 = vadd.xlane.f32.xlu1 %v5147_v31 }
 0xfd5   : > { %5142 = vadd.xlane.f32.xlu1 %v5141_v33 }
 0xfd9   : > { %5151 = vadd.xlane.f32.xlu1 %v5150_v62 }
 0xfdd   : > { %5145 = vadd.xlane.f32.xlu1 %v5144_v36  ;;  %v5267_v36 = vld [vmem:[%s8171_s11 + $0x8] sm:$0xff] }
 0xfee   : > { %4954 = vrot.lane.b32.xlu1 %v8003_v9, %s8194_s22  ;;  %s8112_s22 = scalar_lea.hbm %s8174_s14, %s5791_s20  ;;  %s6959_s20 = scalar_lea.vmem %s6958_s26, 2048 }
 0xff2   : > { %4957 = vrot.lane.b32.xlu1 %v8003_v9, %s8195_s25  ;;  %s471_s25 = sand.u32 1, %s7009_s30  }
 0xff3   : > { %s8120_s17 = scalar_lea.sflag [#allocation4], %s471_s25 }
0x100f   : > { %v4967_v37 = vpop.permute.xlu1 %4966 }
0x1013   : > { %v4970_v3 = vpop.permute.xlu1 %4969 }
0x1014   : > { %v5188_v39 = vpack.c.bf16 %v4970_v3, %v4967_v37  ;;  %v5270_v37 = vld [vmem:[%s8171_s11 + $0x20] sm:$0xff]  ;;  %v5272_v3 = vld [vmem:[%s8171_s11 + $0x30] sm:$0xff] }
0x1016   : > { %5154 = vadd.xlane.f32.xlu1 %v5153_v40  ;;  %6756 = vmatprep.subr.bf16.mxu0 %v5188_v39 }
0x1017   : > { %6757 = vmatpush3.bf16.msra.mxu0 %v5188_v39  ;;  %v4961_v42 = vpop.permute.xlu1 %4960  ;;  %v5273_v39 = vld [vmem:[%s8171_s11 + $0x38] sm:$0xff] }
0x1029   : > { %v5161_v41 = vpop.xlane.xlu0 %5160 }
0x102d   : > { %v4964_v14 = vpop.permute.xlu0 %4963 }
0x102e   : > { %v5187_v43 = vpack.c.bf16 %v4964_v14, %v4961_v42 }
0x1030   : > { %6758 = vmatprep.subr.bf16.mxu0 %v5187_v43 }
0x1031   : > { %6759 = vmatpush3.bf16.msra.mxu0 %v5187_v43 }
0x1052   : > { %v5116_v44 = vpop.xlane.xlu1 %5115 }
0x1053   : > { %v5124_v1 = vsub.f32 %v5092_v60, %v5116_v44 }
0x1055   : > { %v5139_v12 = vmul.f32 1.442695, %v5124_v1 }
0x1056   : > { %v5110_v45 = vpop.xlane.xlu1 %5109 }
0x1057   : > { %6906 = vpow2.f32 %v5139_v12  ;;  %v5122_v4 = vsub.f32 %v5090_v61, %v5110_v45  ;;  %v5777_v45 = vld [vmem:[%s8173_s13] ss:$0 sm:$0xff] }
0x1059   : > { %v5135_v0 = vmul.f32 1.442695, %v5122_v4 }
0x105a   : > { %v5149_v46 = vpop.xlane.xlu1 %5148 }
0x105b   : > { %6908 = vpow2.f32 %v5135_v0 }
0x105c   : > { %6910 = vrcp.f32 %v5149_v46 }
0x105e   : > { %v5143_v5 = vpop.xlane.xlu1 %5142 }
0x1062   : > { %v5152_v47 = vpop.xlane.xlu1 %5151 }
0x1063   : > { %6912 = vrcp.f32 %v5152_v47 }
0x1064   : > { %v6907_v48 = vpop.eup %6906  ;;  %6914 = vrcp.f32 %v5143_v5 }
0x1065   : > { %v5162_v49 = vsel %vm727_vm2, %v6907_v48, 0.0 }
0x1066   : > { %5163 = vadd.xlane.f32.xlu1 %v5162_v49  ;;  %v5146_v50 = vpop.xlane.xlu1 %5145 }
0x1067   : > { %6916 = vrcp.f32 %v5146_v50 }
0x1068   : > { %v6909_v51 = vpop.eup %6908 }
0x1069   : > { %v5156_v52 = vsel %vm727_vm2, %v6909_v51, 0.0  ;;  %v6911_v54 = vpop.eup %6910 }
0x106a   : > { %5157 = vadd.xlane.f32.xlu1 %v5156_v52  ;;  %v4955_v53 = vpop.permute.xlu1 %4954  ;;  %v5175_v63 = vmul.f32 %v6911_v54, %v6897_v30 }
0x106e   : > { %v4958_v55 = vpop.permute.xlu1 %4957 }
0x106f   : > { %v5186_v56 = vpack.c.bf16 %v4958_v55, %v4955_v53 }
0x1070   : > { %v6913_v58 = vpop.eup %6912 }
0x1071   : > { %6760 = vmatprep.subr.bf16.mxu0 %v5186_v56  ;;  %v5176_v6 = vmul.f32 %v6913_v58, %v6901_v34  ;;  %v6915_v7 = vpop.eup %6914 }
0x1072   : > { %6761 = vmatpush3.bf16.msra.mxu0 %v5186_v56  ;;  %v5173_v15 = vmul.f32 %v6915_v7, %v8026_v32 }
0x1073   : > { %v5182_v13 = vpack.c.bf16 %v5176_v6, %v5175_v63 }
0x1074   : > { %v6917_v57 = vpop.eup %6916 }
0x1075   : > { %v5174_v16 = vmul.f32 %v6917_v57, %v6903_v35 }
0x1077   : > { %v5181_v17 = vpack.c.bf16 %v5174_v16, %v5173_v15 }
0x1079   : > { %6764 = vmatprep.mubr.msk.bf16.mxu0 %vm727_vm2, %v5181_v17 }
0x107b   : > { %4951 = vrot.lane.b32.xlu1 %v8003_v9, %s8196_s27  ;;  %s5642_s27 = sshll.u32 %s471_s25, 6 }
0x107c   : > { %s473_s18 = scalar_lea.vmem [#allocation5], %s5642_s27 }
0x107d   : > { %s5562_s5 = sshll.u32 %s473_s18, 4  ;;  %s8114_s5 = int_to_ptr.vmem [resolvable:$true] %s5562_s5 }
0x107e   : > { %s6953_s27 = scalar_lea.vmem %s8114_s5, 1024  ;;  %p6960_p11 = scmp.lt.s32.totalorder %s8114_s5, %s6958_s26 }
0x107f   : > { %p6954_p6 = scmp.ne.s32.totalorder %s8114_s5, %s6953_s27  ;;  %p6961_p12 = scmp.lt.s32.totalorder %s6959_s20, %s6953_s27 }
0x1081   : > { %p6955_p9 = pnand %p6954_p6, %p7148_p5  ;;  %p6962_p13 = por %p6961_p12, %p6960_p11 }
0x1083   : > { %p6956_p10 = pneg %p6955_p9 }
0x1085   : > { %p6963_p0 = pnand %p6962_p13, %p6956_p10 }
0x109f   : > { %v5155_v18 = vpop.xlane.xlu1 %5154 }
0x10ef   : > { %v5164_v19 = vpop.xlane.xlu1 %5163 }
0x10f0   : > { %6918 = vrcp.f32 %v5164_v19 }
0x10f1   : > { %6920 = vrcp.f32 %v5155_v18 }
0x10f2   : > { %6922 = vrcp.f32 %v5161_v41 }
0x10f3   : > { %v5158_v20 = vpop.xlane.xlu1 %5157 }
0x10f4   : > { %6924 = vrcp.f32 %v5158_v20 }
0x10f7   : > { %v4952_v21 = vpop.permute.xlu1 %4951 }
0x10f8   : > { %v5185_v22 = vpack.c.bf16 %v4952_v21, %v8003_v9  ;;  %v5266_v9 = vld [vmem:[%s8171_s11] sm:$0xff] }
0x10fa   : > { %6762 = vmatprep.subr.bf16.mxu0 %v5185_v22 }
0x10fb   : > { %6763 = vmatpush3.bf16.msra.mxu0 %v5185_v22 }
0x10fd   : > { %v6919_v23 = vpop.eup %6918 }
0x10fe   : > { %6765 = vmatmul.mubr.msk.bf16.vlgmr.msra.gmra.mxu0 %vm727_vm2, %v5182_v13  ;;  %v6921_v59 = vpop.eup %6920  ;;  %v5180_v26 = vmul.f32 %v6919_v23, %v6907_v48 }
0x10ff   : > { %v6923_v24 = vpop.eup %6922  ;;  %v5177_v60 = vmul.f32 %v6921_v59, %v8037_v38  ;;  %v5271_v38 = vld [vmem:[%s8171_s11 + $0x28] sm:$0xff] }
0x1100   : > { %v5179_v28 = vmul.f32 %v6923_v24, %v8007_v10 }
0x1101   : > { %v6925_v25 = vpop.eup %6924 }
0x1102   : > { %v5178_v27 = vmul.f32 %v6925_v25, %v6909_v51  ;;  %v5184_v61 = vpack.c.bf16 %v5180_v26, %v5179_v28 }
0x1104   : > { %v5183_v8 = vpack.c.bf16 %v5178_v27, %v5177_v60 }
0x1106   : > { %6768 = vmatprep.mubr.msk.bf16.mxu0 %vm727_vm2, %v5183_v8 }
0x1107   : > { %6769 = vmatmul.mubr.msk.bf16.gmra.mxu0 %vm727_vm2, %v5184_v61 }
0x1108   : > { %6788 = vmatprep.mubr.msk.f32.mxu0 %vm727_vm2, %v5266_v9 }
0x11be   : > { %v6766_v30 = vpop.f32.mrf.mxu0 }
0x11c0   : > { %v5235_v10 = vpop.f32.mrf.mxu0 }
0x11c2   : > { %v6767_v31 = vpop.f32.mrf.mxu0 }
0x11c4   : > { %v5238_v32 = vpop.f32.mrf.mxu0 }
0x11c7   : > { %v6770_v33 = vpop.f32.mrf.mxu0 }
0x11c9   : > { %v5251_v34 = vpop.f32.mrf.mxu0 }
0x11cb   : > { %v6771_v62 = vpop.f32.mrf.mxu0 }
0x11cc   : > { %6772 = vmatprep.subr.mxu0 %v6771_v62 }
0x11cd   : > { %6773 = vmatpush3.msra.mxu0 %v6771_v62  ;;  %v5254_v35 = vpop.f32.mrf.mxu0 }
0x11ce   : > { %6774 = vmatprep.subr.mxu0 %v6770_v33 }
0x11cf   : > { %6775 = vmatpush3.msra.mxu0 %v6770_v33 }
0x11d0   : > { %6776 = vmatprep.subr.mxu0 %v5254_v35 }
0x11d1   : > { %6777 = vmatpush3.msra.mxu0 %v5254_v35 }
0x11d2   : > { %6778 = vmatprep.subr.mxu0 %v5251_v34 }
0x11d3   : > { %6779 = vmatpush3.msra.mxu0 %v5251_v34 }
0x11d4   : > { %6780 = vmatprep.subr.mxu0 %v6767_v31 }
0x11d5   : > { %6781 = vmatpush3.msra.mxu0 %v6767_v31 }
0x11d6   : > { %6782 = vmatprep.subr.mxu0 %v6766_v30 }
0x11d7   : > { %6783 = vmatpush3.msra.mxu0 %v6766_v30 }
0x11d8   : > { %6784 = vmatprep.subr.mxu0 %v5238_v32 }
0x11d9   : > { %6785 = vmatpush3.msra.mxu0 %v5238_v32 }
0x11da   : > { %6786 = vmatprep.subr.mxu0 %v5235_v10 }
0x11db   : > { %6787 = vmatpush3.msra.mxu0 %v5235_v10 }
0x11dc   : > { %6789 = vmatmul.mubr.msk.f32.vlgmr.msra.gmra.mxu0 %vm727_vm2, %v5267_v36 }
0x11dd   : > { %6791 = vmatprep.mubr.msk.f32.mxu0 %vm727_vm2, %v5268_v2 }
0x11e0   : > { %6792 = vmatmul.mubr.msk.f32.gmra.mxu0 %vm727_vm2, %v5269_v11 }
0x11e1   : > { %6794 = vmatprep.mubr.msk.f32.mxu0 %vm727_vm2, %v5270_v37 }
0x11e4   : > { %6795 = vmatmul.mubr.msk.f32.gmra.mxu0 %vm727_vm2, %v5271_v38 }
0x11e5   : > { %6797 = vmatprep.mubr.msk.f32.mxu0 %vm727_vm2, %v5272_v3 }
0x11e8   : > { %6798 = vmatmul.mubr.msk.f32.gmra.mxu0 %vm727_vm2, %v5273_v39 }
0x129c   : > { %v6790_v40 = vpop.f32.mrf.mxu0 }
0x129e   : > { %v5364_v41 = vpop.f32.mrf.mxu0 }
0x129f   : > { %6802 = vmatprep.mubr.msk.f32.mxu1 %vm487_vm1, %v5364_v41 }
0x12a0   : > { %v6793_v42 = vpop.f32.mrf.mxu0  ;;  %6803 = vmatmul.mubr.msk.f32.vlgmr.msra.gmra.mxu1 %vm487_vm1, %v6790_v40 }
0x12a2   : > { %v5374_v14 = vpop.f32.mrf.mxu0 }
0x12a3   : > { %6805 = vmatprep.mubr.msk.f32.mxu1 %vm487_vm1, %v5374_v14 }
0x12a4   : > { %v6796_v43 = vpop.f32.mrf.mxu0  ;;  %6806 = vmatmul.mubr.msk.f32.gmra.mxu1 %vm487_vm1, %v6793_v42 }
0x12a6   : > { %v5384_v44 = vpop.f32.mrf.mxu0 }
0x12a7   : > { %6808 = vmatprep.mubr.msk.f32.mxu1 %vm487_vm1, %v5384_v44 }
0x12a8   : > { %v6799_v1 = vpop.f32.mrf.mxu0  ;;  %6809 = vmatmul.mubr.msk.f32.gmra.mxu1 %vm487_vm1, %v6796_v43 }
0x12aa   : > { %v5394_v12 = vpop.f32.mrf.mxu0 }
0x12ab   : > { %6811 = vmatprep.mubr.msk.f32.mxu1 %vm487_vm1, %v5394_v12 }
0x12ac   : > { %6812 = vmatmul.mubr.msk.f32.gmra.mxu1 %vm487_vm1, %v6799_v1 }
0x1360   : > { %v6804_v4 = vpop.f32.mrf.mxu1 }
0x1361   : > { %v5507_v0 = vadd.f32 %v6804_v4, %v5777_v45 }
0x1362   : > { %v5501_v46 = vpop.f32.mrf.mxu1 }
0x1363   : > { %5541 = vst.msk [vmem:[%s473_s18 + $0x8] sm:$0xff] %vm487_vm1, %v5507_v0  ;;  %v5502_v5 = vadd.f32 %v5777_v45, %v5501_v46 }
0x1364   : > { %v6807_v47 = vpop.f32.mrf.mxu1 }
0x1365   : > { %5540 = vst.msk [vmem:[%s473_s18] sm:$0xff] %vm487_vm1, %v5502_v5  ;;  %v5517_v48 = vadd.f32 %v6807_v47, %v5777_v45 }
0x1366   : > { %v5511_v49 = vpop.f32.mrf.mxu1 }
0x1367   : > { %5543 = vst.msk [vmem:[%s473_s18 + $0x18] sm:$0xff] %vm487_vm1, %v5517_v48  ;;  %v5512_v50 = vadd.f32 %v5777_v45, %v5511_v49 }
0x1368   : > { %v6810_v51 = vpop.f32.mrf.mxu1 }
0x1369   : > { %5542 = vst.msk [vmem:[%s473_s18 + $0x10] sm:$0xff] %vm487_vm1, %v5512_v50  ;;  %v5527_v52 = vadd.f32 %v6810_v51, %v5777_v45 }
0x136a   : > { %v5521_v53 = vpop.f32.mrf.mxu1 }
0x136b   : > { %5545 = vst.msk [vmem:[%s473_s18 + $0x28] sm:$0xff] %vm487_vm1, %v5527_v52  ;;  %v5522_v54 = vadd.f32 %v5777_v45, %v5521_v53 }
0x136c   : > { %v6813_v55 = vpop.f32.mrf.mxu1 }
0x136d   : > { %5544 = vst.msk [vmem:[%s473_s18 + $0x20] sm:$0xff] %vm487_vm1, %v5522_v54  ;;  %v5537_v56 = vadd.f32 %v6813_v55, %v5777_v45 }
0x136e   : > { %v5531_v58 = vpop.f32.mrf.mxu1 }
0x136f   : > { %5547 = vst.msk [vmem:[%s473_s18 + $0x38] sm:$0xff] %vm487_vm1, %v5537_v56  ;;  %v5532_v63 = vadd.f32 %v5777_v45, %v5531_v58 }
0x1371   : > { %5546 = vst.msk [vmem:[%s473_s18 + $0x30] sm:$0xff] %vm487_vm1, %v5532_v63 }
0x1372   : > { %6966 = shalt.err (!%p6963_p0)
}
0x1373   : > { %s6967_s25 = scalar_lea.hbm %s8112_s22, 1024  ;;  %s6971_s21 = scalar_lea.hbm %s8174_s14, 2048 }
0x1374   : > { %p6968_p1 = scmp.ne.s32.totalorder %s8112_s22, %s6967_s25  ;;  %p6972_p4 = scmp.lt.s32.totalorder %s8112_s22, %s8174_s14 }
0x1375   : > { %p6973_p7 = scmp.lt.s32.totalorder %s6971_s21, %s6967_s25 }
0x1376   : > { %p6969_p2 = pnand %p6968_p1, %p7148_p5 }
0x1377   : > { %p6974_p8 = por %p6973_p7, %p6972_p4 }
0x1378   : > { %p6970_p3 = pneg %p6969_p2 }
0x137a   : > { %p6975_p6 = pnand %p6974_p8, %p6970_p3 }
0x137c   : > { %6978 = shalt.err (!%p6975_p6)
}
0x137d   : > { %s7033_s27 = smov 128   ;;  %s7034_s26 = smov 8  }
0x137e   : > { %6830 = dma.vmem_to_hbm [thread:$0]  (%p7148_p5), %s8114_s5, 1024, %s8112_s22, %s8120_s17, %s7033_s27, %s7033_s27, %s7034_s26  }
0x137f PF: > { %p6842_p9 = scmp.ge.s32.totalorder %s7017_s16, 2  ;;  %s5577_s20 = sand.u32 1, %s7005_s29  }
0x1380   : > { %p8197_p10 = scmp.ne.s32.totalorder %s8184_s24, 0  ;;  %s5578_s0 = scalar_lea.sflag [#allocation4], %s5577_s20 }
0x1382   : > { %p6837_p11 = pnand %p6842_p9, %p8197_p10 }
0x1384   : > { %p6838_p12 = pneg %p6837_p11 }
0x1386   : > { %7000 = dma.done.wait (%p6838_p12), %s5578_s0, 1024  }
0x1387   : > { %7002 = vsyncadd (%p6838_p12), %s5578_s0, 4294966272  ;;  %s8198_s25 = sld [smem:[#allocation8_spill]]  ;;  %p25_p13 = scmp.ge.s32.totalorder %s7135_s19, 4  }
0x1388   : > { %s8199_s15 = sld [smem:[#allocation9_spill]]  ;;  %s8200_s29 = smov %s7009_s30 }
0x1389   : > { %s8202_s16 = smov %s7135_s19  ;;  %27 = sbr.rel (!%p25_p13) target bundleno = 7 (0x7), region = 164 }
0x138d   : > { %s8201_s30 = smov %s8198_s25 }
0x138e   :  { %5583 = vsyncpa [#allocation3], 1 }
0x138f   :  { %5585 = vsyncpa [#allocation3 + $0x1], 1 }
0x1390   :  { %5586 = vsyncpa [#allocation4], 1 }
0x1391   :  { %5588 = vsyncpa [#allocation4 + $0x1], 1 }

</bundles_post_ra>
